<compile_context>
chip_gen: v6e
topology: v6e:2x2x1
jax: 0.10.0
libtpu: 0.0.40
codegen_flags: <defaults>
</compile_context>

<pallas_src>
import functools
import math

import jax
import jax.numpy as jnp
from jax.experimental import pallas as pl
from jax.experimental.pallas import tpu as pltpu


N_CLASSES = 10
MAX_BATCH_TILE = 256  # rows per grid step; sized for v7x's smaller VMEM too


def _round_up(x, m):
    return (x + m - 1) // m * m


# ----------------------------- parameter init -----------------------------

def ml_kappa(dim, eps):
    # PowerSpherical mean resultant length is kappa / (kappa + dim - 1); pick
    # kappa so that it equals (1 - eps)  =>  kappa = (dim - 1) * (1 - eps) / eps.
    return (dim - 1) * (1.0 - eps) / eps


def init_fake_linear_params(key, in_features, out_features, eps):
    k_dir, k_w, k_b = jax.random.split(key, 3)
    # kaiming_normal_ then L2-row-normalize (as in FakeLinear.__init__)
    dir_loc = jax.random.normal(k_dir, (out_features, in_features), jnp.float32)
    dir_loc = dir_loc * math.sqrt(2.0 / in_features)
    dir_loc = dir_loc / jnp.sqrt(jnp.sum(dir_loc ** 2, axis=-1, keepdims=True))
    # concentration = softplus(softplus_inv(ml_kappa)) = ml_kappa (constant/row)
    kappa = ml_kappa(in_features, eps)
    mean_scale = kappa / (kappa + in_features - 1.0)
    mean_dir = dir_loc * mean_scale                       # PowerSpherical(...).mean
    # rad_layer = nn.Linear(in, out): kaiming-uniform-ish deterministic init
    bound = 1.0 / math.sqrt(in_features)
    rad_w = jax.random.uniform(k_w, (out_features, in_features), jnp.float32,
                               minval=-bound, maxval=bound)
    rad_b = jax.random.uniform(k_b, (out_features,), jnp.float32,
                               minval=-bound, maxval=bound)
    bias = jnp.zeros((out_features,), jnp.float32)        # uniform_(0, 0)

    # ---- pack into padded, lane-dense, concatenated kernel-side params ----
    k_pad = _round_up(in_features, 128)
    n_pad = _round_up(out_features, 128)
    # w_cat = [ mean_dir.T | rad_w.T ]  with zero padding everywhere else.
    w_cat = jnp.zeros((k_pad, 2 * n_pad), jnp.float32)
    w_cat = w_cat.at[:in_features, :out_features].set(mean_dir.T)
    w_cat = w_cat.at[:in_features, n_pad:n_pad + out_features].set(rad_w.T)
    # b_cat row 0 = rad_b (pre-softplus bias), row 1 = bias (post-product).
    b_cat = jnp.zeros((2, n_pad), jnp.float32)
    b_cat = b_cat.at[0, :out_features].set(rad_b)
    b_cat = b_cat.at[1, :out_features].set(bias)
    return {
        "w": w_cat.astype(jnp.bfloat16),   # [k_pad, 2 * n_pad], bf16 for MXU
        "b": b_cat,                        # [2, n_pad], f32
    }


def init_model_params(key, eps=0.1):
    k1, k2, k3 = jax.random.split(key, 3)
    return {
        "fc1": init_fake_linear_params(k1, 784, 400, eps),
        "fc2": init_fake_linear_params(k2, 400, 400, eps),
        "fc3": init_fake_linear_params(k3, 400, 10, eps),
    }


# ------------------------------- Pallas kernel -----------------------------

def _softplus(x):
    # numerically stable softplus (EUP exp/log1p + VPU max)
    return jnp.maximum(x, 0.0) + jnp.log1p(jnp.exp(-jnp.abs(x)))


def fused_mlp_kernel(x_ref, w1_ref, b1_ref, w2_ref, b2_ref, w3_ref, b3_ref,
                     o_ref):
    # x: [TB, K1p] f32; wN: [Kp, 2*Np] bf16; bN: [2, Np] f32; o: [TB, Op] f32
    def layer(x_f32, w_ref, b_ref, relu):
        n = w_ref.shape[1] // 2
        # one wide MXU dot covers both the projection and the radius pre-act
        z = jnp.dot(x_f32.astype(jnp.bfloat16), w_ref[...],
                    preferred_element_type=jnp.float32)
        b = b_ref[...]
        proj = z[:, :n]                                   # x @ mean_dir.T
        radius = _softplus(z[:, n:] + b[0:1, :])          # softplus(x@radW.T + rad_b)
        out = radius * proj + b[1:2, :]                   # + bias
        if relu:
            out = jnp.maximum(out, 0.0)
        return out

    h = layer(x_ref[...], w1_ref, b1_ref, relu=True)      # ReLU(fc1)
    h = layer(h, w2_ref, b2_ref, relu=True)               # ReLU(fc2)
    o_ref[...] = layer(h, w3_ref, b3_ref, relu=False).astype(o_ref.dtype)


def _fused_forward(x_pad, params, tb):
    b_pad, k_pad = x_pad.shape
    w1, b1 = params["fc1"]["w"], params["fc1"]["b"]
    w2, b2 = params["fc2"]["w"], params["fc2"]["b"]
    w3, b3 = params["fc3"]["w"], params["fc3"]["b"]
    o_pad = w3.shape[1] // 2
    grid = b_pad // tb

    const2d = lambda i: (0, 0)  # weights/biases: same (full) block every step
    return pl.pallas_call(
        fused_mlp_kernel,
        out_shape=jax.ShapeDtypeStruct((b_pad, o_pad), jnp.float32),
        grid_spec=pl.GridSpec(
            grid=(grid,),
            in_specs=[
                pl.BlockSpec((tb, k_pad), lambda i: (i, 0)),   # x: tiled on batch
                pl.BlockSpec(w1.shape, const2d),
                pl.BlockSpec(b1.shape, const2d),
                pl.BlockSpec(w2.shape, const2d),
                pl.BlockSpec(b2.shape, const2d),
                pl.BlockSpec(w3.shape, const2d),
                pl.BlockSpec(b3.shape, const2d),
            ],
            out_specs=pl.BlockSpec((tb, o_pad), lambda i: (i, 0)),
        ),
        compiler_params=pltpu.CompilerParams(
            dimension_semantics=("parallel",)),
    )(x_pad, w1, b1, w2, b2, w3, b3)


# --------------------------------- Model ----------------------------------

@jax.jit
def model_forward(params, inp):
    # inp: NCHW [B, 1, 28, 28] -> flatten to [B, 784] (input.view(B, -1))
    b = inp.shape[0]
    x = inp.reshape(b, -1).astype(jnp.float32)
    k = x.shape[1]
    k_pad = params["fc1"]["w"].shape[0]

    # batch tiling: pad batch to a multiple of the tile (>= 8 sublanes)
    if b <= MAX_BATCH_TILE:
        b_pad = _round_up(b, 8)
        tb = b_pad
    else:
        tb = MAX_BATCH_TILE
        b_pad = _round_up(b, tb)

    x_pad = jnp.zeros((b_pad, k_pad), jnp.float32).at[:b, :k].set(x)
    out_pad = _fused_forward(x_pad, params, tb)
    return out_pad[:b, :N_CLASSES]
# TODO(synk): sample=True path (PowerSpherical rsample) not implemented; only
# the deterministic sample=False forward (distribution mean) is reproduced.


if __name__ == "__main__":
    key = jax.random.PRNGKey(0)
    k_param, k_in = jax.random.split(key)
    params = init_model_params(k_param, eps=0.1)
    # batch=2, MNIST-shaped input (in_features=784 is fixed by the module)
    x = jax.random.normal(k_in, (2, 1, 28, 28), jnp.float32)
    out = model_forward(params, x)
    jax.block_until_ready(out)
    assert out.shape == (2, 10) and out.dtype == jnp.float32
    assert bool(jnp.all(jnp.isfinite(out)))
    print("KERNEL_OK")
</pallas_src>

<mosaic_0001>
module attributes {stable_mosaic.version = 11 : i64} {
  func.func @fused_mlp_kernel(%arg0: i32, %arg1: memref<8x896xf32, #tpu.memory_space<vmem>>, %arg2: memref<896x1024xbf16, #tpu.memory_space<vmem>>, %arg3: memref<2x512xf32, #tpu.memory_space<vmem>>, %arg4: memref<512x1024xbf16, #tpu.memory_space<vmem>>, %arg5: memref<2x512xf32, #tpu.memory_space<vmem>>, %arg6: memref<512x256xbf16, #tpu.memory_space<vmem>>, %arg7: memref<2x128xf32, #tpu.memory_space<vmem>>, %arg8: memref<8x128xf32, #tpu.memory_space<vmem>>) attributes {dimension_semantics = [#tpu.dimension_semantics<parallel>], iteration_bounds = array<i64: 1>, scalar_prefetch = 0 : i64, scratch_operands = 0 : i64, tpu.core_type = #tpu.core_type<tc>, window_params = [{transform_indices = @transform_0, window_bounds = array<i64: 8, 896>}, {pipeline_mode = #tpu.pipeline_mode<synchronous>, transform_indices = @transform_1, window_bounds = array<i64: 896, 1024>}, {pipeline_mode = #tpu.pipeline_mode<synchronous>, transform_indices = @transform_2, window_bounds = array<i64: 2, 512>}, {pipeline_mode = #tpu.pipeline_mode<synchronous>, transform_indices = @transform_3, window_bounds = array<i64: 512, 1024>}, {pipeline_mode = #tpu.pipeline_mode<synchronous>, transform_indices = @transform_4, window_bounds = array<i64: 2, 512>}, {pipeline_mode = #tpu.pipeline_mode<synchronous>, transform_indices = @transform_5, window_bounds = array<i64: 512, 256>}, {pipeline_mode = #tpu.pipeline_mode<synchronous>, transform_indices = @transform_6, window_bounds = array<i64: 2, 128>}, {transform_indices = @transform_7, window_bounds = array<i64: 8, 128>}]} {
    %c0 = arith.constant 0 : index
    %c0_0 = arith.constant 0 : index
    %0 = vector.load %arg1[%c0, %c0_0] : memref<8x896xf32, #tpu.memory_space<vmem>>, vector<8x896xf32>
    %1 = arith.truncf %0 : vector<8x896xf32> to vector<8x896xbf16>
    %c0_1 = arith.constant 0 : index
    %c0_2 = arith.constant 0 : index
    %2 = vector.load %arg2[%c0_1, %c0_2] : memref<896x1024xbf16, #tpu.memory_space<vmem>>, vector<896x1024xbf16>
    %cst = arith.constant dense<0.000000e+00> : vector<8x1024xf32>
    %3 = tpu.matmul %1, %2, %cst {dimension_numbers = #tpu.dot_dimension_numbers<[1], [0], [0], [1], [0, 0, 1, 1], [], []>} : vector<8x896xbf16>, vector<896x1024xbf16>, vector<8x1024xf32> -> vector<8x1024xf32>
    %c0_3 = arith.constant 0 : index
    %c0_4 = arith.constant 0 : index
    %4 = vector.load %arg3[%c0_3, %c0_4] : memref<2x512xf32, #tpu.memory_space<vmem>>, vector<2x512xf32>
    %5 = vector.extract_strided_slice %3 {offsets = [0, 0], sizes = [8, 512], strides = [1, 1]} : vector<8x1024xf32> to vector<8x512xf32>
    %6 = vector.extract_strided_slice %3 {offsets = [0, 512], sizes = [8, 512], strides = [1, 1]} : vector<8x1024xf32> to vector<8x512xf32>
    %7 = vector.extract_strided_slice %4 {offsets = [0, 0], sizes = [1, 512], strides = [1, 1]} : vector<2x512xf32> to vector<1x512xf32>
    %8 = vector.broadcast %7 : vector<1x512xf32> to vector<8x512xf32>
    %9 = arith.addf %6, %8 : vector<8x512xf32>
    %cst_5 = arith.constant 0.000000e+00 : f32
    %10 = vector.broadcast %cst_5 : f32 to vector<8x512xf32>
    %11 = arith.maximumf %9, %10 : vector<8x512xf32>
    %12 = math.absf %9 : vector<8x512xf32>
    %cst_6 = arith.constant 0.000000e+00 : f32
    %13 = vector.broadcast %cst_6 : f32 to vector<8x512xf32>
    %14 = arith.subf %13, %12 : vector<8x512xf32>
    %15 = math.exp %14 : vector<8x512xf32>
    %16 = math.log1p %15 : vector<8x512xf32>
    %17 = arith.addf %11, %16 : vector<8x512xf32>
    %18 = arith.mulf %17, %5 : vector<8x512xf32>
    %19 = vector.extract_strided_slice %4 {offsets = [1, 0], sizes = [1, 512], strides = [1, 1]} : vector<2x512xf32> to vector<1x512xf32>
    %20 = vector.broadcast %19 : vector<1x512xf32> to vector<8x512xf32>
    %21 = arith.addf %18, %20 : vector<8x512xf32>
    %cst_7 = arith.constant 0.000000e+00 : f32
    %22 = vector.broadcast %cst_7 : f32 to vector<8x512xf32>
    %23 = arith.maximumf %21, %22 : vector<8x512xf32>
    %24 = arith.truncf %23 : vector<8x512xf32> to vector<8x512xbf16>
    %c0_8 = arith.constant 0 : index
    %c0_9 = arith.constant 0 : index
    %25 = vector.load %arg4[%c0_8, %c0_9] : memref<512x1024xbf16, #tpu.memory_space<vmem>>, vector<512x1024xbf16>
    %cst_10 = arith.constant dense<0.000000e+00> : vector<8x1024xf32>
    %26 = tpu.matmul %24, %25, %cst_10 {dimension_numbers = #tpu.dot_dimension_numbers<[1], [0], [0], [1], [0, 0, 1, 1], [], []>} : vector<8x512xbf16>, vector<512x1024xbf16>, vector<8x1024xf32> -> vector<8x1024xf32>
    %c0_11 = arith.constant 0 : index
    %c0_12 = arith.constant 0 : index
    %27 = vector.load %arg5[%c0_11, %c0_12] : memref<2x512xf32, #tpu.memory_space<vmem>>, vector<2x512xf32>
    %28 = vector.extract_strided_slice %26 {offsets = [0, 0], sizes = [8, 512], strides = [1, 1]} : vector<8x1024xf32> to vector<8x512xf32>
    %29 = vector.extract_strided_slice %26 {offsets = [0, 512], sizes = [8, 512], strides = [1, 1]} : vector<8x1024xf32> to vector<8x512xf32>
    %30 = vector.extract_strided_slice %27 {offsets = [0, 0], sizes = [1, 512], strides = [1, 1]} : vector<2x512xf32> to vector<1x512xf32>
    %31 = vector.broadcast %30 : vector<1x512xf32> to vector<8x512xf32>
    %32 = arith.addf %29, %31 : vector<8x512xf32>
    %cst_13 = arith.constant 0.000000e+00 : f32
    %33 = vector.broadcast %cst_13 : f32 to vector<8x512xf32>
    %34 = arith.maximumf %32, %33 : vector<8x512xf32>
    %35 = math.absf %32 : vector<8x512xf32>
    %cst_14 = arith.constant 0.000000e+00 : f32
    %36 = vector.broadcast %cst_14 : f32 to vector<8x512xf32>
    %37 = arith.subf %36, %35 : vector<8x512xf32>
    %38 = math.exp %37 : vector<8x512xf32>
    %39 = math.log1p %38 : vector<8x512xf32>
    %40 = arith.addf %34, %39 : vector<8x512xf32>
    %41 = arith.mulf %40, %28 : vector<8x512xf32>
    %42 = vector.extract_strided_slice %27 {offsets = [1, 0], sizes = [1, 512], strides = [1, 1]} : vector<2x512xf32> to vector<1x512xf32>
    %43 = vector.broadcast %42 : vector<1x512xf32> to vector<8x512xf32>
    %44 = arith.addf %41, %43 : vector<8x512xf32>
    %cst_15 = arith.constant 0.000000e+00 : f32
    %45 = vector.broadcast %cst_15 : f32 to vector<8x512xf32>
    %46 = arith.maximumf %44, %45 : vector<8x512xf32>
    %47 = arith.truncf %46 : vector<8x512xf32> to vector<8x512xbf16>
    %c0_16 = arith.constant 0 : index
    %c0_17 = arith.constant 0 : index
    %48 = vector.load %arg6[%c0_16, %c0_17] : memref<512x256xbf16, #tpu.memory_space<vmem>>, vector<512x256xbf16>
    %cst_18 = arith.constant dense<0.000000e+00> : vector<8x256xf32>
    %49 = tpu.matmul %47, %48, %cst_18 {dimension_numbers = #tpu.dot_dimension_numbers<[1], [0], [0], [1], [0, 0, 1, 1], [], []>} : vector<8x512xbf16>, vector<512x256xbf16>, vector<8x256xf32> -> vector<8x256xf32>
    %c0_19 = arith.constant 0 : index
    %c0_20 = arith.constant 0 : index
    %50 = vector.load %arg7[%c0_19, %c0_20] : memref<2x128xf32, #tpu.memory_space<vmem>>, vector<2x128xf32>
    %51 = vector.extract_strided_slice %49 {offsets = [0, 0], sizes = [8, 128], strides = [1, 1]} : vector<8x256xf32> to vector<8x128xf32>
    %52 = vector.extract_strided_slice %49 {offsets = [0, 128], sizes = [8, 128], strides = [1, 1]} : vector<8x256xf32> to vector<8x128xf32>
    %53 = vector.extract_strided_slice %50 {offsets = [0, 0], sizes = [1, 128], strides = [1, 1]} : vector<2x128xf32> to vector<1x128xf32>
    %54 = vector.broadcast %53 : vector<1x128xf32> to vector<8x128xf32>
    %55 = arith.addf %52, %54 : vector<8x128xf32>
    %cst_21 = arith.constant 0.000000e+00 : f32
    %56 = vector.broadcast %cst_21 : f32 to vector<8x128xf32>
    %57 = arith.maximumf %55, %56 : vector<8x128xf32>
    %58 = math.absf %55 : vector<8x128xf32>
    %cst_22 = arith.constant 0.000000e+00 : f32
    %59 = vector.broadcast %cst_22 : f32 to vector<8x128xf32>
    %60 = arith.subf %59, %58 : vector<8x128xf32>
    %61 = math.exp %60 : vector<8x128xf32>
    %62 = math.log1p %61 : vector<8x128xf32>
    %63 = arith.addf %57, %62 : vector<8x128xf32>
    %64 = arith.mulf %63, %51 : vector<8x128xf32>
    %65 = vector.extract_strided_slice %50 {offsets = [1, 0], sizes = [1, 128], strides = [1, 1]} : vector<2x128xf32> to vector<1x128xf32>
    %66 = vector.broadcast %65 : vector<1x128xf32> to vector<8x128xf32>
    %67 = arith.addf %64, %66 : vector<8x128xf32>
    %c0_23 = arith.constant 0 : index
    %c0_24 = arith.constant 0 : index
    %68 = vector.load %arg8[%c0_23, %c0_24] : memref<8x128xf32, #tpu.memory_space<vmem>>, vector<8x128xf32>
    tpu.vector_store %arg8[%c0_23, %c0_24], %67 {strides = array<i32>} : memref<8x128xf32, #tpu.memory_space<vmem>>, vector<8x128xf32>,
    return
  }
  func.func @transform_0(%arg0: i32) -> (i32, i32) {
    %c0_i32 = arith.constant 0 : i32
    %c0_i32_0 = arith.constant 0 : i32
    return %arg0, %c0_i32 : i32, i32
  }
  func.func @transform_1(%arg0: i32) -> (i32, i32) {
    %c0_i32 = arith.constant 0 : i32
    %c0_i32_0 = arith.constant 0 : i32
    %c0_i32_1 = arith.constant 0 : i32
    return %c0_i32, %c0_i32_0 : i32, i32
  }
  func.func @transform_2(%arg0: i32) -> (i32, i32) {
    %c0_i32 = arith.constant 0 : i32
    %c0_i32_0 = arith.constant 0 : i32
    %c0_i32_1 = arith.constant 0 : i32
    return %c0_i32, %c0_i32_0 : i32, i32
  }
  func.func @transform_3(%arg0: i32) -> (i32, i32) {
    %c0_i32 = arith.constant 0 : i32
    %c0_i32_0 = arith.constant 0 : i32
    %c0_i32_1 = arith.constant 0 : i32
    return %c0_i32, %c0_i32_0 : i32, i32
  }
  func.func @transform_4(%arg0: i32) -> (i32, i32) {
    %c0_i32 = arith.constant 0 : i32
    %c0_i32_0 = arith.constant 0 : i32
    %c0_i32_1 = arith.constant 0 : i32
    return %c0_i32, %c0_i32_0 : i32, i32
  }
  func.func @transform_5(%arg0: i32) -> (i32, i32) {
    %c0_i32 = arith.constant 0 : i32
    %c0_i32_0 = arith.constant 0 : i32
    %c0_i32_1 = arith.constant 0 : i32
    return %c0_i32, %c0_i32_0 : i32, i32
  }
  func.func @transform_6(%arg0: i32) -> (i32, i32) {
    %c0_i32 = arith.constant 0 : i32
    %c0_i32_0 = arith.constant 0 : i32
    %c0_i32_1 = arith.constant 0 : i32
    return %c0_i32, %c0_i32_0 : i32, i32
  }
  func.func @transform_7(%arg0: i32) -> (i32, i32) {
    %c0_i32 = arith.constant 0 : i32
    %c0_i32_0 = arith.constant 0 : i32
    return %arg0, %c0_i32 : i32, i32
  }
}

</mosaic_0001>

<bundles_post_ra>
// kernel: model_forward.1
= control target key start
LH: loop header
LB: loop body
LE: loop exit
PB: predicated region body
PF: predicated region fallthrough
CT: control target
= control target key end

     0   :  { %12 = vsyncpa [#allocation3], 0  ;;  %s7548_s0 = inlined_call_operand.vmem [shape: f32[8,896], index: 0, kind: input, shape index: {}]   ;;  %s7549_s1 = inlined_call_operand.hbm [shape: bf16[896,1024], index: 1, kind: input, shape index: {}]   ;;  %s7550_s2 = inlined_call_operand.hbm [shape: f32[2,512], index: 2, kind: input, shape index: {}]   ;;  %s7551_s3 = inlined_call_operand.hbm [shape: bf16[512,1024], index: 3, kind: input, shape index: {}]   ;;  %s7552_s4 = inlined_call_operand.hbm [shape: f32[2,512], index: 4, kind: input, shape index: {}]   ;;  %s7553_s5 = inlined_call_operand.hbm [shape: bf16[512,256], index: 5, kind: input, shape index: {}]   ;;  %s7554_s6 = inlined_call_operand.hbm [shape: f32[2,128], index: 6, kind: input, shape index: {}]   ;;  %s7555_s7 = inlined_call_operand.vmem [shape: f32[8,128], index: 7, kind: output, shape index: {}]  }
   0x1   :  { %13 = vsyncpa [#allocation5], 0 }
   0x2   :  { %14 = vsyncpa [#allocation8], 0 }
   0x3   :  { %15 = vsyncpa [#allocation11], 0  ;;  %s7174_s24 = smov [#allocation4]   ;;  %s7175_s26 = smov [#allocation7]  }
   0x4   :  { %s36_s25 = sshll.u32 %s7174_s24, 4  ;;  %s58_s27 = sshll.u32 %s7175_s26, 4  ;;  %s37_s25 = int_to_ptr.vmem [resolvable:$true] %s36_s25  ;;  %s59_s27 = int_to_ptr.vmem [resolvable:$true] %s58_s27 }
   0x5   :  { %s7054_s28 = scalar_lea.vmem %s37_s25, 128  ;;  %p7059_p1 = scmp.lt.s32.totalorder %s37_s25, %s37_s25 }
   0x6   :  { %p7055_p0 = scmp.ne.s32.totalorder %s37_s25, %s7054_s28  ;;  %p7060_p2 = scmp.lt.s32.totalorder %s7054_s28, %s7054_s28 }
   0x8   :  { %p7061_p3 = por %p7060_p2, %p7059_p1 }
   0xa   :  { %p7062_p4 = pnand %p7061_p3, %p7055_p0 }
   0xc   :  { %7065 = shalt.err (!%p7062_p4)
}
   0xd   :  { %39 = dma.hbm_to_vmem [thread:$0]  %s7550_s2, 128, %s37_s25, [#allocation5]  }
   0xe   :  { %s7074_s8 = scalar_lea.vmem %s59_s27, 128  ;;  %p7079_p6 = scmp.lt.s32.totalorder %s59_s27, %s59_s27 }
   0xf   :  { %p7075_p5 = scmp.ne.s32.totalorder %s59_s27, %s7074_s8  ;;  %p7080_p7 = scmp.lt.s32.totalorder %s7074_s8, %s7074_s8 }
  0x11   :  { %p7081_p8 = por %p7080_p7, %p7079_p6 }
  0x13   :  { %p7082_p9 = pnand %p7081_p8, %p7075_p5 }
  0x15   :  { %7085 = shalt.err (!%p7082_p9)
}
  0x16   :  { %61 = dma.hbm_to_vmem [thread:$0]  %s7552_s4, 128, %s59_s27, [#allocation8]  }
  0x17   :  { %s7176_s11 = smov [#allocation2]  }
  0x18   :  { %s23_s12 = sshll.u32 %s7176_s11, 4  ;;  %s24_s12 = int_to_ptr.vmem [resolvable:$true] %s23_s12 }
  0x19   :  { %s7094_s13 = scalar_lea.vmem %s24_s12, 57344  ;;  %p7099_p11 = scmp.lt.s32.totalorder %s24_s12, %s24_s12 }
  0x1a   :  { %p7095_p10 = scmp.ne.s32.totalorder %s24_s12, %s7094_s13  ;;  %p7100_p12 = scmp.lt.s32.totalorder %s7094_s13, %s7094_s13 }
  0x1c   :  { %p7101_p13 = por %p7100_p12, %p7099_p11 }
  0x1e   :  { %p7102_p0 = pnand %p7101_p13, %p7095_p10 }
  0x20   :  { %7105 = shalt.err (!%p7102_p0)
}
  0x21   :  { %s7177_s2 = smov 512   ;;  %s7178_s14 = smov 32  }
  0x22   :  { %29 = dma.hbm_to_vmem [thread:$0]  %s7549_s1, 57344, %s24_s12, [#allocation3], %s7177_s2, %s7177_s2, %s7178_s14  }
  0x23   :  { %s7179_s17 = smov [#allocation6]   ;;  %s7180_s4 = smov [#allocation9]  }
  0x24   :  { %s45_s18 = sshll.u32 %s7179_s17, 4  ;;  %s67_s19 = sshll.u32 %s7180_s4, 4  ;;  %s46_s18 = int_to_ptr.vmem [resolvable:$true] %s45_s18  ;;  %s68_s19 = int_to_ptr.vmem [resolvable:$true] %s67_s19 }
  0x25   :  { %s7114_s20 = scalar_lea.vmem %s46_s18, 32768  ;;  %p7119_p2 = scmp.lt.s32.totalorder %s46_s18, %s46_s18 }
  0x26   :  { %p7115_p1 = scmp.ne.s32.totalorder %s46_s18, %s7114_s20  ;;  %p7120_p3 = scmp.lt.s32.totalorder %s7114_s20, %s7114_s20 }
  0x28   :  { %p7121_p4 = por %p7120_p3, %p7119_p2 }
  0x2a   :  { %p7122_p5 = pnand %p7121_p4, %p7115_p1 }
  0x2c   :  { %7125 = shalt.err (!%p7122_p5)
}
  0x2d   :  { %51 = dma.hbm_to_vmem [thread:$0]  %s7551_s3, 32768, %s46_s18, [#allocation5], %s7177_s2, %s7177_s2, %s7178_s14  }
  0x2e   :  { %s7134_s23 = scalar_lea.vmem %s68_s19, 8192  ;;  %p7139_p7 = scmp.lt.s32.totalorder %s68_s19, %s68_s19 }
  0x2f   :  { %p7135_p6 = scmp.ne.s32.totalorder %s68_s19, %s7134_s23  ;;  %p7140_p8 = scmp.lt.s32.totalorder %s7134_s23, %s7134_s23 }
  0x31   :  { %p7141_p9 = por %p7140_p8, %p7139_p7 }
  0x33   :  { %p7142_p10 = pnand %p7141_p9, %p7135_p6 }
  0x35   :  { %7145 = shalt.err (!%p7142_p10)
}
  0x36   :  { %s7181_s1 = smov 128   ;;  %s7182_s24 = smov 8  }
  0x37   :  { %73 = dma.hbm_to_vmem [thread:$0]  %s7553_s5, 8192, %s68_s19, [#allocation8], %s7181_s1, %s7181_s1, %s7182_s24  }
  0x38   :  { %s7183_s27 = smov [#allocation10]  }
  0x39   :  { %s80_s28 = sshll.u32 %s7183_s27, 4  ;;  %s81_s28 = int_to_ptr.vmem [resolvable:$true] %s80_s28 }
  0x3a   :  { %s7154_s29 = scalar_lea.vmem %s81_s28, 32  ;;  %p7159_p12 = scmp.lt.s32.totalorder %s81_s28, %s81_s28 }
  0x3b   :  { %p7155_p11 = scmp.ne.s32.totalorder %s81_s28, %s7154_s29  ;;  %p7160_p13 = scmp.lt.s32.totalorder %s7154_s29, %s7154_s29 }
  0x3d   :  { %p7161_p0 = por %p7160_p13, %p7159_p12 }
  0x3f   :  { %p7162_p1 = pnand %p7161_p0, %p7155_p11 }
  0x41   :  { %7165 = shalt.err (!%p7162_p1)
}
  0x42   :  { %83 = dma.hbm_to_vmem [thread:$0]  %s7554_s6, 32, %s81_s28, [#allocation11]  }
  0x43   :  { %7166 = dma.done.wait [#allocation3], 57344  }
  0x44   :  { %7167 = vsyncadd [#allocation3], 4294909952 }
  0x45   :  { %7168 = dma.done.wait [#allocation5], 32896  }
  0x46   :  { %7169 = vsyncadd [#allocation5], 4294934400 }
  0x47   :  { %7170 = dma.done.wait [#allocation8], 8320  }
  0x48   :  { %7171 = vsyncadd [#allocation8], 4294958976 }
  0x49   :  { %7172 = dma.done.wait [#allocation11], 32  }
  0x4a   :  { %7173 = vsyncadd [#allocation11], 4294967264  ;;  %v173_v0 = vld [vmem:[#allocation2 + $0x1c0] sm:$0xff]  ;;  %v104_v53 = vld [vmem:[%s7548_s0 + $0x8] sm:$0xff] }
  0x4b   :  { %v177_v1 = vld [vmem:[#allocation2 + $0x1e0] sm:$0xff]  ;;  %v106_v54 = vld [vmem:[%s7548_s0 + $0x18] sm:$0xff]  ;;  %v7249_v58 = vpack.c.bf16 %v104_v53, %v104_v53 }
  0x4c   :  { %v301_v2 = vld [vmem:[#allocation2 + $0x5c0] sm:$0xff]  ;;  %v6192_v3 = vcombine.high %v173_v0, %v177_v1  ;;  %v6191_v5 = vcombine.low %v173_v0, %v177_v1  ;;  %v7251_v59 = vpack.c.bf16 %v106_v54, %v106_v54 }
  0x4d   :  { %v305_v4 = vld [vmem:[#allocation2 + $0x5e0] sm:$0xff]  ;;  %2837 = vmatprep.mubr.bf16.mxu0 %v7249_v58 }
  0x4e   :  { %v165_v6 = vld [vmem:[#allocation2 + $0x180] sm:$0xff]  ;;  %v6320_v8 = vcombine.high %v301_v2, %v305_v4  ;;  %v6319_v9 = vcombine.low %v301_v2, %v305_v4  ;;  %2805 = vmatprep.subr.bf16.mxu0 %v6192_v3  ;;  %2878 = vmatprep.mubr.bf16.mxu1 %v7251_v59 }
  0x4f   :  { %v169_v7 = vld [vmem:[#allocation2 + $0x1a0] sm:$0xff]  ;;  %2806 = vmatpush1.bf16.msra.mxu0 %v6191_v5 }
  0x50   :  { %v6184_v10 = vcombine.high %v165_v6, %v169_v7  ;;  %v293_v11 = vld [vmem:[#allocation2 + $0x580] sm:$0xff]  ;;  %2846 = vmatprep.subr.bf16.mxu1 %v6320_v8  ;;  %v6183_v18 = vcombine.low %v165_v6, %v169_v7 }
  0x51   :  { %v297_v12 = vld [vmem:[#allocation2 + $0x5a0] sm:$0xff]  ;;  %2847 = vmatpush1.bf16.msra.mxu1 %v6319_v9 }
  0x52   :  { %v157_v13 = vld [vmem:[#allocation2 + $0x140] sm:$0xff]  ;;  %v6312_v14 = vcombine.high %v293_v11, %v297_v12  ;;  %2807 = vmatprep.subr.bf16.mxu0 %v6184_v10  ;;  %v6311_v19 = vcombine.low %v293_v11, %v297_v12 }
  0x53   :  { %v161_v15 = vld [vmem:[#allocation2 + $0x160] sm:$0xff]  ;;  %2808 = vmatpush1.bf16.msra.mxu0 %v6183_v18 }
  0x54   :  { %v285_v16 = vld [vmem:[#allocation2 + $0x540] sm:$0xff]  ;;  %v6176_v20 = vcombine.high %v157_v13, %v161_v15  ;;  %2848 = vmatprep.subr.bf16.mxu1 %v6312_v14  ;;  %v6175_v26 = vcombine.low %v157_v13, %v161_v15 }
  0x55   :  { %v289_v17 = vld [vmem:[#allocation2 + $0x560] sm:$0xff]  ;;  %2849 = vmatpush1.bf16.msra.mxu1 %v6311_v19 }
  0x56   :  { %v6304_v21 = vcombine.high %v285_v16, %v289_v17  ;;  %v149_v22 = vld [vmem:[#allocation2 + $0x100] sm:$0xff]  ;;  %2809 = vmatprep.subr.bf16.mxu0 %v6176_v20  ;;  %v6303_v27 = vcombine.low %v285_v16, %v289_v17 }
  0x57   :  { %v153_v23 = vld [vmem:[#allocation2 + $0x120] sm:$0xff]  ;;  %2810 = vmatpush1.bf16.msra.mxu0 %v6175_v26 }
  0x58   :  { %v277_v24 = vld [vmem:[#allocation2 + $0x500] sm:$0xff]  ;;  %v6168_v28 = vcombine.high %v149_v22, %v153_v23  ;;  %2850 = vmatprep.subr.bf16.mxu1 %v6304_v21  ;;  %v6167_v34 = vcombine.low %v149_v22, %v153_v23 }
  0x59   :  { %v281_v25 = vld [vmem:[#allocation2 + $0x520] sm:$0xff]  ;;  %2851 = vmatpush1.bf16.msra.mxu1 %v6303_v27 }
  0x5a   :  { %v6296_v29 = vcombine.high %v277_v24, %v281_v25  ;;  %v141_v30 = vld [vmem:[#allocation2 + $0xc0] sm:$0xff]  ;;  %2811 = vmatprep.subr.bf16.mxu0 %v6168_v28  ;;  %v6295_v35 = vcombine.low %v277_v24, %v281_v25 }
  0x5b   :  { %v145_v31 = vld [vmem:[#allocation2 + $0xe0] sm:$0xff]  ;;  %2812 = vmatpush1.bf16.msra.mxu0 %v6167_v34 }
  0x5c   :  { %v269_v32 = vld [vmem:[#allocation2 + $0x4c0] sm:$0xff]  ;;  %v6160_v36 = vcombine.high %v141_v30, %v145_v31  ;;  %2852 = vmatprep.subr.bf16.mxu1 %v6296_v29  ;;  %v6159_v42 = vcombine.low %v141_v30, %v145_v31 }
  0x5d   :  { %v273_v33 = vld [vmem:[#allocation2 + $0x4e0] sm:$0xff]  ;;  %2853 = vmatpush1.bf16.msra.mxu1 %v6295_v35 }
  0x5e   :  { %v6288_v37 = vcombine.high %v269_v32, %v273_v33  ;;  %v133_v38 = vld [vmem:[#allocation2 + $0x80] sm:$0xff]  ;;  %2813 = vmatprep.subr.bf16.mxu0 %v6160_v36  ;;  %v6287_v43 = vcombine.low %v269_v32, %v273_v33 }
  0x5f   :  { %v137_v39 = vld [vmem:[#allocation2 + $0xa0] sm:$0xff]  ;;  %2814 = vmatpush1.bf16.msra.mxu0 %v6159_v42 }
  0x60   :  { %v261_v40 = vld [vmem:[#allocation2 + $0x480] sm:$0xff]  ;;  %v6152_v44 = vcombine.high %v133_v38, %v137_v39  ;;  %2854 = vmatprep.subr.bf16.mxu1 %v6288_v37  ;;  %v6151_v50 = vcombine.low %v133_v38, %v137_v39 }
  0x61   :  { %v265_v41 = vld [vmem:[#allocation2 + $0x4a0] sm:$0xff]  ;;  %2855 = vmatpush1.bf16.msra.mxu1 %v6287_v43 }
  0x62   :  { %v6280_v45 = vcombine.high %v261_v40, %v265_v41  ;;  %v125_v46 = vld [vmem:[#allocation2 + $0x40] sm:$0xff]  ;;  %2815 = vmatprep.subr.bf16.mxu0 %v6152_v44  ;;  %v6279_v51 = vcombine.low %v261_v40, %v265_v41 }
  0x63   :  { %v129_v47 = vld [vmem:[#allocation2 + $0x60] sm:$0xff]  ;;  %2816 = vmatpush1.bf16.msra.mxu0 %v6151_v50 }
  0x64   :  { %v253_v48 = vld [vmem:[#allocation2 + $0x440] sm:$0xff]  ;;  %v6144_v52 = vcombine.high %v125_v46, %v129_v47  ;;  %2856 = vmatprep.subr.bf16.mxu1 %v6280_v45  ;;  %v6143_v62 = vcombine.low %v125_v46, %v129_v47 }
  0x65   :  { %v257_v49 = vld [vmem:[#allocation2 + $0x460] sm:$0xff]  ;;  %2857 = vmatpush1.bf16.msra.mxu1 %v6279_v51 }
  0x66   :  { %v6272_v55 = vcombine.high %v253_v48, %v257_v49  ;;  %v117_v56 = vld [vmem:[#allocation2] sm:$0xff]  ;;  %2817 = vmatprep.subr.bf16.mxu0 %v6144_v52  ;;  %v6271_v63 = vcombine.low %v253_v48, %v257_v49 }
  0x67   :  { %v121_v57 = vld [vmem:[#allocation2 + $0x20] sm:$0xff]  ;;  %2818 = vmatpush1.bf16.msra.mxu0 %v6143_v62 }
  0x68   :  { %v245_v60 = vld [vmem:[#allocation2 + $0x400] sm:$0xff]  ;;  %v6136_v0 = vcombine.high %v117_v56, %v121_v57  ;;  %2858 = vmatprep.subr.bf16.mxu1 %v6272_v55  ;;  %v6135_v6 = vcombine.low %v117_v56, %v121_v57 }
  0x69   :  { %v249_v61 = vld [vmem:[#allocation2 + $0x420] sm:$0xff]  ;;  %2859 = vmatpush1.bf16.msra.mxu1 %v6271_v63 }
  0x6a   :  { %v6264_v1 = vcombine.high %v245_v60, %v249_v61  ;;  %v237_v2 = vld [vmem:[#allocation2 + $0x3c0] sm:$0xff]  ;;  %2819 = vmatprep.subr.bf16.mxu0 %v6136_v0  ;;  %v6263_v7 = vcombine.low %v245_v60, %v249_v61 }
  0x6b   :  { %v241_v3 = vld [vmem:[#allocation2 + $0x3e0] sm:$0xff]  ;;  %2820 = vmatpush1.bf16.msra.mxu0 %v6135_v6 }
  0x6c   :  { %v365_v4 = vld [vmem:[#allocation2 + $0x7c0] sm:$0xff]  ;;  %v6256_v8 = vcombine.high %v237_v2, %v241_v3  ;;  %2860 = vmatprep.subr.bf16.mxu1 %v6264_v1  ;;  %v6255_v14 = vcombine.low %v237_v2, %v241_v3 }
  0x6d   :  { %v369_v5 = vld [vmem:[#allocation2 + $0x7e0] sm:$0xff]  ;;  %2861 = vmatpush1.bf16.msra.mxu1 %v6263_v7 }
  0x6e   :  { %v6384_v9 = vcombine.high %v365_v4, %v369_v5  ;;  %v229_v10 = vld [vmem:[#allocation2 + $0x380] sm:$0xff]  ;;  %2821 = vmatprep.subr.bf16.mxu0 %v6256_v8  ;;  %v6383_v15 = vcombine.low %v365_v4, %v369_v5 }
  0x6f   :  { %v233_v11 = vld [vmem:[#allocation2 + $0x3a0] sm:$0xff]  ;;  %2822 = vmatpush2.bf16.msra.mxu0 %v6255_v14 }
  0x70   :  { %v357_v12 = vld [vmem:[#allocation2 + $0x780] sm:$0xff]  ;;  %v6248_v16 = vcombine.high %v229_v10, %v233_v11  ;;  %2862 = vmatprep.subr.bf16.mxu1 %v6384_v9  ;;  %v6247_v22 = vcombine.low %v229_v10, %v233_v11  ;;  %v105_v11 = vld [vmem:[%s7548_s0 + $0x10] sm:$0xff] }
  0x71   :  { %v361_v13 = vld [vmem:[#allocation2 + $0x7a0] sm:$0xff]  ;;  %2863 = vmatpush2.bf16.msra.mxu1 %v6383_v15 }
  0x72   :  { %v6376_v17 = vcombine.high %v357_v12, %v361_v13  ;;  %v221_v18 = vld [vmem:[#allocation2 + $0x340] sm:$0xff]  ;;  %2823 = vmatprep.subr.bf16.mxu0 %v6248_v16  ;;  %v6375_v23 = vcombine.low %v357_v12, %v361_v13 }
  0x73   :  { %v225_v19 = vld [vmem:[#allocation2 + $0x360] sm:$0xff]  ;;  %2824 = vmatpush2.bf16.msra.mxu0 %v6247_v22 }
  0x74   :  { %v349_v20 = vld [vmem:[#allocation2 + $0x740] sm:$0xff]  ;;  %v6240_v24 = vcombine.high %v221_v18, %v225_v19  ;;  %2864 = vmatprep.subr.bf16.mxu1 %v6376_v17  ;;  %v6239_v30 = vcombine.low %v221_v18, %v225_v19  ;;  %v7263_v19 = vpack.c.bf16 %v105_v11, %v105_v11 }
  0x75   :  { %v353_v21 = vld [vmem:[#allocation2 + $0x760] sm:$0xff]  ;;  %2865 = vmatpush2.bf16.msra.mxu1 %v6375_v23 }
  0x76   :  { %v6368_v25 = vcombine.high %v349_v20, %v353_v21  ;;  %v213_v26 = vld [vmem:[#allocation2 + $0x300] sm:$0xff]  ;;  %2825 = vmatprep.subr.bf16.mxu0 %v6240_v24  ;;  %v6367_v31 = vcombine.low %v349_v20, %v353_v21  ;;  %v108_v21 = vld [vmem:[%s7548_s0 + $0x28] sm:$0xff] }
  0x77   :  { %v217_v27 = vld [vmem:[#allocation2 + $0x320] sm:$0xff]  ;;  %2826 = vmatpush2.bf16.msra.mxu0 %v6239_v30 }
  0x78   :  { %v341_v28 = vld [vmem:[#allocation2 + $0x700] sm:$0xff]  ;;  %v6232_v32 = vcombine.high %v213_v26, %v217_v27  ;;  %2866 = vmatprep.subr.bf16.mxu1 %v6368_v25  ;;  %v6231_v38 = vcombine.low %v213_v26, %v217_v27 }
  0x79   :  { %v345_v29 = vld [vmem:[#allocation2 + $0x720] sm:$0xff]  ;;  %2867 = vmatpush2.bf16.msra.mxu1 %v6367_v31 }
  0x7a   :  { %v6360_v33 = vcombine.high %v341_v28, %v345_v29  ;;  %v205_v34 = vld [vmem:[#allocation2 + $0x2c0] sm:$0xff]  ;;  %2827 = vmatprep.subr.bf16.mxu0 %v6232_v32  ;;  %v6359_v39 = vcombine.low %v341_v28, %v345_v29  ;;  %v7269_v29 = vpack.c.bf16 %v108_v21, %v108_v21 }
  0x7b   :  { %v209_v35 = vld [vmem:[#allocation2 + $0x2e0] sm:$0xff]  ;;  %2828 = vmatpush2.bf16.msra.mxu0 %v6231_v38  ;;  %v7184_v38 = vmov 0  }
  0x7c   :  { %v333_v36 = vld [vmem:[#allocation2 + $0x6c0] sm:$0xff]  ;;  %v6224_v40 = vcombine.high %v205_v34, %v209_v35  ;;  %2868 = vmatprep.subr.bf16.mxu1 %v6360_v33  ;;  %v6223_v46 = vcombine.low %v205_v34, %v209_v35 }
  0x7d   :  { %v337_v37 = vld [vmem:[#allocation2 + $0x6e0] sm:$0xff]  ;;  %2869 = vmatpush2.bf16.msra.mxu1 %v6359_v39 }
  0x7e   :  { %v6352_v41 = vcombine.high %v333_v36, %v337_v37  ;;  %v197_v42 = vld [vmem:[#allocation2 + $0x280] sm:$0xff]  ;;  %2829 = vmatprep.subr.bf16.mxu0 %v6224_v40  ;;  %v6351_v47 = vcombine.low %v333_v36, %v337_v37 }
  0x7f   :  { %v201_v43 = vld [vmem:[#allocation2 + $0x2a0] sm:$0xff]  ;;  %2830 = vmatpush2.bf16.msra.mxu0 %v6223_v46 }
  0x80   :  { %v325_v44 = vld [vmem:[#allocation2 + $0x680] sm:$0xff]  ;;  %v6216_v48 = vcombine.high %v197_v42, %v201_v43  ;;  %2870 = vmatprep.subr.bf16.mxu1 %v6352_v41  ;;  %v6215_v54 = vcombine.low %v197_v42, %v201_v43 }
  0x81   :  { %v329_v45 = vld [vmem:[#allocation2 + $0x6a0] sm:$0xff]  ;;  %2871 = vmatpush2.bf16.msra.mxu1 %v6351_v47 }
  0x82   :  { %v6344_v49 = vcombine.high %v325_v44, %v329_v45  ;;  %v189_v50 = vld [vmem:[#allocation2 + $0x240] sm:$0xff]  ;;  %2831 = vmatprep.subr.bf16.mxu0 %v6216_v48  ;;  %v6343_v55 = vcombine.low %v325_v44, %v329_v45 }
  0x83   :  { %v193_v51 = vld [vmem:[#allocation2 + $0x260] sm:$0xff]  ;;  %2832 = vmatpush2.bf16.msra.mxu0 %v6215_v54 }
  0x84   :  { %v317_v52 = vld [vmem:[#allocation2 + $0x640] sm:$0xff]  ;;  %v6208_v56 = vcombine.high %v189_v50, %v193_v51  ;;  %2872 = vmatprep.subr.bf16.mxu1 %v6344_v49  ;;  %v6207_v0 = vcombine.low %v189_v50, %v193_v51 }
  0x85   :  { %v321_v53 = vld [vmem:[#allocation2 + $0x660] sm:$0xff]  ;;  %2873 = vmatpush2.bf16.msra.mxu1 %v6343_v55 }
  0x86   :  { %v6336_v57 = vcombine.high %v317_v52, %v321_v53  ;;  %v181_v60 = vld [vmem:[#allocation2 + $0x200] sm:$0xff]  ;;  %2833 = vmatprep.subr.bf16.mxu0 %v6208_v56  ;;  %v6335_v1 = vcombine.low %v317_v52, %v321_v53 }
  0x87   :  { %v185_v61 = vld [vmem:[#allocation2 + $0x220] sm:$0xff]  ;;  %2834 = vmatpush2.bf16.msra.mxu0 %v6207_v0 }
  0x88   :  { %v309_v62 = vld [vmem:[#allocation2 + $0x600] sm:$0xff]  ;;  %v6200_v2 = vcombine.high %v181_v60, %v185_v61  ;;  %2874 = vmatprep.subr.bf16.mxu1 %v6336_v57  ;;  %v6199_v8 = vcombine.low %v181_v60, %v185_v61 }
  0x89   :  { %v313_v63 = vld [vmem:[#allocation2 + $0x620] sm:$0xff]  ;;  %2875 = vmatpush2.bf16.msra.mxu1 %v6335_v1 }
  0x8a   :  { %v6328_v3 = vcombine.high %v309_v62, %v313_v63  ;;  %v429_v4 = vld [vmem:[#allocation2 + $0x9c0] sm:$0xff]  ;;  %2835 = vmatprep.subr.bf16.mxu0 %v6200_v2  ;;  %v6327_v10 = vcombine.low %v309_v62, %v313_v63 }
  0x8b   :  { %v433_v5 = vld [vmem:[#allocation2 + $0x9e0] sm:$0xff]  ;;  %2836 = vmatpush2.bf16.msra.mxu0 %v6199_v8 }
  0x8c   :  { %v557_v6 = vld [vmem:[#allocation2 + $0xdc0] sm:$0xff]  ;;  %v6448_v12 = vcombine.high %v429_v4, %v433_v5  ;;  %2876 = vmatprep.subr.bf16.mxu1 %v6328_v3  ;;  %v6447_v20 = vcombine.low %v429_v4, %v433_v5 }
  0x8d   :  { %v561_v7 = vld [vmem:[#allocation2 + $0xde0] sm:$0xff]  ;;  %2877 = vmatpush2.bf16.msra.mxu1 %v6327_v10 }
  0x8e   :  { %v103_v9 = vld [vmem:[%s7548_s0] sm:$0xff]  ;;  %v6576_v13 = vcombine.high %v557_v6, %v561_v7  ;;  %2887 = vmatprep.subr.bf16.mxu0 %v6448_v12  ;;  %v6575_v22 = vcombine.low %v557_v6, %v561_v7 }
  0x8f   :  { %v421_v14 = vld [vmem:[#allocation2 + $0x980] sm:$0xff]  ;;  %v7261_v16 = vpack.c.bf16 %v103_v9, %v103_v9 }
  0x90   :  { %v425_v15 = vld [vmem:[#allocation2 + $0x9a0] sm:$0xff]  ;;  %2928 = vmatprep.subr.bf16.mxu1 %v6576_v13  ;;  %2879 = vmatmul.mubr.bf16.vlgmr.msra.gmra.mxu1 %v7263_v19 }
  0x91   :  { %v549_v17 = vld [vmem:[#allocation2 + $0xd80] sm:$0xff]  ;;  %v6440_v23 = vcombine.high %v421_v14, %v425_v15  ;;  %2838 = vmatmul.mubr.bf16.vlgmr.msra.gmra.mxu0 %v7261_v16  ;;  %v6439_v30 = vcombine.low %v421_v14, %v425_v15  ;;  %2929 = vmatpush1.bf16.msra.mxu1 %v6575_v22  ;;  %v174_v14 = vld [vmem:[#allocation2 + $0x1c8] sm:$0xff] }
  0x92   :  { %v553_v18 = vld [vmem:[#allocation2 + $0xda0] sm:$0xff]  ;;  %2888 = vmatpush1.bf16.msra.mxu0 %v6447_v20  ;;  %2960 = vmatprep.mubr.bf16.mxu1 %v7184_v38 }
  0x93   :  { %v6568_v24 = vcombine.high %v549_v17, %v553_v18  ;;  %v413_v25 = vld [vmem:[#allocation2 + $0x940] sm:$0xff]  ;;  %2889 = vmatprep.subr.bf16.mxu0 %v6440_v23  ;;  %v6567_v31 = vcombine.low %v549_v17, %v553_v18  ;;  %2919 = vmatprep.mubr.bf16.mxu0 %v7269_v29  ;;  %v178_v17 = vld [vmem:[#allocation2 + $0x1e8] sm:$0xff]  ;;  %v109_v18 = vld [vmem:[%s7548_s0 + $0x30] sm:$0xff] }
  0x94   :  { %v417_v26 = vld [vmem:[#allocation2 + $0x960] sm:$0xff] }
  0x95   :  { %v541_v27 = vld [vmem:[#allocation2 + $0xd40] sm:$0xff]  ;;  %v6432_v32 = vcombine.high %v413_v25, %v417_v26  ;;  %2930 = vmatprep.subr.bf16.mxu1 %v6568_v24  ;;  %v6431_v39 = vcombine.low %v413_v25, %v417_v26  ;;  %v166_v25 = vld [vmem:[#allocation2 + $0x188] sm:$0xff]  ;;  %v6194_v26 = vcombine.high %v174_v14, %v178_v17 }
  0x96   :  { %v545_v28 = vld [vmem:[#allocation2 + $0xd60] sm:$0xff]  ;;  %2890 = vmatpush1.bf16.msra.mxu0 %v6439_v30  ;;  %2931 = vmatpush1.bf16.msra.mxu1 %v6567_v31  ;;  %v7277_v30 = vpack.c.bf16 %v109_v18, %v109_v18  ;;  %v6193_v31 = vcombine.low %v174_v14, %v178_v17  ;;  %v122_v17 = vld [vmem:[#allocation2 + $0x28] sm:$0xff] }
  0x97   :  { %v405_v33 = vld [vmem:[#allocation2 + $0x900] sm:$0xff]  ;;  %v6560_v36 = vcombine.high %v541_v27, %v545_v28  ;;  %2891 = vmatprep.subr.bf16.mxu0 %v6432_v32  ;;  %v6559_v40 = vcombine.low %v541_v27, %v545_v28  ;;  %v170_v27 = vld [vmem:[#allocation2 + $0x1a8] sm:$0xff] }
  0x98   :  { %v409_v34 = vld [vmem:[#allocation2 + $0x920] sm:$0xff] }
  0x99   :  { %v533_v35 = vld [vmem:[#allocation2 + $0xd00] sm:$0xff]  ;;  %v6424_v41 = vcombine.high %v405_v33, %v409_v34  ;;  %2932 = vmatprep.subr.bf16.mxu1 %v6560_v36  ;;  %v6423_v47 = vcombine.low %v405_v33, %v409_v34  ;;  %v158_v36 = vld [vmem:[#allocation2 + $0x148] sm:$0xff] }
  0x9a   :  { %v537_v37 = vld [vmem:[#allocation2 + $0xd20] sm:$0xff]  ;;  %2892 = vmatpush1.bf16.msra.mxu0 %v6431_v39  ;;  %2933 = vmatpush1.bf16.msra.mxu1 %v6559_v40  ;;  %v6185_v40 = vcombine.low %v166_v25, %v170_v27 }
  0x9b   :  { %v397_v42 = vld [vmem:[#allocation2 + $0x8c0] sm:$0xff]  ;;  %v6552_v45 = vcombine.high %v533_v35, %v537_v37  ;;  %2893 = vmatprep.subr.bf16.mxu0 %v6424_v41  ;;  %v6551_v48 = vcombine.low %v533_v35, %v537_v37  ;;  %v6186_v35 = vcombine.high %v166_v25, %v170_v27  ;;  %v162_v37 = vld [vmem:[#allocation2 + $0x168] sm:$0xff] }
  0x9c   :  { %v401_v43 = vld [vmem:[#allocation2 + $0x8e0] sm:$0xff]  ;;  %v238_v25 = vld [vmem:[#allocation2 + $0x3c8] sm:$0xff] }
  0x9d   :  { %v525_v44 = vld [vmem:[#allocation2 + $0xcc0] sm:$0xff]  ;;  %v6416_v49 = vcombine.high %v397_v42, %v401_v43  ;;  %2934 = vmatprep.subr.bf16.mxu1 %v6552_v45  ;;  %v6415_v55 = vcombine.low %v397_v42, %v401_v43  ;;  %v6178_v42 = vcombine.high %v158_v36, %v162_v37  ;;  %v150_v45 = vld [vmem:[#allocation2 + $0x108] sm:$0xff] }
  0x9e   :  { %v529_v46 = vld [vmem:[#allocation2 + $0xce0] sm:$0xff]  ;;  %2894 = vmatpush1.bf16.msra.mxu0 %v6423_v47  ;;  %2935 = vmatpush1.bf16.msra.mxu1 %v6551_v48  ;;  %v6177_v48 = vcombine.low %v158_v36, %v162_v37  ;;  %v230_v37 = vld [vmem:[#allocation2 + $0x388] sm:$0xff] }
  0x9f   :  { %v389_v50 = vld [vmem:[#allocation2 + $0x880] sm:$0xff]  ;;  %v6544_v53 = vcombine.high %v525_v44, %v529_v46  ;;  %2895 = vmatprep.subr.bf16.mxu0 %v6416_v49  ;;  %v6543_v56 = vcombine.low %v525_v44, %v529_v46  ;;  %v154_v46 = vld [vmem:[#allocation2 + $0x128] sm:$0xff] }
  0xa0   :  { %v393_v51 = vld [vmem:[#allocation2 + $0x8a0] sm:$0xff] }
  0xa1   :  { %v517_v52 = vld [vmem:[#allocation2 + $0xc80] sm:$0xff]  ;;  %v6408_v57 = vcombine.high %v389_v50, %v393_v51  ;;  %2936 = vmatprep.subr.bf16.mxu1 %v6544_v53  ;;  %v6407_v1 = vcombine.low %v389_v50, %v393_v51  ;;  %v6170_v50 = vcombine.high %v150_v45, %v154_v46  ;;  %v142_v53 = vld [vmem:[#allocation2 + $0xc8] sm:$0xff] }
  0xa2   :  { %v521_v54 = vld [vmem:[#allocation2 + $0xca0] sm:$0xff]  ;;  %2896 = vmatpush1.bf16.msra.mxu0 %v6415_v55  ;;  %2937 = vmatpush1.bf16.msra.mxu1 %v6543_v56  ;;  %v6169_v56 = vcombine.low %v150_v45, %v154_v46  ;;  %v290_v45 = vld [vmem:[#allocation2 + $0x568] sm:$0xff] }
  0xa3   :  { %v381_v60 = vld [vmem:[#allocation2 + $0x840] sm:$0xff]  ;;  %v6536_v63 = vcombine.high %v517_v52, %v521_v54  ;;  %2897 = vmatprep.subr.bf16.mxu0 %v6408_v57  ;;  %v6535_v2 = vcombine.low %v517_v52, %v521_v54  ;;  %v146_v54 = vld [vmem:[#allocation2 + $0xe8] sm:$0xff] }
  0xa4   :  { %v385_v61 = vld [vmem:[#allocation2 + $0x860] sm:$0xff]  ;;  %v222_v46 = vld [vmem:[#allocation2 + $0x348] sm:$0xff] }
  0xa5   :  { %v509_v62 = vld [vmem:[#allocation2 + $0xc40] sm:$0xff]  ;;  %v6400_v3 = vcombine.high %v381_v60, %v385_v61  ;;  %2938 = vmatprep.subr.bf16.mxu1 %v6536_v63  ;;  %v6399_v9 = vcombine.low %v381_v60, %v385_v61  ;;  %v6162_v60 = vcombine.high %v142_v53, %v146_v54  ;;  %v134_v63 = vld [vmem:[#allocation2 + $0x88] sm:$0xff] }
  0xa6   :  { %v513_v0 = vld [vmem:[#allocation2 + $0xc60] sm:$0xff]  ;;  %2898 = vmatpush1.bf16.msra.mxu0 %v6407_v1  ;;  %2939 = vmatpush1.bf16.msra.mxu1 %v6535_v2  ;;  %v6161_v2 = vcombine.low %v142_v53, %v146_v54  ;;  %v282_v53 = vld [vmem:[#allocation2 + $0x528] sm:$0xff] }
  0xa7   :  { %v373_v4 = vld [vmem:[#allocation2 + $0x800] sm:$0xff]  ;;  %v6528_v7 = vcombine.high %v509_v62, %v513_v0  ;;  %2899 = vmatprep.subr.bf16.mxu0 %v6400_v3  ;;  %v6527_v10 = vcombine.low %v509_v62, %v513_v0  ;;  %v138_v0 = vld [vmem:[#allocation2 + $0xa8] sm:$0xff] }
  0xa8   :  { %v377_v5 = vld [vmem:[#allocation2 + $0x820] sm:$0xff]  ;;  %v214_v54 = vld [vmem:[#allocation2 + $0x308] sm:$0xff] }
  0xa9   :  { %v501_v6 = vld [vmem:[#allocation2 + $0xc00] sm:$0xff]  ;;  %v6392_v11 = vcombine.high %v373_v4, %v377_v5  ;;  %2940 = vmatprep.subr.bf16.mxu1 %v6528_v7  ;;  %v6391_v20 = vcombine.low %v373_v4, %v377_v5  ;;  %v6154_v4 = vcombine.high %v134_v63, %v138_v0  ;;  %v126_v7 = vld [vmem:[#allocation2 + $0x48] sm:$0xff] }
  0xaa   :  { %v505_v8 = vld [vmem:[#allocation2 + $0xc20] sm:$0xff]  ;;  %2900 = vmatpush1.bf16.msra.mxu0 %v6399_v9  ;;  %2941 = vmatpush1.bf16.msra.mxu1 %v6527_v10  ;;  %v6153_v10 = vcombine.low %v134_v63, %v138_v0  ;;  %v274_v63 = vld [vmem:[#allocation2 + $0x4e8] sm:$0xff] }
  0xab   :  { %v493_v12 = vld [vmem:[#allocation2 + $0xbc0] sm:$0xff]  ;;  %v6520_v15 = vcombine.high %v501_v6, %v505_v8  ;;  %2901 = vmatprep.subr.bf16.mxu0 %v6392_v11  ;;  %v6519_v21 = vcombine.low %v501_v6, %v505_v8  ;;  %v130_v8 = vld [vmem:[#allocation2 + $0x68] sm:$0xff] }
  0xac   :  { %v497_v13 = vld [vmem:[#allocation2 + $0xbe0] sm:$0xff]  ;;  %v206_v0 = vld [vmem:[#allocation2 + $0x2c8] sm:$0xff] }
  0xad   :  { %v6512_v22 = vcombine.high %v493_v12, %v497_v13  ;;  %v485_v23 = vld [vmem:[#allocation2 + $0xb80] sm:$0xff]  ;;  %2942 = vmatprep.subr.bf16.mxu1 %v6520_v15  ;;  %v6511_v28 = vcombine.low %v493_v12, %v497_v13  ;;  %v6146_v12 = vcombine.high %v126_v7, %v130_v8  ;;  %v118_v15 = vld [vmem:[#allocation2 + $0x8] sm:$0xff] }
  0xae   :  { %v489_v24 = vld [vmem:[#allocation2 + $0xba0] sm:$0xff]  ;;  %2902 = vmatpush1.bf16.msra.mxu0 %v6391_v20  ;;  %2943 = vmatpush1.bf16.msra.mxu1 %v6519_v21  ;;  %v6145_v20 = vcombine.low %v126_v7, %v130_v8  ;;  %v266_v7 = vld [vmem:[#allocation2 + $0x4a8] sm:$0xff] }
  0xaf   :  { %2903 = vmatprep.subr.bf16.mxu0 %v6512_v22  ;;  %v6504_v32 = vcombine.high %v485_v23, %v489_v24  ;;  %v477_v33 = vld [vmem:[#allocation2 + $0xb40] sm:$0xff]  ;;  %2969 = vmatprep.subr.bf16.mxu1 %v6194_v26  ;;  %v6503_v39 = vcombine.low %v485_v23, %v489_v24  ;;  %v6138_v22 = vcombine.high %v118_v15, %v122_v17  ;;  %v302_v23 = vld [vmem:[#allocation2 + $0x5c8] sm:$0xff] }
  0xb0   :  { %v481_v34 = vld [vmem:[#allocation2 + $0xb60] sm:$0xff]  ;;  %v306_v24 = vld [vmem:[#allocation2 + $0x5e8] sm:$0xff] }
  0xb1   :  { %2961 = vmatmul.mubr.bf16.vlgmr.msra.gmra.mxu1 %v7277_v30  ;;  %v6496_v41 = vcombine.high %v477_v33, %v481_v34  ;;  %v469_v43 = vld [vmem:[#allocation2 + $0xb00] sm:$0xff]  ;;  %v6495_v47 = vcombine.low %v477_v33, %v481_v34  ;;  %v242_v26 = vld [vmem:[#allocation2 + $0x3e8] sm:$0xff] }
  0xb2   :  { %2904 = vmatpush2.bf16.msra.mxu0 %v6511_v28  ;;  %2970 = vmatpush1.bf16.msra.mxu1 %v6193_v31  ;;  %v473_v44 = vld [vmem:[#allocation2 + $0xb20] sm:$0xff]  ;;  %v6137_v31 = vcombine.low %v118_v15, %v122_v17  ;;  %v6258_v33 = vcombine.high %v238_v25, %v242_v26  ;;  %v294_v34 = vld [vmem:[#allocation2 + $0x588] sm:$0xff] }
  0xb3   :  { %2905 = vmatprep.subr.bf16.mxu0 %v6504_v32  ;;  %2971 = vmatprep.subr.bf16.mxu1 %v6186_v35  ;;  %v6488_v49 = vcombine.high %v469_v43, %v473_v44  ;;  %v461_v51 = vld [vmem:[#allocation2 + $0xac0] sm:$0xff]  ;;  %v6487_v55 = vcombine.low %v469_v43, %v473_v44  ;;  %v6322_v32 = vcombine.high %v302_v23, %v306_v24  ;;  %v298_v35 = vld [vmem:[#allocation2 + $0x5a8] sm:$0xff] }
  0xb4   :  { %3001 = vmatprep.mubr.bf16.mxu1 %v7249_v58  ;;  %v465_v52 = vld [vmem:[#allocation2 + $0xae0] sm:$0xff]  ;;  %v286_v44 = vld [vmem:[#allocation2 + $0x548] sm:$0xff] }
  0xb5   :  { %v6480_v57 = vcombine.high %v461_v51, %v465_v52  ;;  %v453_v61 = vld [vmem:[#allocation2 + $0xa80] sm:$0xff]  ;;  %v6479_v1 = vcombine.low %v461_v51, %v465_v52  ;;  %v278_v52 = vld [vmem:[#allocation2 + $0x508] sm:$0xff] }
  0xb6   :  { %2906 = vmatpush2.bf16.msra.mxu0 %v6503_v39  ;;  %2972 = vmatpush1.bf16.msra.mxu1 %v6185_v40  ;;  %v457_v62 = vld [vmem:[#allocation2 + $0xaa0] sm:$0xff]  ;;  %v234_v39 = vld [vmem:[#allocation2 + $0x3a8] sm:$0xff]  ;;  %v6321_v40 = vcombine.low %v302_v23, %v306_v24 }
  0xb7   :  { %2907 = vmatprep.subr.bf16.mxu0 %v6496_v41  ;;  %2973 = vmatprep.subr.bf16.mxu1 %v6178_v42  ;;  %v6472_v3 = vcombine.high %v453_v61, %v457_v62  ;;  %v445_v5 = vld [vmem:[#allocation2 + $0xa40] sm:$0xff]  ;;  %v6471_v9 = vcombine.low %v453_v61, %v457_v62  ;;  %v6257_v41 = vcombine.low %v238_v25, %v242_v26  ;;  %v270_v62 = vld [vmem:[#allocation2 + $0x4c8] sm:$0xff] }
  0xb8   :  { %v449_v6 = vld [vmem:[#allocation2 + $0xa60] sm:$0xff]  ;;  %v6314_v42 = vcombine.high %v294_v34, %v298_v35  ;;  %v6250_v43 = vcombine.high %v230_v37, %v234_v39  ;;  %v198_v8 = vld [vmem:[#allocation2 + $0x288] sm:$0xff] }
  0xb9   :  { %v6464_v11 = vcombine.high %v445_v5, %v449_v6  ;;  %v437_v13 = vld [vmem:[#allocation2 + $0xa00] sm:$0xff]  ;;  %v6463_v18 = vcombine.low %v445_v5, %v449_v6  ;;  %v262_v6 = vld [vmem:[#allocation2 + $0x488] sm:$0xff] }
  0xba   :  { %2908 = vmatpush2.bf16.msra.mxu0 %v6495_v47  ;;  %2974 = vmatpush1.bf16.msra.mxu1 %v6177_v48  ;;  %v441_v14 = vld [vmem:[#allocation2 + $0xa20] sm:$0xff]  ;;  %v226_v47 = vld [vmem:[#allocation2 + $0x368] sm:$0xff]  ;;  %v6313_v48 = vcombine.low %v294_v34, %v298_v35 }
  0xbb   :  { %2909 = vmatprep.subr.bf16.mxu0 %v6488_v49  ;;  %2975 = vmatprep.subr.bf16.mxu1 %v6170_v50  ;;  %v6456_v21 = vcombine.high %v437_v13, %v441_v14  ;;  %v6455_v27 = vcombine.low %v437_v13, %v441_v14  ;;  %v107_v28 = vld [vmem:[%s7548_s0 + $0x20] sm:$0xff]  ;;  %v6249_v49 = vcombine.low %v230_v37, %v234_v39  ;;  %v254_v14 = vld [vmem:[#allocation2 + $0x448] sm:$0xff] }
  0xbc   :  { %v7284_v36 = vpack.c.bf16 %v107_v28, %v107_v28  ;;  %v6306_v50 = vcombine.high %v286_v44, %v290_v45  ;;  %v6242_v51 = vcombine.high %v222_v46, %v226_v47  ;;  %v258_v15 = vld [vmem:[#allocation2 + $0x468] sm:$0xff] }
  0xbd   :  { %v190_v17 = vld [vmem:[#allocation2 + $0x248] sm:$0xff]  ;;  %v6273_v28 = vcombine.low %v254_v14, %v258_v15 }
  0xbe   :  { %2910 = vmatpush2.bf16.msra.mxu0 %v6487_v55  ;;  %2976 = vmatpush1.bf16.msra.mxu1 %v6169_v56  ;;  %v218_v55 = vld [vmem:[#allocation2 + $0x328] sm:$0xff]  ;;  %v6305_v56 = vcombine.low %v286_v44, %v290_v45 }
  0xbf   :  { %2911 = vmatprep.subr.bf16.mxu0 %v6480_v57  ;;  %2977 = vmatprep.subr.bf16.mxu1 %v6162_v60  ;;  %v6241_v57 = vcombine.low %v222_v46, %v226_v47  ;;  %v6298_v60 = vcombine.high %v278_v52, %v282_v53  ;;  %v6234_v61 = vcombine.high %v214_v54, %v218_v55  ;;  %v246_v24 = vld [vmem:[#allocation2 + $0x408] sm:$0xff] }
  0xc0   :  { %v250_v25 = vld [vmem:[#allocation2 + $0x428] sm:$0xff] }
  0xc1   :  { %v182_v26 = vld [vmem:[#allocation2 + $0x208] sm:$0xff] }
  0xc2   :  { %2912 = vmatpush2.bf16.msra.mxu0 %v6479_v1  ;;  %2978 = vmatpush1.bf16.msra.mxu1 %v6161_v2  ;;  %v210_v1 = vld [vmem:[#allocation2 + $0x2e8] sm:$0xff]  ;;  %v6297_v2 = vcombine.low %v278_v52, %v282_v53 }
  0xc3   :  { %2913 = vmatprep.subr.bf16.mxu0 %v6472_v3  ;;  %2979 = vmatprep.subr.bf16.mxu1 %v6154_v4  ;;  %v6233_v3 = vcombine.low %v214_v54, %v218_v55  ;;  %v6290_v4 = vcombine.high %v270_v62, %v274_v63  ;;  %v6226_v5 = vcombine.high %v206_v0, %v210_v1  ;;  %v366_v34 = vld [vmem:[#allocation2 + $0x7c8] sm:$0xff] }
  0xc4   :  { %v370_v35 = vld [vmem:[#allocation2 + $0x7e8] sm:$0xff] }
  0xc5   :  { %v430_v37 = vld [vmem:[#allocation2 + $0x9c8] sm:$0xff] }
  0xc6   :  { %2914 = vmatpush2.bf16.msra.mxu0 %v6471_v9  ;;  %2980 = vmatpush1.bf16.msra.mxu1 %v6153_v10  ;;  %v202_v9 = vld [vmem:[#allocation2 + $0x2a8] sm:$0xff]  ;;  %v6289_v10 = vcombine.low %v270_v62, %v274_v63 }
  0xc7   :  { %2915 = vmatprep.subr.bf16.mxu0 %v6464_v11  ;;  %2981 = vmatprep.subr.bf16.mxu1 %v6146_v12  ;;  %v6225_v11 = vcombine.low %v206_v0, %v210_v1  ;;  %v6282_v12 = vcombine.high %v262_v6, %v266_v7  ;;  %v6218_v13 = vcombine.high %v198_v8, %v202_v9  ;;  %v434_v39 = vld [vmem:[#allocation2 + $0x9e8] sm:$0xff] }
  0xc8   :  { %v358_v44 = vld [vmem:[#allocation2 + $0x788] sm:$0xff] }
  0xc9   :  { %v362_v45 = vld [vmem:[#allocation2 + $0x7a8] sm:$0xff] }
  0xca   :  { %2916 = vmatpush2.bf16.msra.mxu0 %v6463_v18  ;;  %2982 = vmatpush1.bf16.msra.mxu1 %v6145_v20  ;;  %v194_v18 = vld [vmem:[#allocation2 + $0x268] sm:$0xff]  ;;  %v6281_v20 = vcombine.low %v262_v6, %v266_v7 }
  0xcb   :  { %2917 = vmatprep.subr.bf16.mxu0 %v6456_v21  ;;  %2983 = vmatprep.subr.bf16.mxu1 %v6138_v22  ;;  %v6217_v21 = vcombine.low %v198_v8, %v202_v9  ;;  %v6274_v22 = vcombine.high %v254_v14, %v258_v15  ;;  %v6210_v23 = vcombine.high %v190_v17, %v194_v18  ;;  %v422_v46 = vld [vmem:[#allocation2 + $0x988] sm:$0xff] }
  0xcc   :  { %v426_v47 = vld [vmem:[#allocation2 + $0x9a8] sm:$0xff] }
  0xcd   :  { %v350_v52 = vld [vmem:[#allocation2 + $0x748] sm:$0xff] }
  0xce   :  { %2918 = vmatpush2.bf16.msra.mxu0 %v6455_v27  ;;  %2984 = vmatpush1.bf16.msra.mxu1 %v6137_v31  ;;  %v186_v27 = vld [vmem:[#allocation2 + $0x228] sm:$0xff]  ;;  %v6209_v31 = vcombine.low %v190_v17, %v194_v18 }
  0xcf   :  { %3010 = vmatprep.subr.bf16.mxu0 %v6322_v32  ;;  %2985 = vmatprep.subr.bf16.mxu1 %v6258_v33  ;;  %v6266_v32 = vcombine.high %v246_v24, %v250_v25  ;;  %v6202_v33 = vcombine.high %v182_v26, %v186_v27  ;;  %v354_v53 = vld [vmem:[#allocation2 + $0x768] sm:$0xff] }
  0xd0   :  { %v414_v54 = vld [vmem:[#allocation2 + $0x948] sm:$0xff] }
  0xd1   :  { %2920 = vmatmul.mubr.bf16.vlgmr.msra.gmra.mxu0 %v7284_v36  ;;  %v418_v55 = vld [vmem:[#allocation2 + $0x968] sm:$0xff] }
  0xd2   :  { %3011 = vmatpush1.bf16.msra.mxu0 %v6321_v40  ;;  %3042 = vmatprep.mubr.bf16.mxu0 %v7251_v59  ;;  %v6265_v40 = vcombine.low %v246_v24, %v250_v25  ;;  %v342_v62 = vld [vmem:[#allocation2 + $0x708] sm:$0xff] }
  0xd3   :  { %2986 = vmatpush2.bf16.msra.mxu1 %v6257_v41  ;;  %3012 = vmatprep.subr.bf16.mxu0 %v6314_v42  ;;  %v6201_v41 = vcombine.low %v182_v26, %v186_v27  ;;  %v6386_v42 = vcombine.high %v366_v34, %v370_v35  ;;  %v346_v63 = vld [vmem:[#allocation2 + $0x728] sm:$0xff] }
  0xd4   :  { %2987 = vmatprep.subr.bf16.mxu1 %v6250_v43  ;;  %v6450_v43 = vcombine.high %v430_v37, %v434_v39  ;;  %v406_v0 = vld [vmem:[#allocation2 + $0x908] sm:$0xff] }
  0xd5   :  { %v410_v1 = vld [vmem:[#allocation2 + $0x928] sm:$0xff] }
  0xd6   :  { %3013 = vmatpush1.bf16.msra.mxu0 %v6313_v48  ;;  %v6385_v48 = vcombine.low %v366_v34, %v370_v35  ;;  %v334_v6 = vld [vmem:[#allocation2 + $0x6c8] sm:$0xff] }
  0xd7   :  { %2988 = vmatpush2.bf16.msra.mxu1 %v6249_v49  ;;  %3014 = vmatprep.subr.bf16.mxu0 %v6306_v50  ;;  %v6449_v49 = vcombine.low %v430_v37, %v434_v39  ;;  %v6378_v50 = vcombine.high %v358_v44, %v362_v45  ;;  %v338_v7 = vld [vmem:[#allocation2 + $0x6e8] sm:$0xff] }
  0xd8   :  { %2989 = vmatprep.subr.bf16.mxu1 %v6242_v51  ;;  %v6442_v51 = vcombine.high %v422_v46, %v426_v47  ;;  %v398_v8 = vld [vmem:[#allocation2 + $0x8c8] sm:$0xff] }
  0xd9   :  { %v402_v9 = vld [vmem:[#allocation2 + $0x8e8] sm:$0xff] }
  0xda   :  { %3015 = vmatpush1.bf16.msra.mxu0 %v6305_v56  ;;  %v6377_v56 = vcombine.low %v358_v44, %v362_v45  ;;  %v326_v14 = vld [vmem:[#allocation2 + $0x688] sm:$0xff] }
  0xdb   :  { %2990 = vmatpush2.bf16.msra.mxu1 %v6241_v57  ;;  %3016 = vmatprep.subr.bf16.mxu0 %v6298_v60  ;;  %v6441_v57 = vcombine.low %v422_v46, %v426_v47  ;;  %v6370_v60 = vcombine.high %v350_v52, %v354_v53  ;;  %v330_v15 = vld [vmem:[#allocation2 + $0x6a8] sm:$0xff] }
  0xdc   :  { %2991 = vmatprep.subr.bf16.mxu1 %v6234_v61  ;;  %v6434_v61 = vcombine.high %v414_v54, %v418_v55  ;;  %v390_v17 = vld [vmem:[#allocation2 + $0x888] sm:$0xff] }
  0xdd   :  { %v394_v18 = vld [vmem:[#allocation2 + $0x8a8] sm:$0xff] }
  0xde   :  { %3017 = vmatpush1.bf16.msra.mxu0 %v6297_v2  ;;  %v6369_v2 = vcombine.low %v350_v52, %v354_v53  ;;  %v318_v24 = vld [vmem:[#allocation2 + $0x648] sm:$0xff] }
  0xdf   :  { %2992 = vmatpush2.bf16.msra.mxu1 %v6233_v3  ;;  %3018 = vmatprep.subr.bf16.mxu0 %v6290_v4  ;;  %v6433_v3 = vcombine.low %v414_v54, %v418_v55  ;;  %v6362_v4 = vcombine.high %v342_v62, %v346_v63  ;;  %v322_v25 = vld [vmem:[#allocation2 + $0x668] sm:$0xff] }
  0xe0   :  { %2993 = vmatprep.subr.bf16.mxu1 %v6226_v5  ;;  %v6426_v5 = vcombine.high %v406_v0, %v410_v1  ;;  %v382_v26 = vld [vmem:[#allocation2 + $0x848] sm:$0xff] }
  0xe1   :  { %v386_v27 = vld [vmem:[#allocation2 + $0x868] sm:$0xff] }
  0xe2   :  { %3019 = vmatpush1.bf16.msra.mxu0 %v6289_v10  ;;  %v6361_v10 = vcombine.low %v342_v62, %v346_v63  ;;  %v310_v34 = vld [vmem:[#allocation2 + $0x608] sm:$0xff] }
  0xe3   :  { %2994 = vmatpush2.bf16.msra.mxu1 %v6225_v11  ;;  %3020 = vmatprep.subr.bf16.mxu0 %v6282_v12  ;;  %v6425_v11 = vcombine.low %v406_v0, %v410_v1  ;;  %v6354_v12 = vcombine.high %v334_v6, %v338_v7  ;;  %v314_v35 = vld [vmem:[#allocation2 + $0x628] sm:$0xff] }
  0xe4   :  { %2995 = vmatprep.subr.bf16.mxu1 %v6218_v13  ;;  %v6418_v13 = vcombine.high %v398_v8, %v402_v9  ;;  %v374_v37 = vld [vmem:[#allocation2 + $0x808] sm:$0xff] }
  0xe5   :  { %v378_v39 = vld [vmem:[#allocation2 + $0x828] sm:$0xff] }
  0xe6   :  { %3021 = vmatpush1.bf16.msra.mxu0 %v6281_v20  ;;  %v6353_v20 = vcombine.low %v334_v6, %v338_v7  ;;  %v558_v44 = vld [vmem:[#allocation2 + $0xdc8] sm:$0xff] }
  0xe7   :  { %2996 = vmatpush2.bf16.msra.mxu1 %v6217_v21  ;;  %3022 = vmatprep.subr.bf16.mxu0 %v6274_v22  ;;  %v6417_v21 = vcombine.low %v398_v8, %v402_v9  ;;  %v6346_v22 = vcombine.high %v326_v14, %v330_v15  ;;  %v562_v45 = vld [vmem:[#allocation2 + $0xde8] sm:$0xff] }
  0xe8   :  { %2997 = vmatprep.subr.bf16.mxu1 %v6210_v23  ;;  %v6410_v23 = vcombine.high %v390_v17, %v394_v18  ;;  %v494_v46 = vld [vmem:[#allocation2 + $0xbc8] sm:$0xff] }
  0xe9   :  { %v498_v47 = vld [vmem:[#allocation2 + $0xbe8] sm:$0xff] }
  0xea   :  { %3023 = vmatpush1.bf16.msra.mxu0 %v6273_v28  ;;  %v6345_v28 = vcombine.low %v326_v14, %v330_v15  ;;  %v550_v52 = vld [vmem:[#allocation2 + $0xd88] sm:$0xff] }
  0xeb   :  { %2998 = vmatpush2.bf16.msra.mxu1 %v6209_v31  ;;  %3024 = vmatprep.subr.bf16.mxu0 %v6266_v32  ;;  %v6409_v31 = vcombine.low %v390_v17, %v394_v18  ;;  %v6338_v32 = vcombine.high %v318_v24, %v322_v25  ;;  %v554_v53 = vld [vmem:[#allocation2 + $0xda8] sm:$0xff] }
  0xec   :  { %2999 = vmatprep.subr.bf16.mxu1 %v6202_v33  ;;  %v6402_v33 = vcombine.high %v382_v26, %v386_v27  ;;  %v486_v54 = vld [vmem:[#allocation2 + $0xb88] sm:$0xff] }
  0xed   :  { %v490_v55 = vld [vmem:[#allocation2 + $0xba8] sm:$0xff] }
  0xee   :  { %3025 = vmatpush1.bf16.msra.mxu0 %v6265_v40  ;;  %v6337_v40 = vcombine.low %v318_v24, %v322_v25  ;;  %v542_v62 = vld [vmem:[#allocation2 + $0xd48] sm:$0xff] }
  0xef   :  { %3000 = vmatpush2.bf16.msra.mxu1 %v6201_v41  ;;  %3026 = vmatprep.subr.bf16.mxu0 %v6386_v42  ;;  %v6401_v41 = vcombine.low %v382_v26, %v386_v27  ;;  %v6330_v42 = vcombine.high %v310_v34, %v314_v35  ;;  %v546_v63 = vld [vmem:[#allocation2 + $0xd68] sm:$0xff] }
  0xf0   :  { %3051 = vmatprep.subr.bf16.mxu1 %v6450_v43  ;;  %v6394_v43 = vcombine.high %v374_v37, %v378_v39  ;;  %v478_v0 = vld [vmem:[#allocation2 + $0xb48] sm:$0xff] }
  0xf1   :  { %v482_v1 = vld [vmem:[#allocation2 + $0xb68] sm:$0xff] }
  0xf2   :  { %3002 = vmatmul.mubr.bf16.vlgmr.msra.gmra.mxu1 %v7261_v16  ;;  %3027 = vmatpush2.bf16.msra.mxu0 %v6385_v48  ;;  %v6329_v48 = vcombine.low %v310_v34, %v314_v35  ;;  %v534_v6 = vld [vmem:[#allocation2 + $0xd08] sm:$0xff] }
  0xf3   :  { %3052 = vmatpush1.bf16.msra.mxu1 %v6449_v49  ;;  %3028 = vmatprep.subr.bf16.mxu0 %v6378_v50  ;;  %v6393_v49 = vcombine.low %v374_v37, %v378_v39  ;;  %v6578_v50 = vcombine.high %v558_v44, %v562_v45  ;;  %v538_v7 = vld [vmem:[#allocation2 + $0xd28] sm:$0xff] }
  0xf4   :  { %3053 = vmatprep.subr.bf16.mxu1 %v6442_v51  ;;  %3083 = vmatprep.mubr.bf16.mxu1 %v7269_v29  ;;  %v6514_v51 = vcombine.high %v494_v46, %v498_v47  ;;  %v470_v8 = vld [vmem:[#allocation2 + $0xb08] sm:$0xff] }
  0xf5   :  { %v474_v9 = vld [vmem:[#allocation2 + $0xb28] sm:$0xff] }
  0xf6   :  { %3029 = vmatpush2.bf16.msra.mxu0 %v6377_v56  ;;  %v6577_v56 = vcombine.low %v558_v44, %v562_v45  ;;  %v526_v14 = vld [vmem:[#allocation2 + $0xcc8] sm:$0xff] }
  0xf7   :  { %3054 = vmatpush1.bf16.msra.mxu1 %v6441_v57  ;;  %3030 = vmatprep.subr.bf16.mxu0 %v6370_v60  ;;  %v6513_v57 = vcombine.low %v494_v46, %v498_v47  ;;  %v6570_v60 = vcombine.high %v550_v52, %v554_v53  ;;  %v530_v15 = vld [vmem:[#allocation2 + $0xce8] sm:$0xff] }
  0xf8   :  { %3055 = vmatprep.subr.bf16.mxu1 %v6434_v61  ;;  %v6506_v61 = vcombine.high %v486_v54, %v490_v55  ;;  %v462_v17 = vld [vmem:[#allocation2 + $0xac8] sm:$0xff] }
  0xf9   :  { %v466_v18 = vld [vmem:[#allocation2 + $0xae8] sm:$0xff] }
  0xfa   :  { %3031 = vmatpush2.bf16.msra.mxu0 %v6369_v2  ;;  %v6569_v2 = vcombine.low %v550_v52, %v554_v53  ;;  %v518_v24 = vld [vmem:[#allocation2 + $0xc88] sm:$0xff]  ;;  %v175_v52 = vld [vmem:[#allocation2 + $0x1d0] sm:$0xff] }
  0xfb   :  { %3056 = vmatpush1.bf16.msra.mxu1 %v6433_v3  ;;  %3032 = vmatprep.subr.bf16.mxu0 %v6362_v4  ;;  %v6505_v3 = vcombine.low %v486_v54, %v490_v55  ;;  %v6562_v4 = vcombine.high %v542_v62, %v546_v63  ;;  %v522_v25 = vld [vmem:[#allocation2 + $0xca8] sm:$0xff]  ;;  %v179_v53 = vld [vmem:[#allocation2 + $0x1f0] sm:$0xff] }
  0xfc   :  { %3057 = vmatprep.subr.bf16.mxu1 %v6426_v5  ;;  %v6498_v5 = vcombine.high %v478_v0, %v482_v1  ;;  %v454_v26 = vld [vmem:[#allocation2 + $0xa88] sm:$0xff]  ;;  %v303_v54 = vld [vmem:[#allocation2 + $0x5d0] sm:$0xff] }
  0xfd   :  { %v458_v27 = vld [vmem:[#allocation2 + $0xaa8] sm:$0xff]  ;;  %v307_v55 = vld [vmem:[#allocation2 + $0x5f0] sm:$0xff] }
  0xfe   :  { %3033 = vmatpush2.bf16.msra.mxu0 %v6361_v10  ;;  %v6561_v10 = vcombine.low %v542_v62, %v546_v63  ;;  %v510_v34 = vld [vmem:[#allocation2 + $0xc48] sm:$0xff]  ;;  %v167_v62 = vld [vmem:[#allocation2 + $0x190] sm:$0xff] }
  0xff   :  { %3058 = vmatpush1.bf16.msra.mxu1 %v6425_v11  ;;  %3034 = vmatprep.subr.bf16.mxu0 %v6354_v12  ;;  %v6497_v11 = vcombine.low %v478_v0, %v482_v1  ;;  %v6554_v12 = vcombine.high %v534_v6, %v538_v7  ;;  %v514_v35 = vld [vmem:[#allocation2 + $0xc68] sm:$0xff]  ;;  %v171_v63 = vld [vmem:[#allocation2 + $0x1b0] sm:$0xff] }
 0x100   :  { %3059 = vmatprep.subr.bf16.mxu1 %v6418_v13  ;;  %v6490_v13 = vcombine.high %v470_v8, %v474_v9  ;;  %v446_v37 = vld [vmem:[#allocation2 + $0xa48] sm:$0xff]  ;;  %v295_v0 = vld [vmem:[#allocation2 + $0x590] sm:$0xff] }
 0x101   :  { %v450_v39 = vld [vmem:[#allocation2 + $0xa68] sm:$0xff]  ;;  %v299_v1 = vld [vmem:[#allocation2 + $0x5b0] sm:$0xff] }
 0x102   :  { %3035 = vmatpush2.bf16.msra.mxu0 %v6353_v20  ;;  %v6553_v20 = vcombine.low %v534_v6, %v538_v7  ;;  %v502_v44 = vld [vmem:[#allocation2 + $0xc08] sm:$0xff]  ;;  %v159_v6 = vld [vmem:[#allocation2 + $0x150] sm:$0xff] }
 0x103   :  { %3060 = vmatpush1.bf16.msra.mxu1 %v6417_v21  ;;  %3036 = vmatprep.subr.bf16.mxu0 %v6346_v22  ;;  %v6489_v21 = vcombine.low %v470_v8, %v474_v9  ;;  %v6546_v22 = vcombine.high %v526_v14, %v530_v15  ;;  %v506_v45 = vld [vmem:[#allocation2 + $0xc28] sm:$0xff]  ;;  %v163_v7 = vld [vmem:[#allocation2 + $0x170] sm:$0xff] }
 0x104   :  { %3061 = vmatprep.subr.bf16.mxu1 %v6410_v23  ;;  %v6482_v23 = vcombine.high %v462_v17, %v466_v18  ;;  %v438_v46 = vld [vmem:[#allocation2 + $0xa08] sm:$0xff]  ;;  %v287_v8 = vld [vmem:[#allocation2 + $0x550] sm:$0xff] }
 0x105   :  { %v442_v47 = vld [vmem:[#allocation2 + $0xa28] sm:$0xff]  ;;  %v291_v9 = vld [vmem:[#allocation2 + $0x570] sm:$0xff] }
 0x106   :  { %3037 = vmatpush2.bf16.msra.mxu0 %v6345_v28  ;;  %v6545_v28 = vcombine.low %v526_v14, %v530_v15  ;;  %v151_v14 = vld [vmem:[#allocation2 + $0x110] sm:$0xff] }
 0x107   :  { %3062 = vmatpush1.bf16.msra.mxu1 %v6409_v31  ;;  %3038 = vmatprep.subr.bf16.mxu0 %v6338_v32  ;;  %v6481_v31 = vcombine.low %v462_v17, %v466_v18  ;;  %v6538_v32 = vcombine.high %v518_v24, %v522_v25  ;;  %v155_v15 = vld [vmem:[#allocation2 + $0x130] sm:$0xff] }
 0x108   :  { %3063 = vmatprep.subr.bf16.mxu1 %v6402_v33  ;;  %v6474_v33 = vcombine.high %v454_v26, %v458_v27  ;;  %v279_v17 = vld [vmem:[#allocation2 + $0x510] sm:$0xff] }
 0x109   :  { %v283_v18 = vld [vmem:[#allocation2 + $0x530] sm:$0xff] }
 0x10a   :  { %3039 = vmatpush2.bf16.msra.mxu0 %v6337_v40  ;;  %v6537_v40 = vcombine.low %v518_v24, %v522_v25  ;;  %v143_v24 = vld [vmem:[#allocation2 + $0xd0] sm:$0xff] }
 0x10b   :  { %3064 = vmatpush1.bf16.msra.mxu1 %v6401_v41  ;;  %3040 = vmatprep.subr.bf16.mxu0 %v6330_v42  ;;  %v6473_v41 = vcombine.low %v454_v26, %v458_v27  ;;  %v6530_v42 = vcombine.high %v510_v34, %v514_v35  ;;  %v147_v25 = vld [vmem:[#allocation2 + $0xf0] sm:$0xff] }
 0x10c   :  { %3065 = vmatprep.subr.bf16.mxu1 %v6394_v43  ;;  %v6466_v43 = vcombine.high %v446_v37, %v450_v39  ;;  %v271_v26 = vld [vmem:[#allocation2 + $0x4d0] sm:$0xff] }
 0x10d   :  { %v275_v27 = vld [vmem:[#allocation2 + $0x4f0] sm:$0xff] }
 0x10e   :  { %3041 = vmatpush2.bf16.msra.mxu0 %v6329_v48  ;;  %v6529_v48 = vcombine.low %v510_v34, %v514_v35  ;;  %v135_v34 = vld [vmem:[#allocation2 + $0x90] sm:$0xff] }
 0x10f   :  { %3066 = vmatpush1.bf16.msra.mxu1 %v6393_v49  ;;  %3092 = vmatprep.subr.bf16.mxu0 %v6578_v50  ;;  %v6465_v49 = vcombine.low %v446_v37, %v450_v39  ;;  %v6522_v50 = vcombine.high %v502_v44, %v506_v45  ;;  %v139_v35 = vld [vmem:[#allocation2 + $0xb0] sm:$0xff] }
 0x110   :  { %3067 = vmatprep.subr.bf16.mxu1 %v6514_v51  ;;  %v6458_v51 = vcombine.high %v438_v46, %v442_v47  ;;  %v263_v37 = vld [vmem:[#allocation2 + $0x490] sm:$0xff] }
 0x111   :  { %3043 = vmatmul.mubr.bf16.vlgmr.msra.gmra.mxu0 %v7263_v19  ;;  %v267_v39 = vld [vmem:[#allocation2 + $0x4b0] sm:$0xff] }
 0x112   :  { %3093 = vmatpush1.bf16.msra.mxu0 %v6577_v56  ;;  %3124 = vmatprep.mubr.bf16.mxu0 %v7184_v38  ;;  %v6521_v56 = vcombine.low %v502_v44, %v506_v45  ;;  %v127_v44 = vld [vmem:[#allocation2 + $0x50] sm:$0xff] }
 0x113   :  { %3068 = vmatpush2.bf16.msra.mxu1 %v6513_v57  ;;  %3094 = vmatprep.subr.bf16.mxu0 %v6570_v60  ;;  %v6457_v57 = vcombine.low %v438_v46, %v442_v47  ;;  %v6196_v60 = vcombine.high %v175_v52, %v179_v53  ;;  %v131_v45 = vld [vmem:[#allocation2 + $0x70] sm:$0xff] }
 0x114   :  { %3069 = vmatprep.subr.bf16.mxu1 %v6506_v61  ;;  %v6324_v61 = vcombine.high %v303_v54, %v307_v55  ;;  %v255_v46 = vld [vmem:[#allocation2 + $0x450] sm:$0xff] }
 0x115   :  { %v259_v47 = vld [vmem:[#allocation2 + $0x470] sm:$0xff] }
 0x116   :  { %3095 = vmatpush1.bf16.msra.mxu0 %v6569_v2  ;;  %v6195_v2 = vcombine.low %v175_v52, %v179_v53  ;;  %v119_v52 = vld [vmem:[#allocation2 + $0x10] sm:$0xff] }
 0x117   :  { %3070 = vmatpush2.bf16.msra.mxu1 %v6505_v3  ;;  %3096 = vmatprep.subr.bf16.mxu0 %v6562_v4  ;;  %v6323_v3 = vcombine.low %v303_v54, %v307_v55  ;;  %v6188_v4 = vcombine.high %v167_v62, %v171_v63  ;;  %v123_v53 = vld [vmem:[#allocation2 + $0x30] sm:$0xff] }
 0x118   :  { %3071 = vmatprep.subr.bf16.mxu1 %v6498_v5  ;;  %v6316_v5 = vcombine.high %v295_v0, %v299_v1  ;;  %v247_v54 = vld [vmem:[#allocation2 + $0x410] sm:$0xff] }
 0x119   :  { %v251_v55 = vld [vmem:[#allocation2 + $0x430] sm:$0xff] }
 0x11a   :  { %3097 = vmatpush1.bf16.msra.mxu0 %v6561_v10  ;;  %v6187_v10 = vcombine.low %v167_v62, %v171_v63  ;;  %v239_v62 = vld [vmem:[#allocation2 + $0x3d0] sm:$0xff] }
 0x11b   :  { %3072 = vmatpush2.bf16.msra.mxu1 %v6497_v11  ;;  %3098 = vmatprep.subr.bf16.mxu0 %v6554_v12  ;;  %v6315_v11 = vcombine.low %v295_v0, %v299_v1  ;;  %v6180_v12 = vcombine.high %v159_v6, %v163_v7  ;;  %v243_v63 = vld [vmem:[#allocation2 + $0x3f0] sm:$0xff] }
 0x11c   :  { %3073 = vmatprep.subr.bf16.mxu1 %v6490_v13  ;;  %v6308_v13 = vcombine.high %v287_v8, %v291_v9  ;;  %v367_v0 = vld [vmem:[#allocation2 + $0x7d0] sm:$0xff] }
 0x11d   :  { %v371_v1 = vld [vmem:[#allocation2 + $0x7f0] sm:$0xff] }
 0x11e   :  { %3099 = vmatpush1.bf16.msra.mxu0 %v6553_v20  ;;  %v6179_v20 = vcombine.low %v159_v6, %v163_v7  ;;  %v231_v6 = vld [vmem:[#allocation2 + $0x390] sm:$0xff] }
 0x11f   :  { %3074 = vmatpush2.bf16.msra.mxu1 %v6489_v21  ;;  %3100 = vmatprep.subr.bf16.mxu0 %v6546_v22  ;;  %v6307_v21 = vcombine.low %v287_v8, %v291_v9  ;;  %v6172_v22 = vcombine.high %v151_v14, %v155_v15  ;;  %v235_v7 = vld [vmem:[#allocation2 + $0x3b0] sm:$0xff] }
 0x120   :  { %3075 = vmatprep.subr.bf16.mxu1 %v6482_v23  ;;  %v6300_v23 = vcombine.high %v279_v17, %v283_v18  ;;  %v359_v8 = vld [vmem:[#allocation2 + $0x790] sm:$0xff] }
 0x121   :  { %v363_v9 = vld [vmem:[#allocation2 + $0x7b0] sm:$0xff] }
 0x122   :  { %3101 = vmatpush1.bf16.msra.mxu0 %v6545_v28  ;;  %v6171_v28 = vcombine.low %v151_v14, %v155_v15  ;;  %v223_v14 = vld [vmem:[#allocation2 + $0x350] sm:$0xff] }
 0x123   :  { %3076 = vmatpush2.bf16.msra.mxu1 %v6481_v31  ;;  %3102 = vmatprep.subr.bf16.mxu0 %v6538_v32  ;;  %v6299_v31 = vcombine.low %v279_v17, %v283_v18  ;;  %v6164_v32 = vcombine.high %v143_v24, %v147_v25  ;;  %v227_v15 = vld [vmem:[#allocation2 + $0x370] sm:$0xff] }
 0x124   :  { %3077 = vmatprep.subr.bf16.mxu1 %v6474_v33  ;;  %v6292_v33 = vcombine.high %v271_v26, %v275_v27  ;;  %v351_v18 = vld [vmem:[#allocation2 + $0x750] sm:$0xff] }
 0x126   :  { %3103 = vmatpush1.bf16.msra.mxu0 %v6537_v40  ;;  %v6163_v40 = vcombine.low %v143_v24, %v147_v25  ;;  %v6379_v25 = vcombine.low %v359_v8, %v363_v9 }
 0x127   :  { %3078 = vmatpush2.bf16.msra.mxu1 %v6473_v41  ;;  %3104 = vmatprep.subr.bf16.mxu0 %v6530_v42  ;;  %v6291_v41 = vcombine.low %v271_v26, %v275_v27  ;;  %v6156_v42 = vcombine.high %v135_v34, %v139_v35  ;;  %v6244_v26 = vcombine.high %v223_v14, %v227_v15 }
 0x128   :  { %3079 = vmatprep.subr.bf16.mxu1 %v6466_v43  ;;  %v6284_v43 = vcombine.high %v263_v37, %v267_v39 }
 0x12a   :  { %3105 = vmatpush1.bf16.msra.mxu0 %v6529_v48  ;;  %v6155_v48 = vcombine.low %v135_v34, %v139_v35  ;;  %v343_v35 = vld [vmem:[#allocation2 + $0x710] sm:$0xff] }
 0x12b   :  { %3080 = vmatpush2.bf16.msra.mxu1 %v6465_v49  ;;  %3106 = vmatprep.subr.bf16.mxu0 %v6522_v50  ;;  %v6283_v49 = vcombine.low %v263_v37, %v267_v39  ;;  %v6148_v50 = vcombine.high %v127_v44, %v131_v45  ;;  %v347_v37 = vld [vmem:[#allocation2 + $0x730] sm:$0xff] }
 0x12c   :  { %3081 = vmatprep.subr.bf16.mxu1 %v6458_v51  ;;  %v6276_v51 = vcombine.high %v255_v46, %v259_v47 }
 0x12e   :  { %3107 = vmatpush1.bf16.msra.mxu0 %v6521_v56  ;;  %v6147_v56 = vcombine.low %v127_v44, %v131_v45  ;;  %v6364_v45 = vcombine.high %v343_v35, %v347_v37 }
 0x12f   :  { %3082 = vmatpush2.bf16.msra.mxu1 %v6457_v57  ;;  %3133 = vmatprep.subr.bf16.mxu0 %v6196_v60  ;;  %v6275_v57 = vcombine.low %v255_v46, %v259_v47  ;;  %v6140_v60 = vcombine.high %v119_v52, %v123_v53  ;;  %v207_v46 = vld [vmem:[#allocation2 + $0x2d0] sm:$0xff] }
 0x130   :  { %3174 = vmatprep.subr.bf16.mxu1 %v6324_v61  ;;  %v6268_v61 = vcombine.high %v247_v54, %v251_v55  ;;  %v211_v47 = vld [vmem:[#allocation2 + $0x2f0] sm:$0xff] }
 0x131   :  { %3125 = vmatmul.mubr.bf16.vlgmr.msra.gmra.mxu0 %v7277_v30 }
 0x132   :  { %3084 = vmatmul.mubr.bf16.vlgmr.msra.gmra.mxu1 %v7284_v36  ;;  %3134 = vmatpush1.bf16.msra.mxu0 %v6195_v2  ;;  %v6139_v2 = vcombine.low %v119_v52, %v123_v53  ;;  %v6228_v52 = vcombine.high %v207_v46, %v211_v47 }
 0x133   :  { %3175 = vmatpush1.bf16.msra.mxu1 %v6323_v3  ;;  %3135 = vmatprep.subr.bf16.mxu0 %v6188_v4  ;;  %v6267_v3 = vcombine.low %v247_v54, %v251_v55  ;;  %v6260_v4 = vcombine.high %v239_v62, %v243_v63  ;;  %v199_v54 = vld [vmem:[#allocation2 + $0x290] sm:$0xff] }
 0x134   :  { %3176 = vmatprep.subr.bf16.mxu1 %v6316_v5  ;;  %3165 = vmatprep.mubr.bf16.mxu0 %v7249_v58  ;;  %v6388_v5 = vcombine.high %v367_v0, %v371_v1  ;;  %v203_v55 = vld [vmem:[#allocation2 + $0x2b0] sm:$0xff] }
 0x135   :  { %3206 = vmatprep.mubr.bf16.mxu1 %v7251_v59 }
 0x136   :  { %3136 = vmatpush1.bf16.msra.mxu0 %v6187_v10  ;;  %v6259_v10 = vcombine.low %v239_v62, %v243_v63  ;;  %v6220_v62 = vcombine.high %v199_v54, %v203_v55 }
 0x137   :  { %3177 = vmatpush1.bf16.msra.mxu1 %v6315_v11  ;;  %3137 = vmatprep.subr.bf16.mxu0 %v6180_v12  ;;  %v6387_v11 = vcombine.low %v367_v0, %v371_v1  ;;  %v6252_v12 = vcombine.high %v231_v6, %v235_v7  ;;  %v191_v0 = vld [vmem:[#allocation2 + $0x250] sm:$0xff] }
 0x138   :  { %3178 = vmatprep.subr.bf16.mxu1 %v6308_v13  ;;  %v6380_v13 = vcombine.high %v359_v8, %v363_v9  ;;  %v195_v1 = vld [vmem:[#allocation2 + $0x270] sm:$0xff] }
 0x139   :  { %v183_v8 = vld [vmem:[#allocation2 + $0x210] sm:$0xff] }
 0x13a   :  { %3138 = vmatpush1.bf16.msra.mxu0 %v6179_v20  ;;  %v355_v20 = vld [vmem:[#allocation2 + $0x770] sm:$0xff] }
 0x13b   :  { %3179 = vmatpush1.bf16.msra.mxu1 %v6307_v21  ;;  %3139 = vmatprep.subr.bf16.mxu0 %v6172_v22  ;;  %v6251_v22 = vcombine.low %v231_v6, %v235_v7  ;;  %v6212_v6 = vcombine.high %v191_v0, %v195_v1  ;;  %v187_v9 = vld [vmem:[#allocation2 + $0x230] sm:$0xff] }
 0x13c   :  { %3180 = vmatprep.subr.bf16.mxu1 %v6300_v23 }
 0x13e   :  { %3140 = vmatpush1.bf16.msra.mxu0 %v6171_v28  ;;  %v6372_v28 = vcombine.high %v351_v18, %v355_v20 }
 0x13f   :  { %3181 = vmatpush1.bf16.msra.mxu1 %v6299_v31  ;;  %3141 = vmatprep.subr.bf16.mxu0 %v6164_v32  ;;  %v215_v31 = vld [vmem:[#allocation2 + $0x310] sm:$0xff] }
 0x140   :  { %3182 = vmatprep.subr.bf16.mxu1 %v6292_v33  ;;  %v219_v32 = vld [vmem:[#allocation2 + $0x330] sm:$0xff] }
 0x142   :  { %3142 = vmatpush1.bf16.msra.mxu0 %v6163_v40  ;;  %v6243_v40 = vcombine.low %v223_v14, %v227_v15  ;;  %v6204_v14 = vcombine.high %v183_v8, %v187_v9 }
 0x143   :  { %3183 = vmatpush1.bf16.msra.mxu1 %v6291_v41  ;;  %3143 = vmatprep.subr.bf16.mxu0 %v6156_v42  ;;  %v6371_v42 = vcombine.low %v351_v18, %v355_v20  ;;  %v435_v18 = vld [vmem:[#allocation2 + $0x9f0] sm:$0xff] }
 0x144   :  { %3184 = vmatprep.subr.bf16.mxu1 %v6284_v43  ;;  %v6236_v43 = vcombine.high %v215_v31, %v219_v32  ;;  %v559_v20 = vld [vmem:[#allocation2 + $0xdd0] sm:$0xff] }
 0x146   :  { %3144 = vmatpush1.bf16.msra.mxu0 %v6155_v48  ;;  %v335_v48 = vld [vmem:[#allocation2 + $0x6d0] sm:$0xff] }
 0x147   :  { %3185 = vmatpush1.bf16.msra.mxu1 %v6283_v49  ;;  %3145 = vmatprep.subr.bf16.mxu0 %v6148_v50  ;;  %v339_v49 = vld [vmem:[#allocation2 + $0x6f0] sm:$0xff]  ;;  %v6235_v50 = vcombine.low %v215_v31, %v219_v32 }
 0x148   :  { %3186 = vmatprep.subr.bf16.mxu1 %v6276_v51  ;;  %v6363_v51 = vcombine.low %v343_v35, %v347_v37  ;;  %v6356_v53 = vcombine.high %v335_v48, %v339_v49  ;;  %v551_v31 = vld [vmem:[#allocation2 + $0xd90] sm:$0xff] }
 0x149   :  { %v555_v32 = vld [vmem:[#allocation2 + $0xdb0] sm:$0xff] }
 0x14a   :  { %3146 = vmatpush1.bf16.msra.mxu0 %v6147_v56  ;;  %v327_v56 = vld [vmem:[#allocation2 + $0x690] sm:$0xff] }
 0x14b   :  { %3187 = vmatpush1.bf16.msra.mxu1 %v6275_v57  ;;  %3147 = vmatprep.subr.bf16.mxu0 %v6140_v60  ;;  %v331_v57 = vld [vmem:[#allocation2 + $0x6b0] sm:$0xff]  ;;  %v6227_v60 = vcombine.low %v207_v46, %v211_v47  ;;  %v6571_v46 = vcombine.low %v551_v31, %v555_v32 }
 0x14c   :  { %3188 = vmatprep.subr.bf16.mxu1 %v6268_v61  ;;  %v6355_v61 = vcombine.low %v335_v48, %v339_v49  ;;  %v6348_v63 = vcombine.high %v327_v56, %v331_v57 }
 0x14e   :  { %3148 = vmatpush1.bf16.msra.mxu0 %v6139_v2  ;;  %v319_v2 = vld [vmem:[#allocation2 + $0x650] sm:$0xff] }
 0x14f   :  { %3189 = vmatpush1.bf16.msra.mxu1 %v6267_v3  ;;  %3149 = vmatprep.subr.bf16.mxu0 %v6260_v4  ;;  %v323_v3 = vld [vmem:[#allocation2 + $0x670] sm:$0xff]  ;;  %v6219_v4 = vcombine.low %v199_v54, %v203_v55 }
 0x150   :  { %3190 = vmatprep.subr.bf16.mxu1 %v6388_v5  ;;  %v2880_v21 = vpop.f32.mrf.mxu1  ;;  %v6347_v5 = vcombine.low %v327_v56, %v331_v57  ;;  %v6340_v7 = vcombine.high %v319_v2, %v323_v3 }
 0x151   :  { %v2839_v17 = vpop.f32.mrf.mxu0 }
 0x152   :  { %3150 = vmatpush2.bf16.msra.mxu0 %v6259_v10  ;;  %v7296_v23 = vadd.f32 %v2880_v21, %v2839_v17  ;;  %v2882_v27 = vpop.f32.mrf.mxu1  ;;  %v311_v10 = vld [vmem:[#allocation2 + $0x610] sm:$0xff] }
 0x153   :  { %3191 = vmatpush2.bf16.msra.mxu1 %v6387_v11  ;;  %v2841_v24 = vpop.f32.mrf.mxu0  ;;  %3151 = vmatprep.subr.bf16.mxu0 %v6252_v12  ;;  %v315_v11 = vld [vmem:[#allocation2 + $0x630] sm:$0xff]  ;;  %v6211_v12 = vcombine.low %v191_v0, %v195_v1 }
 0x154   :  { %3192 = vmatprep.subr.bf16.mxu1 %v6380_v13  ;;  %v7298_v33 = vadd.f32 %v2882_v27, %v2841_v24  ;;  %v2884_v39 = vpop.f32.mrf.mxu1  ;;  %v6339_v13 = vcombine.low %v319_v2, %v323_v3  ;;  %v6332_v15 = vcombine.high %v311_v10, %v315_v11  ;;  %v431_v17 = vld [vmem:[#allocation2 + $0x9d0] sm:$0xff]  ;;  %v6331_v24 = vcombine.low %v311_v10, %v315_v11 }
 0x155   :  { %v2843_v34 = vpop.f32.mrf.mxu0  ;;  %v563_v21 = vld [vmem:[#allocation2 + $0xdf0] sm:$0xff]  ;;  %v6572_v39 = vcombine.high %v551_v31, %v555_v32 }
 0x156   :  { %3152 = vmatpush2.bf16.msra.mxu0 %v6251_v22  ;;  %v2885_v44 = vpop.f32.mrf.mxu1  ;;  %v6203_v22 = vcombine.low %v183_v8, %v187_v9  ;;  %v423_v27 = vld [vmem:[#allocation2 + $0x990] sm:$0xff]  ;;  %v6451_v34 = vcombine.low %v431_v17, %v435_v18  ;;  %v6579_v35 = vcombine.low %v559_v20, %v563_v21 }
 0x157   :  { %3193 = vmatpush2.bf16.msra.mxu1 %v6379_v25  ;;  %v2844_v41 = vpop.f32.mrf.mxu0  ;;  %3153 = vmatprep.subr.bf16.mxu0 %v6244_v26  ;;  %v6452_v25 = vcombine.high %v431_v17, %v435_v18  ;;  %v6580_v26 = vcombine.high %v559_v20, %v563_v21  ;;  %v527_v0 = vld [vmem:[#allocation2 + $0xcd0] sm:$0xff] }
 0x158   :  { %3194 = vmatprep.subr.bf16.mxu1 %v6372_v28  ;;  %v427_v28 = vld [vmem:[#allocation2 + $0x9b0] sm:$0xff] }
 0x159   :  { %v6444_v37 = vcombine.high %v423_v27, %v427_v28  ;;  %v419_v41 = vld [vmem:[#allocation2 + $0x970] sm:$0xff] }
 0x15a   :  { %3154 = vmatpush2.bf16.msra.mxu0 %v6243_v40  ;;  %v415_v40 = vld [vmem:[#allocation2 + $0x950] sm:$0xff] }
 0x15b   :  { %3195 = vmatpush2.bf16.msra.mxu1 %v6371_v42  ;;  %3155 = vmatprep.subr.bf16.mxu0 %v6236_v43  ;;  %v543_v42 = vld [vmem:[#allocation2 + $0xd50] sm:$0xff]  ;;  %v6436_v47 = vcombine.high %v415_v40, %v419_v41  ;;  %v6435_v55 = vcombine.low %v415_v40, %v419_v41  ;;  %v176_v40 = vld [vmem:[#allocation2 + $0x1d8] sm:$0xff] }
 0x15c   :  { %3196 = vmatprep.subr.bf16.mxu1 %v6364_v45  ;;  %v547_v43 = vld [vmem:[#allocation2 + $0xd70] sm:$0xff]  ;;  %v6443_v45 = vcombine.low %v423_v27, %v427_v28  ;;  %v180_v41 = vld [vmem:[#allocation2 + $0x1f8] sm:$0xff] }
 0x15d   :  { %v6564_v49 = vcombine.high %v543_v42, %v547_v43  ;;  %v6563_v56 = vcombine.low %v543_v42, %v547_v43  ;;  %v531_v1 = vld [vmem:[#allocation2 + $0xcf0] sm:$0xff] }
 0x15e   :  { %3156 = vmatpush2.bf16.msra.mxu0 %v6235_v50  ;;  %v407_v50 = vld [vmem:[#allocation2 + $0x910] sm:$0xff]  ;;  %v6547_v11 = vcombine.low %v527_v0, %v531_v1 }
 0x15f   :  { %3197 = vmatpush2.bf16.msra.mxu1 %v6363_v51  ;;  %3157 = vmatprep.subr.bf16.mxu0 %v6228_v52  ;;  %v411_v51 = vld [vmem:[#allocation2 + $0x930] sm:$0xff] }
 0x160   :  { %3198 = vmatprep.subr.bf16.mxu1 %v6356_v53  ;;  %v535_v52 = vld [vmem:[#allocation2 + $0xd10] sm:$0xff]  ;;  %v6428_v57 = vcombine.high %v407_v50, %v411_v51  ;;  %v6427_v2 = vcombine.low %v407_v50, %v411_v51  ;;  %v168_v50 = vld [vmem:[#allocation2 + $0x198] sm:$0xff] }
 0x161   :  { %v539_v53 = vld [vmem:[#allocation2 + $0xd30] sm:$0xff]  ;;  %v172_v51 = vld [vmem:[#allocation2 + $0x1b8] sm:$0xff] }
 0x162   :  { %3158 = vmatpush2.bf16.msra.mxu0 %v6227_v60  ;;  %v6555_v3 = vcombine.low %v535_v52, %v539_v53  ;;  %v519_v8 = vld [vmem:[#allocation2 + $0xc90] sm:$0xff] }
 0x163   :  { %3199 = vmatpush2.bf16.msra.mxu1 %v6355_v61  ;;  %3159 = vmatprep.subr.bf16.mxu0 %v6220_v62  ;;  %v6556_v61 = vcombine.high %v535_v52, %v539_v53  ;;  %v399_v62 = vld [vmem:[#allocation2 + $0x8d0] sm:$0xff]  ;;  %v6197_v53 = vcombine.low %v176_v40, %v180_v41 }
 0x164   :  { %3200 = vmatprep.subr.bf16.mxu1 %v6348_v63  ;;  %v403_v63 = vld [vmem:[#allocation2 + $0x8f0] sm:$0xff] }
 0x165   :  { %v523_v9 = vld [vmem:[#allocation2 + $0xcb0] sm:$0xff]  ;;  %v6419_v10 = vcombine.low %v399_v62, %v403_v63 }
 0x166   :  { %3160 = vmatpush2.bf16.msra.mxu0 %v6219_v4  ;;  %v6420_v4 = vcombine.high %v399_v62, %v403_v63  ;;  %v511_v17 = vld [vmem:[#allocation2 + $0xc50] sm:$0xff]  ;;  %v6539_v21 = vcombine.low %v519_v8, %v523_v9  ;;  %v164_v62 = vld [vmem:[#allocation2 + $0x178] sm:$0xff] }
 0x167   :  { %3201 = vmatpush2.bf16.msra.mxu1 %v6347_v5  ;;  %3161 = vmatprep.subr.bf16.mxu0 %v6212_v6  ;;  %v6548_v5 = vcombine.high %v527_v0, %v531_v1  ;;  %v391_v6 = vld [vmem:[#allocation2 + $0x890] sm:$0xff] }
 0x168   :  { %3202 = vmatprep.subr.bf16.mxu1 %v6340_v7  ;;  %v395_v7 = vld [vmem:[#allocation2 + $0x8b0] sm:$0xff] }
 0x169   :  { %v515_v18 = vld [vmem:[#allocation2 + $0xc70] sm:$0xff]  ;;  %v6411_v20 = vcombine.low %v391_v6, %v395_v7 }
 0x16a   :  { %3162 = vmatpush2.bf16.msra.mxu0 %v6211_v12  ;;  %v6412_v12 = vcombine.high %v391_v6, %v395_v7  ;;  %v503_v27 = vld [vmem:[#allocation2 + $0xc10] sm:$0xff]  ;;  %v6531_v32 = vcombine.low %v511_v17, %v515_v18 }
 0x16b   :  { %3203 = vmatpush2.bf16.msra.mxu1 %v6339_v13  ;;  %3163 = vmatprep.subr.bf16.mxu0 %v6204_v14  ;;  %v6540_v13 = vcombine.high %v519_v8, %v523_v9  ;;  %v383_v14 = vld [vmem:[#allocation2 + $0x850] sm:$0xff]  ;;  %v152_v9 = vld [vmem:[#allocation2 + $0x118] sm:$0xff] }
 0x16c   :  { %3204 = vmatprep.subr.bf16.mxu1 %v6332_v15  ;;  %v387_v15 = vld [vmem:[#allocation2 + $0x870] sm:$0xff] }
 0x16d   :  { %v507_v28 = vld [vmem:[#allocation2 + $0xc30] sm:$0xff]  ;;  %v6403_v31 = vcombine.low %v383_v14, %v387_v15 }
 0x16e   :  { %3164 = vmatpush2.bf16.msra.mxu0 %v6203_v22  ;;  %v6404_v22 = vcombine.high %v383_v14, %v387_v15  ;;  %v6523_v43 = vcombine.low %v503_v27, %v507_v28  ;;  %v471_v7 = vld [vmem:[#allocation2 + $0xb10] sm:$0xff] }
 0x16f   :  { %3205 = vmatpush2.bf16.msra.mxu1 %v6331_v24  ;;  %3215 = vmatprep.subr.bf16.mxu0 %v6452_v25  ;;  %v6532_v24 = vcombine.high %v511_v17, %v515_v18  ;;  %v375_v25 = vld [vmem:[#allocation2 + $0x810] sm:$0xff]  ;;  %v144_v18 = vld [vmem:[#allocation2 + $0xd8] sm:$0xff] }
 0x170   :  { %3256 = vmatprep.subr.bf16.mxu1 %v6580_v26  ;;  %v379_v26 = vld [vmem:[#allocation2 + $0x830] sm:$0xff] }
 0x171   :  { %3166 = vmatmul.mubr.bf16.vlgmr.msra.gmra.mxu0 %v7261_v16  ;;  %v7301_v44 = vpop.f32.mrf.mxu1  ;;  %v6395_v42 = vcombine.low %v375_v25, %v379_v26  ;;  %v475_v8 = vld [vmem:[#allocation2 + $0xb30] sm:$0xff] }
 0x172   :  { %3207 = vmatmul.mubr.bf16.vlgmr.msra.gmra.mxu1 %v7263_v19  ;;  %3216 = vmatpush1.bf16.msra.mxu0 %v6451_v34  ;;  %v6396_v34 = vcombine.high %v375_v25, %v379_v26  ;;  %v6492_v14 = vcombine.high %v471_v7, %v475_v8  ;;  %v463_v15 = vld [vmem:[#allocation2 + $0xad0] sm:$0xff]  ;;  %v136_v26 = vld [vmem:[#allocation2 + $0x98] sm:$0xff] }
 0x173   :  { %3257 = vmatpush1.bf16.msra.mxu1 %v6579_v35  ;;  %3217 = vmatprep.subr.bf16.mxu0 %v6444_v37  ;;  %v7304_v48 = vpop.f32.mrf.mxu1  ;;  %v6524_v35 = vcombine.high %v503_v27, %v507_v28  ;;  %v495_v37 = vld [vmem:[#allocation2 + $0xbd0] sm:$0xff]  ;;  %v140_v27 = vld [vmem:[#allocation2 + $0xb8] sm:$0xff] }
 0x174   :  { %3258 = vmatprep.subr.bf16.mxu1 %v6572_v39  ;;  %3288 = vmatprep.mubr.bf16.mxu1 %v7184_v38  ;;  %v499_v39 = vld [vmem:[#allocation2 + $0xbf0] sm:$0xff] }
 0x175   :  { %3247 = vmatprep.mubr.bf16.mxu0 %v7269_v29  ;;  %v2966_v54 = vpop.f32.mrf.mxu1  ;;  %v6515_v52 = vcombine.low %v495_v37, %v499_v39  ;;  %v467_v17 = vld [vmem:[#allocation2 + $0xaf0] sm:$0xff] }
 0x176   :  { %3218 = vmatpush1.bf16.msra.mxu0 %v6443_v45  ;;  %v6516_v45 = vcombine.high %v495_v37, %v499_v39  ;;  %v459_v25 = vld [vmem:[#allocation2 + $0xab0] sm:$0xff]  ;;  %v6483_v28 = vcombine.low %v463_v15, %v467_v17  ;;  %v128_v39 = vld [vmem:[#allocation2 + $0x58] sm:$0xff] }
 0x177   :  { %3259 = vmatpush1.bf16.msra.mxu1 %v6571_v46  ;;  %3219 = vmatprep.subr.bf16.mxu0 %v6436_v47  ;;  %v2967_v60 = vpop.f32.mrf.mxu1  ;;  %v6198_v46 = vcombine.high %v176_v40, %v180_v41  ;;  %v487_v47 = vld [vmem:[#allocation2 + $0xb90] sm:$0xff]  ;;  %v132_v40 = vld [vmem:[#allocation2 + $0x78] sm:$0xff] }
 0x178   :  { %3260 = vmatprep.subr.bf16.mxu1 %v6564_v49  ;;  %v491_v49 = vld [vmem:[#allocation2 + $0xbb0] sm:$0xff] }
 0x179   :  { %v6508_v54 = vcombine.high %v487_v47, %v491_v49  ;;  %v6507_v0 = vcombine.low %v487_v47, %v491_v49  ;;  %v451_v37 = vld [vmem:[#allocation2 + $0xa70] sm:$0xff]  ;;  %v120_v49 = vld [vmem:[#allocation2 + $0x18] sm:$0xff] }
 0x17a   :  { %3220 = vmatpush1.bf16.msra.mxu0 %v6435_v55  ;;  %v6190_v55 = vcombine.high %v168_v50, %v172_v51  ;;  %v443_v47 = vld [vmem:[#allocation2 + $0xa30] sm:$0xff] }
 0x17b   :  { %3261 = vmatpush1.bf16.msra.mxu1 %v6563_v56  ;;  %3221 = vmatprep.subr.bf16.mxu0 %v6428_v57  ;;  %v479_v56 = vld [vmem:[#allocation2 + $0xb50] sm:$0xff] }
 0x17c   :  { %3262 = vmatprep.subr.bf16.mxu1 %v6556_v61  ;;  %v483_v57 = vld [vmem:[#allocation2 + $0xb70] sm:$0xff]  ;;  %v160_v61 = vld [vmem:[#allocation2 + $0x158] sm:$0xff] }
 0x17d   :  { %v6182_v6 = vcombine.high %v160_v61, %v164_v62 }
 0x17e   :  { %3222 = vmatpush1.bf16.msra.mxu0 %v6427_v2  ;;  %v6189_v2 = vcombine.low %v168_v50, %v172_v51  ;;  %v124_v50 = vld [vmem:[#allocation2 + $0x38] sm:$0xff] }
 0x17f   :  { %3263 = vmatpush1.bf16.msra.mxu1 %v6555_v3  ;;  %3223 = vmatprep.subr.bf16.mxu0 %v6420_v4  ;;  %v6500_v3 = vcombine.high %v479_v56, %v483_v57 }
 0x180   :  { %3264 = vmatprep.subr.bf16.mxu1 %v6548_v5 }
 0x182   :  { %3224 = vmatpush1.bf16.msra.mxu0 %v6419_v10  ;;  %v156_v10 = vld [vmem:[#allocation2 + $0x138] sm:$0xff] }
 0x183   :  { %3265 = vmatpush1.bf16.msra.mxu1 %v6547_v11  ;;  %3225 = vmatprep.subr.bf16.mxu0 %v6412_v12  ;;  %v6499_v12 = vcombine.low %v479_v56, %v483_v57  ;;  %v308_v56 = vld [vmem:[#allocation2 + $0x5f8] sm:$0xff] }
 0x184   :  { %3266 = vmatprep.subr.bf16.mxu1 %v6540_v13  ;;  %v240_v57 = vld [vmem:[#allocation2 + $0x3d8] sm:$0xff] }
 0x186   :  { %3226 = vmatpush1.bf16.msra.mxu0 %v6411_v20  ;;  %v148_v20 = vld [vmem:[#allocation2 + $0xf8] sm:$0xff] }
 0x187   :  { %3267 = vmatpush1.bf16.msra.mxu1 %v6539_v21  ;;  %3227 = vmatprep.subr.bf16.mxu0 %v6404_v22  ;;  %v6173_v21 = vcombine.low %v152_v9, %v156_v10  ;;  %v6166_v22 = vcombine.high %v144_v18, %v148_v20 }
 0x188   :  { %3268 = vmatprep.subr.bf16.mxu1 %v6532_v24  ;;  %v455_v24 = vld [vmem:[#allocation2 + $0xa90] sm:$0xff] }
 0x189   :  { %v6475_v41 = vcombine.low %v455_v24, %v459_v25 }
 0x18a   :  { %3228 = vmatpush1.bf16.msra.mxu0 %v6403_v31  ;;  %v6165_v31 = vcombine.low %v144_v18, %v148_v20  ;;  %v280_v20 = vld [vmem:[#allocation2 + $0x518] sm:$0xff] }
 0x18b   :  { %3269 = vmatpush1.bf16.msra.mxu1 %v6531_v32  ;;  %3229 = vmatprep.subr.bf16.mxu0 %v6396_v34  ;;  %v6476_v32 = vcombine.high %v455_v24, %v459_v25  ;;  %v6158_v34 = vcombine.high %v136_v26, %v140_v27 }
 0x18c   :  { %3270 = vmatprep.subr.bf16.mxu1 %v6524_v35  ;;  %v447_v35 = vld [vmem:[#allocation2 + $0xa50] sm:$0xff] }
 0x18d   :  { %v6467_v51 = vcombine.low %v447_v35, %v451_v37 }
 0x18e   :  { %3230 = vmatpush1.bf16.msra.mxu0 %v6395_v42  ;;  %v6157_v42 = vcombine.low %v136_v26, %v140_v27 }
 0x18f   :  { %3271 = vmatpush1.bf16.msra.mxu1 %v6523_v43  ;;  %3231 = vmatprep.subr.bf16.mxu0 %v6516_v45  ;;  %v6468_v43 = vcombine.high %v447_v35, %v451_v37  ;;  %v6150_v45 = vcombine.high %v128_v39, %v132_v40 }
 0x190   :  { %3297 = vmatprep.subr.bf16.mxu1 %v6198_v46  ;;  %v439_v46 = vld [vmem:[#allocation2 + $0xa10] sm:$0xff] }
 0x191   :  { %v2921_v60 = vpop.f32.mrf.mxu0 }
 0x192   :  { %v2922_v63 = vadd.f32 %v2921_v60, %v7296_v23  ;;  %3289 = vmatmul.mubr.bf16.vlgmr.msra.gmra.mxu1 %v7277_v30  ;;  %3232 = vmatpush2.bf16.msra.mxu0 %v6515_v52  ;;  %v6149_v52 = vcombine.low %v128_v39, %v132_v40  ;;  %v244_v60 = vld [vmem:[#allocation2 + $0x3f8] sm:$0xff] }
 0x193   :  { %3298 = vmatpush1.bf16.msra.mxu1 %v6197_v53  ;;  %v2923_v1 = vpop.f32.mrf.mxu0  ;;  %3233 = vmatprep.subr.bf16.mxu0 %v6508_v54  ;;  %v6460_v53 = vcombine.high %v439_v46, %v443_v47  ;;  %v6142_v54 = vcombine.high %v120_v49, %v124_v50 }
 0x194   :  { %v7311_v4 = vadd.f32 %v7301_v44, %v2922_v63  ;;  %v2924_v5 = vadd.f32 %v2923_v1, %v7298_v33  ;;  %3299 = vmatprep.subr.bf16.mxu1 %v6190_v55  ;;  %3329 = vmatprep.mubr.bf16.mxu1 %v7249_v58  ;;  %v6181_v44 = vcombine.low %v160_v61, %v164_v62  ;;  %v304_v55 = vld [vmem:[#allocation2 + $0x5d8] sm:$0xff] }
 0x195   :  { %v2925_v23 = vpop.f32.mrf.mxu0  ;;  %v6174_v33 = vcombine.high %v152_v9, %v156_v10  ;;  %v6491_v58 = vcombine.low %v471_v7, %v475_v8  ;;  %v6459_v61 = vcombine.low %v439_v46, %v443_v47  ;;  %v6141_v62 = vcombine.low %v120_v49, %v124_v50  ;;  %v296_v1 = vld [vmem:[#allocation2 + $0x598] sm:$0xff] }
 0x196   :  { %v7316_v11 = vadd.f32 %v7304_v48, %v2924_v5  ;;  %3234 = vmatpush2.bf16.msra.mxu0 %v6507_v0  ;;  %v6484_v48 = vcombine.high %v463_v15, %v467_v17  ;;  %v6326_v63 = vcombine.high %v304_v55, %v308_v56  ;;  %v6262_v0 = vcombine.high %v240_v57, %v244_v60  ;;  %v236_v5 = vld [vmem:[#allocation2 + $0x3b8] sm:$0xff] }
 0x197   :  { %3300 = vmatpush1.bf16.msra.mxu1 %v6189_v2  ;;  %v2926_v13 = vpop.f32.mrf.mxu0  ;;  %3235 = vmatprep.subr.bf16.mxu0 %v6500_v3  ;;  %v300_v2 = vld [vmem:[#allocation2 + $0x5b8] sm:$0xff]  ;;  %v6261_v7 = vcombine.low %v240_v57, %v244_v60 }
 0x198   :  { %3301 = vmatprep.subr.bf16.mxu1 %v6182_v6  ;;  %v232_v3 = vld [vmem:[#allocation2 + $0x398] sm:$0xff]  ;;  %v6325_v6 = vcombine.low %v304_v55, %v308_v56  ;;  %v6318_v8 = vcombine.high %v296_v1, %v300_v2 }
 0x199   :  { %v6254_v23 = vcombine.high %v232_v3, %v236_v5  ;;  %v288_v9 = vld [vmem:[#allocation2 + $0x558] sm:$0xff] }
 0x19a   :  { %3236 = vmatpush2.bf16.msra.mxu0 %v6499_v12  ;;  %v292_v10 = vld [vmem:[#allocation2 + $0x578] sm:$0xff] }
 0x19b   :  { %3302 = vmatpush1.bf16.msra.mxu1 %v6181_v44  ;;  %3237 = vmatprep.subr.bf16.mxu0 %v6492_v14  ;;  %v224_v12 = vld [vmem:[#allocation2 + $0x358] sm:$0xff]  ;;  %v6317_v14 = vcombine.low %v296_v1, %v300_v2  ;;  %v6310_v15 = vcombine.high %v288_v9, %v292_v10  ;;  %v6309_v24 = vcombine.low %v288_v9, %v292_v10 }
 0x19c   :  { %3303 = vmatprep.subr.bf16.mxu1 %v6174_v33  ;;  %v228_v13 = vld [vmem:[#allocation2 + $0x378] sm:$0xff]  ;;  %v6253_v33 = vcombine.low %v232_v3, %v236_v5 }
 0x19d   :  { %v6246_v18 = vcombine.high %v224_v12, %v228_v13  ;;  %v6245_v25 = vcombine.low %v224_v12, %v228_v13 }
 0x19e   :  { %3238 = vmatpush2.bf16.msra.mxu0 %v6491_v58  ;;  %v284_v58 = vld [vmem:[#allocation2 + $0x538] sm:$0xff] }
 0x19f   :  { %3304 = vmatpush1.bf16.msra.mxu1 %v6173_v21  ;;  %3239 = vmatprep.subr.bf16.mxu0 %v6484_v48  ;;  %v216_v21 = vld [vmem:[#allocation2 + $0x318] sm:$0xff]  ;;  %v6302_v26 = vcombine.high %v280_v20, %v284_v58  ;;  %v6301_v35 = vcombine.low %v280_v20, %v284_v58 }
 0x1a0   :  { %3305 = vmatprep.subr.bf16.mxu1 %v6166_v22  ;;  %v220_v48 = vld [vmem:[#allocation2 + $0x338] sm:$0xff] }
 0x1a1   :  { %v6238_v27 = vcombine.high %v216_v21, %v220_v48  ;;  %v6237_v37 = vcombine.low %v216_v21, %v220_v48 }
 0x1a2   :  { %3240 = vmatpush2.bf16.msra.mxu0 %v6483_v28  ;;  %v272_v28 = vld [vmem:[#allocation2 + $0x4d8] sm:$0xff] }
 0x1a3   :  { %3306 = vmatpush1.bf16.msra.mxu1 %v6165_v31  ;;  %3241 = vmatprep.subr.bf16.mxu0 %v6476_v32  ;;  %v276_v31 = vld [vmem:[#allocation2 + $0x4f8] sm:$0xff] }
 0x1a4   :  { %3307 = vmatprep.subr.bf16.mxu1 %v6158_v34  ;;  %v208_v32 = vld [vmem:[#allocation2 + $0x2d8] sm:$0xff]  ;;  %v6294_v39 = vcombine.high %v272_v28, %v276_v31  ;;  %v6293_v46 = vcombine.low %v272_v28, %v276_v31 }
 0x1a5   :  { %v212_v34 = vld [vmem:[#allocation2 + $0x2f8] sm:$0xff] }
 0x1a6   :  { %3242 = vmatpush2.bf16.msra.mxu0 %v6475_v41  ;;  %v6230_v40 = vcombine.high %v208_v32, %v212_v34  ;;  %v264_v41 = vld [vmem:[#allocation2 + $0x498] sm:$0xff]  ;;  %v6229_v47 = vcombine.low %v208_v32, %v212_v34 }
 0x1a7   :  { %3308 = vmatpush1.bf16.msra.mxu1 %v6157_v42  ;;  %3243 = vmatprep.subr.bf16.mxu0 %v6468_v43  ;;  %v268_v42 = vld [vmem:[#allocation2 + $0x4b8] sm:$0xff] }
 0x1a8   :  { %3309 = vmatprep.subr.bf16.mxu1 %v6150_v45  ;;  %v200_v43 = vld [vmem:[#allocation2 + $0x298] sm:$0xff]  ;;  %v6286_v49 = vcombine.high %v264_v41, %v268_v42  ;;  %v6285_v55 = vcombine.low %v264_v41, %v268_v42 }
 0x1a9   :  { %v204_v45 = vld [vmem:[#allocation2 + $0x2b8] sm:$0xff] }
 0x1aa   :  { %3244 = vmatpush2.bf16.msra.mxu0 %v6467_v51  ;;  %v6222_v50 = vcombine.high %v200_v43, %v204_v45  ;;  %v256_v51 = vld [vmem:[#allocation2 + $0x458] sm:$0xff]  ;;  %v6221_v56 = vcombine.low %v200_v43, %v204_v45 }
 0x1ab   :  { %3310 = vmatpush1.bf16.msra.mxu1 %v6149_v52  ;;  %3245 = vmatprep.subr.bf16.mxu0 %v6460_v53  ;;  %v260_v52 = vld [vmem:[#allocation2 + $0x478] sm:$0xff] }
 0x1ac   :  { %3311 = vmatprep.subr.bf16.mxu1 %v6142_v54  ;;  %v192_v53 = vld [vmem:[#allocation2 + $0x258] sm:$0xff]  ;;  %v6278_v57 = vcombine.high %v256_v51, %v260_v52  ;;  %v6277_v1 = vcombine.low %v256_v51, %v260_v52 }
 0x1ad   :  { %v196_v54 = vld [vmem:[#allocation2 + $0x278] sm:$0xff] }
 0x1ae   :  { %3246 = vmatpush2.bf16.msra.mxu0 %v6459_v61  ;;  %v6214_v60 = vcombine.high %v192_v53, %v196_v54  ;;  %v248_v61 = vld [vmem:[#allocation2 + $0x418] sm:$0xff]  ;;  %v6213_v2 = vcombine.low %v192_v53, %v196_v54 }
 0x1af   :  { %3312 = vmatpush1.bf16.msra.mxu1 %v6141_v62  ;;  %3338 = vmatprep.subr.bf16.mxu0 %v6326_v63  ;;  %v252_v62 = vld [vmem:[#allocation2 + $0x438] sm:$0xff] }
 0x1b0   :  { %3313 = vmatprep.subr.bf16.mxu1 %v6262_v0  ;;  %v184_v63 = vld [vmem:[#allocation2 + $0x218] sm:$0xff]  ;;  %v6270_v3 = vcombine.high %v248_v61, %v252_v62  ;;  %v6269_v9 = vcombine.low %v248_v61, %v252_v62 }
 0x1b1   :  { %3248 = vmatmul.mubr.bf16.vlgmr.msra.gmra.mxu0 %v7284_v36  ;;  %v188_v0 = vld [vmem:[#allocation2 + $0x238] sm:$0xff] }
 0x1b2   :  { %v7319_v44 = vpop.f32.mrf.mxu1  ;;  %3339 = vmatpush1.bf16.msra.mxu0 %v6325_v6  ;;  %3370 = vmatprep.mubr.bf16.mxu0 %v7251_v59  ;;  %v6206_v5 = vcombine.high %v184_v63, %v188_v0  ;;  %v368_v6 = vld [vmem:[#allocation2 + $0x7d8] sm:$0xff]  ;;  %v6205_v10 = vcombine.low %v184_v63, %v188_v0 }
 0x1b3   :  { %3314 = vmatpush2.bf16.msra.mxu1 %v6261_v7  ;;  %3340 = vmatprep.subr.bf16.mxu0 %v6318_v8  ;;  %v372_v7 = vld [vmem:[#allocation2 + $0x7f8] sm:$0xff] }
 0x1b4   :  { %v7322_v17 = vpop.f32.mrf.mxu1  ;;  %3315 = vmatprep.subr.bf16.mxu1 %v6254_v23  ;;  %v432_v8 = vld [vmem:[#allocation2 + $0x9d8] sm:$0xff]  ;;  %v6390_v12 = vcombine.high %v368_v6, %v372_v7  ;;  %v6389_v20 = vcombine.low %v368_v6, %v372_v7 }
 0x1b5   :  { %v436_v23 = vld [vmem:[#allocation2 + $0x9f8] sm:$0xff] }
 0x1b6   :  { %v3007_v22 = vpop.f32.mrf.mxu1  ;;  %3341 = vmatpush1.bf16.msra.mxu0 %v6317_v14  ;;  %v6454_v13 = vcombine.high %v432_v8, %v436_v23  ;;  %v360_v14 = vld [vmem:[#allocation2 + $0x798] sm:$0xff]  ;;  %v6453_v58 = vcombine.low %v432_v8, %v436_v23 }
 0x1b7   :  { %3316 = vmatpush2.bf16.msra.mxu1 %v6253_v33  ;;  %3342 = vmatprep.subr.bf16.mxu0 %v6310_v15  ;;  %v364_v33 = vld [vmem:[#allocation2 + $0x7b8] sm:$0xff] }
 0x1b8   :  { %v3008_v59 = vpop.f32.mrf.mxu1  ;;  %3317 = vmatprep.subr.bf16.mxu1 %v6246_v18  ;;  %v424_v15 = vld [vmem:[#allocation2 + $0x998] sm:$0xff]  ;;  %v6382_v21 = vcombine.high %v360_v14, %v364_v33  ;;  %v6381_v28 = vcombine.low %v360_v14, %v364_v33 }
 0x1b9   :  { %v428_v18 = vld [vmem:[#allocation2 + $0x9b8] sm:$0xff] }
 0x1ba   :  { %3343 = vmatpush1.bf16.msra.mxu0 %v6309_v24  ;;  %v6446_v48 = vcombine.high %v424_v15, %v428_v18  ;;  %v352_v22 = vld [vmem:[#allocation2 + $0x758] sm:$0xff]  ;;  %v6445_v32 = vcombine.low %v424_v15, %v428_v18 }
 0x1bb   :  { %3318 = vmatpush2.bf16.msra.mxu1 %v6245_v25  ;;  %3344 = vmatprep.subr.bf16.mxu0 %v6302_v26  ;;  %v356_v24 = vld [vmem:[#allocation2 + $0x778] sm:$0xff] }
 0x1bc   :  { %3319 = vmatprep.subr.bf16.mxu1 %v6238_v27  ;;  %v416_v26 = vld [vmem:[#allocation2 + $0x958] sm:$0xff]  ;;  %v6374_v34 = vcombine.high %v352_v22, %v356_v24 }
 0x1bd   :  { %v420_v59 = vld [vmem:[#allocation2 + $0x978] sm:$0xff] }
 0x1be   :  { %3345 = vmatpush1.bf16.msra.mxu0 %v6301_v35  ;;  %v408_v41 = vld [vmem:[#allocation2 + $0x918] sm:$0xff]  ;;  %v6437_v45 = vcombine.low %v416_v26, %v420_v59 }
 0x1bf   :  { %3320 = vmatpush2.bf16.msra.mxu1 %v6237_v37  ;;  %3346 = vmatprep.subr.bf16.mxu0 %v6294_v39  ;;  %v6438_v37 = vcombine.high %v416_v26, %v420_v59  ;;  %v344_v39 = vld [vmem:[#allocation2 + $0x718] sm:$0xff] }
 0x1c0   :  { %3321 = vmatprep.subr.bf16.mxu1 %v6230_v40  ;;  %v348_v40 = vld [vmem:[#allocation2 + $0x738] sm:$0xff] }
 0x1c1   :  { %v412_v42 = vld [vmem:[#allocation2 + $0x938] sm:$0xff]  ;;  %v6365_v52 = vcombine.low %v344_v39, %v348_v40 }
 0x1c2   :  { %3347 = vmatpush1.bf16.msra.mxu0 %v6293_v46  ;;  %v6366_v46 = vcombine.high %v344_v39, %v348_v40  ;;  %v404_v51 = vld [vmem:[#allocation2 + $0x8f8] sm:$0xff] }
 0x1c3   :  { %3322 = vmatpush2.bf16.msra.mxu1 %v6229_v47  ;;  %3348 = vmatprep.subr.bf16.mxu0 %v6286_v49  ;;  %v6430_v47 = vcombine.high %v408_v41, %v412_v42  ;;  %v340_v49 = vld [vmem:[#allocation2 + $0x6f8] sm:$0xff] }
 0x1c4   :  { %3323 = vmatprep.subr.bf16.mxu1 %v6222_v50  ;;  %v400_v50 = vld [vmem:[#allocation2 + $0x8d8] sm:$0xff] }
 0x1c5   :  { %v6422_v54 = vcombine.high %v400_v50, %v404_v51  ;;  %v6421_v62 = vcombine.low %v400_v50, %v404_v51  ;;  %v552_v59 = vld [vmem:[#allocation2 + $0xd98] sm:$0xff] }
 0x1c6   :  { %3349 = vmatpush1.bf16.msra.mxu0 %v6285_v55  ;;  %v328_v55 = vld [vmem:[#allocation2 + $0x698] sm:$0xff] }
 0x1c7   :  { %3324 = vmatpush2.bf16.msra.mxu1 %v6221_v56  ;;  %3350 = vmatprep.subr.bf16.mxu0 %v6278_v57  ;;  %v332_v56 = vld [vmem:[#allocation2 + $0x6b8] sm:$0xff] }
 0x1c8   :  { %3325 = vmatprep.subr.bf16.mxu1 %v6214_v60  ;;  %v392_v57 = vld [vmem:[#allocation2 + $0x898] sm:$0xff]  ;;  %v6350_v63 = vcombine.high %v328_v55, %v332_v56  ;;  %v6349_v6 = vcombine.low %v328_v55, %v332_v56 }
 0x1c9   :  { %v396_v60 = vld [vmem:[#allocation2 + $0x8b8] sm:$0xff] }
 0x1ca   :  { %3351 = vmatpush1.bf16.msra.mxu0 %v6277_v1  ;;  %v6414_v0 = vcombine.high %v392_v57, %v396_v60  ;;  %v320_v1 = vld [vmem:[#allocation2 + $0x658] sm:$0xff]  ;;  %v6413_v7 = vcombine.low %v392_v57, %v396_v60 }
 0x1cb   :  { %3326 = vmatpush2.bf16.msra.mxu1 %v6213_v2  ;;  %3352 = vmatprep.subr.bf16.mxu0 %v6270_v3  ;;  %v324_v2 = vld [vmem:[#allocation2 + $0x678] sm:$0xff] }
 0x1cc   :  { %3327 = vmatprep.subr.bf16.mxu1 %v6206_v5  ;;  %v384_v3 = vld [vmem:[#allocation2 + $0x858] sm:$0xff]  ;;  %v6342_v8 = vcombine.high %v320_v1, %v324_v2  ;;  %v6341_v14 = vcombine.low %v320_v1, %v324_v2 }
 0x1cd   :  { %v388_v5 = vld [vmem:[#allocation2 + $0x878] sm:$0xff] }
 0x1ce   :  { %3353 = vmatpush1.bf16.msra.mxu0 %v6269_v9  ;;  %v6406_v23 = vcombine.high %v384_v3, %v388_v5  ;;  %v312_v9 = vld [vmem:[#allocation2 + $0x618] sm:$0xff]  ;;  %v6405_v33 = vcombine.low %v384_v3, %v388_v5 }
 0x1cf   :  { %3328 = vmatpush2.bf16.msra.mxu1 %v6205_v10  ;;  %3354 = vmatprep.subr.bf16.mxu0 %v6390_v12  ;;  %v316_v10 = vld [vmem:[#allocation2 + $0x638] sm:$0xff] }
 0x1d0   :  { %3379 = vmatprep.subr.bf16.mxu1 %v6454_v13  ;;  %v376_v12 = vld [vmem:[#allocation2 + $0x818] sm:$0xff]  ;;  %v6334_v15 = vcombine.high %v312_v9, %v316_v10 }
 0x1d1   :  { %v3044_v25 = vpop.f32.mrf.mxu0  ;;  %v380_v13 = vld [vmem:[#allocation2 + $0x838] sm:$0xff] }
 0x1d2   :  { %v7325_v27 = vadd.f32 %v3044_v25, %v7319_v44  ;;  %3330 = vmatmul.mubr.bf16.vlgmr.msra.gmra.mxu1 %v7261_v16  ;;  %3355 = vmatpush2.bf16.msra.mxu0 %v6389_v20  ;;  %v6373_v16 = vcombine.low %v352_v22, %v356_v24  ;;  %v6398_v18 = vcombine.high %v376_v12, %v380_v13  ;;  %v560_v20 = vld [vmem:[#allocation2 + $0xdd8] sm:$0xff] }
 0x1d3   :  { %3380 = vmatpush1.bf16.msra.mxu1 %v6453_v58  ;;  %v3046_v31 = vpop.f32.mrf.mxu0  ;;  %3356 = vmatprep.subr.bf16.mxu0 %v6382_v21  ;;  %v564_v58 = vld [vmem:[#allocation2 + $0xdf8] sm:$0xff]  ;;  %v6333_v22 = vcombine.low %v312_v9, %v316_v10  ;;  %v6397_v24 = vcombine.low %v376_v12, %v380_v13 }
 0x1d4   :  { %v7329_v35 = vadd.f32 %v3046_v31, %v7322_v17  ;;  %3381 = vmatprep.subr.bf16.mxu1 %v6446_v48  ;;  %3411 = vmatprep.mubr.bf16.mxu1 %v7269_v29  ;;  %v336_v17 = vld [vmem:[#allocation2 + $0x6d8] sm:$0xff]  ;;  %v6429_v29 = vcombine.low %v408_v41, %v412_v42  ;;  %v6582_v25 = vcombine.high %v560_v20, %v564_v58 }
 0x1d5   :  { %v3048_v44 = vpop.f32.mrf.mxu0  ;;  %v6358_v53 = vcombine.high %v336_v17, %v340_v49  ;;  %v6357_v61 = vcombine.low %v336_v17, %v340_v49  ;;  %v496_v21 = vld [vmem:[#allocation2 + $0xbd8] sm:$0xff] }
 0x1d6   :  { %3357 = vmatpush2.bf16.msra.mxu0 %v6381_v28  ;;  %v500_v48 = vld [vmem:[#allocation2 + $0xbf8] sm:$0xff] }
 0x1d7   :  { %3382 = vmatpush1.bf16.msra.mxu1 %v6445_v32  ;;  %v3049_v43 = vpop.f32.mrf.mxu0  ;;  %3358 = vmatprep.subr.bf16.mxu0 %v6374_v34  ;;  %v6518_v26 = vcombine.high %v496_v21, %v500_v48  ;;  %v556_v28 = vld [vmem:[#allocation2 + $0xdb8] sm:$0xff]  ;;  %v6581_v34 = vcombine.low %v560_v20, %v564_v58 }
 0x1d8   :  { %3383 = vmatprep.subr.bf16.mxu1 %v6438_v37  ;;  %v488_v31 = vld [vmem:[#allocation2 + $0xb98] sm:$0xff]  ;;  %v6517_v37 = vcombine.low %v496_v21, %v500_v48  ;;  %v6574_v39 = vcombine.high %v552_v59, %v556_v28 }
 0x1d9   :  { %v492_v32 = vld [vmem:[#allocation2 + $0xbb8] sm:$0xff] }
 0x1da   :  { %3359 = vmatpush2.bf16.msra.mxu0 %v6373_v16  ;;  %v6510_v40 = vcombine.high %v488_v31, %v492_v32  ;;  %v544_v44 = vld [vmem:[#allocation2 + $0xd58] sm:$0xff]  ;;  %v6509_v49 = vcombine.low %v488_v31, %v492_v32 }
 0x1db   :  { %3384 = vmatpush1.bf16.msra.mxu1 %v6437_v45  ;;  %3360 = vmatprep.subr.bf16.mxu0 %v6366_v46  ;;  %v548_v41 = vld [vmem:[#allocation2 + $0xd78] sm:$0xff]  ;;  %v6573_v46 = vcombine.low %v552_v59, %v556_v28 }
 0x1dc   :  { %3385 = vmatprep.subr.bf16.mxu1 %v6430_v47  ;;  %v480_v16 = vld [vmem:[#allocation2 + $0xb58] sm:$0xff]  ;;  %v6566_v50 = vcombine.high %v544_v44, %v548_v41 }
 0x1dd   :  { %v484_v43 = vld [vmem:[#allocation2 + $0xb78] sm:$0xff] }
 0x1de   :  { %3361 = vmatpush2.bf16.msra.mxu0 %v6365_v52  ;;  %v6502_v52 = vcombine.high %v480_v16, %v484_v43  ;;  %v472_v56 = vld [vmem:[#allocation2 + $0xb18] sm:$0xff] }
 0x1df   :  { %3386 = vmatpush1.bf16.msra.mxu1 %v6429_v29  ;;  %3362 = vmatprep.subr.bf16.mxu0 %v6358_v53  ;;  %v536_v29 = vld [vmem:[#allocation2 + $0xd18] sm:$0xff] }
 0x1e0   :  { %3387 = vmatprep.subr.bf16.mxu1 %v6422_v54  ;;  %v540_v53 = vld [vmem:[#allocation2 + $0xd38] sm:$0xff] }
 0x1e1   :  { %v476_v57 = vld [vmem:[#allocation2 + $0xb38] sm:$0xff] }
 0x1e2   :  { %3363 = vmatpush2.bf16.msra.mxu0 %v6357_v61  ;;  %v6494_v1 = vcombine.high %v472_v56, %v476_v57  ;;  %v528_v2 = vld [vmem:[#allocation2 + $0xcd8] sm:$0xff] }
 0x1e3   :  { %3388 = vmatpush1.bf16.msra.mxu1 %v6421_v62  ;;  %3364 = vmatprep.subr.bf16.mxu0 %v6350_v63  ;;  %v6501_v62 = vcombine.low %v480_v16, %v484_v43  ;;  %v6558_v63 = vcombine.high %v536_v29, %v540_v53  ;;  %v532_v3 = vld [vmem:[#allocation2 + $0xcf8] sm:$0xff] }
 0x1e4   :  { %3389 = vmatprep.subr.bf16.mxu1 %v6414_v0  ;;  %v464_v5 = vld [vmem:[#allocation2 + $0xad8] sm:$0xff] }
 0x1e5   :  { %v520_v9 = vld [vmem:[#allocation2 + $0xc98] sm:$0xff] }
 0x1e6   :  { %3365 = vmatpush2.bf16.msra.mxu0 %v6349_v6  ;;  %v6557_v6 = vcombine.low %v536_v29, %v540_v53  ;;  %v524_v10 = vld [vmem:[#allocation2 + $0xcb8] sm:$0xff]  ;;  %v3647_v29 = vld [vmem:[#allocation6 + $0x100] sm:$0xff] }
 0x1e7   :  { %3390 = vmatpush1.bf16.msra.mxu1 %v6413_v7  ;;  %3366 = vmatprep.subr.bf16.mxu0 %v6342_v8  ;;  %v6493_v7 = vcombine.low %v472_v56, %v476_v57  ;;  %v6550_v8 = vcombine.high %v528_v2, %v532_v3  ;;  %v456_v12 = vld [vmem:[#allocation2 + $0xa98] sm:$0xff]  ;;  %v3651_v53 = vld [vmem:[#allocation6 + $0x120] sm:$0xff] }
 0x1e8   :  { %3391 = vmatprep.subr.bf16.mxu1 %v6406_v23  ;;  %v460_v13 = vld [vmem:[#allocation2 + $0xab8] sm:$0xff]  ;;  %v3639_v56 = vld [vmem:[#allocation6 + $0xc0] sm:$0xff] }
 0x1e9   :  { %v512_v20 = vld [vmem:[#allocation2 + $0xc58] sm:$0xff]  ;;  %v3643_v57 = vld [vmem:[#allocation6 + $0xe0] sm:$0xff] }
 0x1ea   :  { %3367 = vmatpush2.bf16.msra.mxu0 %v6341_v14  ;;  %v6549_v14 = vcombine.low %v528_v2, %v532_v3  ;;  %v516_v58 = vld [vmem:[#allocation2 + $0xc78] sm:$0xff]  ;;  %v3615_v3 = vld [vmem:[#allocation6] sm:$0xff] }
 0x1eb   :  { %3392 = vmatpush1.bf16.msra.mxu1 %v6405_v33  ;;  %3368 = vmatprep.subr.bf16.mxu0 %v6334_v15  ;;  %v6542_v15 = vcombine.high %v520_v9, %v524_v10  ;;  %v448_v21 = vld [vmem:[#allocation2 + $0xa58] sm:$0xff] }
 0x1ec   :  { %3393 = vmatprep.subr.bf16.mxu1 %v6398_v18  ;;  %v6478_v18 = vcombine.high %v456_v12, %v460_v13  ;;  %v452_v48 = vld [vmem:[#allocation2 + $0xa78] sm:$0xff] }
 0x1ed   :  { %v504_v59 = vld [vmem:[#allocation2 + $0xc18] sm:$0xff] }
 0x1ee   :  { %3369 = vmatpush2.bf16.msra.mxu0 %v6333_v22  ;;  %v6541_v22 = vcombine.low %v520_v9, %v524_v10  ;;  %v508_v28 = vld [vmem:[#allocation2 + $0xc38] sm:$0xff]  ;;  %v7344_v9 = vld [vmem:[#allocation6 + $0x1e8] sm:$0xff] }
 0x1ef   :  { %3394 = vmatpush1.bf16.msra.mxu1 %v6397_v24  ;;  %3420 = vmatprep.subr.bf16.mxu0 %v6582_v25  ;;  %v6477_v24 = vcombine.low %v456_v12, %v460_v13  ;;  %v6534_v25 = vcombine.high %v512_v20, %v516_v58  ;;  %v440_v31 = vld [vmem:[#allocation2 + $0xa18] sm:$0xff] }
 0x1f0   :  { %3395 = vmatprep.subr.bf16.mxu1 %v6518_v26  ;;  %v6470_v26 = vcombine.high %v448_v21, %v452_v48  ;;  %v444_v32 = vld [vmem:[#allocation2 + $0xa38] sm:$0xff] }
 0x1f1   :  { %v3126_v42 = vpop.f32.mrf.mxu0  ;;  %3371 = vmatmul.mubr.bf16.vlgmr.msra.gmra.mxu0 %v7263_v19  ;;  %v6461_v16 = vcombine.low %v440_v31, %v444_v32 }
 0x1f2   :  { %v3085_v45 = vpop.f32.mrf.mxu1  ;;  %3421 = vmatpush1.bf16.msra.mxu0 %v6581_v34  ;;  %3452 = vmatprep.mubr.bf16.mxu0 %v7184_v38  ;;  %v6533_v34 = vcombine.low %v512_v20, %v516_v58  ;;  %v3719_v20 = vld [vmem:[#allocation6 + $0x340] sm:$0xff] }
 0x1f3   :  { %v3086_v47 = vadd.f32 %v3085_v45, %v7325_v27  ;;  %3396 = vmatpush2.bf16.msra.mxu1 %v6517_v37  ;;  %v3128_v17 = vpop.f32.mrf.mxu0  ;;  %3422 = vmatprep.subr.bf16.mxu0 %v6574_v39  ;;  %v6565_v27 = vcombine.low %v544_v44, %v548_v41  ;;  %v6469_v37 = vcombine.low %v448_v21, %v452_v48  ;;  %v3671_v44 = vld [vmem:[#allocation6 + $0x1c0] sm:$0xff] }
 0x1f4   :  { %v3087_v51 = vpop.f32.mrf.mxu1  ;;  %3397 = vmatprep.subr.bf16.mxu1 %v6510_v40  ;;  %v6526_v39 = vcombine.high %v504_v59, %v508_v28  ;;  %v6462_v40 = vcombine.high %v440_v31, %v444_v32  ;;  %v3675_v41 = vld [vmem:[#allocation6 + $0x1e0] sm:$0xff] }
 0x1f5   :  { %v7335_v19 = vadd.f32 %v3126_v42, %v3086_v47  ;;  %v3088_v54 = vadd.f32 %v3087_v51, %v7329_v35  ;;  %v3130_v55 = vpop.f32.mrf.mxu0  ;;  %v468_v35 = vld [vmem:[#allocation2 + $0xaf8] sm:$0xff]  ;;  %v6525_v42 = vcombine.low %v504_v59, %v508_v28  ;;  %v6640_v43 = vcombine.high %v3671_v44, %v3675_v41  ;;  %v3663_v45 = vld [vmem:[#allocation6 + $0x180] sm:$0xff] }
 0x1f6   :  { %v3089_v38 = vpop.f32.mrf.mxu1  ;;  %3423 = vmatpush1.bf16.msra.mxu0 %v6573_v46  ;;  %v6486_v23 = vcombine.high %v464_v5, %v468_v35  ;;  %v6485_v33 = vcombine.low %v464_v5, %v468_v35  ;;  %v3667_v46 = vld [vmem:[#allocation6 + $0x1a0] sm:$0xff]  ;;  %v6639_v47 = vcombine.low %v3671_v44, %v3675_v41  ;;  %v6616_v55 = vcombine.high %v3647_v29, %v3651_v53 }
 0x1f7   :  { %v7338_v60 = vadd.f32 %v3128_v17, %v3088_v54  ;;  %3398 = vmatpush2.bf16.msra.mxu1 %v6509_v49  ;;  %v3131_v61 = vpop.f32.mrf.mxu0  ;;  %3424 = vmatprep.subr.bf16.mxu0 %v6566_v50  ;;  %v6632_v17 = vcombine.high %v3663_v45, %v3667_v46  ;;  %v3655_v49 = vld [vmem:[#allocation6 + $0x140] sm:$0xff]  ;;  %v6631_v51 = vcombine.low %v3663_v45, %v3667_v46 }
 0x1f8   :  { %v3090_v0 = vpop.f32.mrf.mxu1  ;;  %3399 = vmatprep.subr.bf16.mxu1 %v6502_v52  ;;  %v3659_v50 = vld [vmem:[#allocation6 + $0x160] sm:$0xff]  ;;  %v6615_v38 = vcombine.low %v3647_v29, %v3651_v53 }
 0x1f9   :  { %v6624_v52 = vcombine.high %v3655_v49, %v3659_v50  ;;  %v6623_v54 = vcombine.low %v3655_v49, %v3659_v50  ;;  %v3631_v61 = vld [vmem:[#allocation6 + $0x80] sm:$0xff] }
 0x1fa   :  { %3425 = vmatpush1.bf16.msra.mxu0 %v6565_v27  ;;  %v6608_v27 = vcombine.high %v3639_v56, %v3643_v57  ;;  %v3627_v0 = vld [vmem:[#allocation6 + $0x60] sm:$0xff] }
 0x1fb   :  { %3400 = vmatpush2.bf16.msra.mxu1 %v6501_v62  ;;  %3426 = vmatprep.subr.bf16.mxu0 %v6558_v63  ;;  %v3623_v63 = vld [vmem:[#allocation6 + $0x40] sm:$0xff] }
 0x1fc   :  { %3401 = vmatprep.subr.bf16.mxu1 %v6494_v1  ;;  %v6592_v2 = vcombine.high %v3623_v63, %v3627_v0  ;;  %v3619_v5 = vld [vmem:[#allocation6 + $0x20] sm:$0xff]  ;;  %v6591_v35 = vcombine.low %v3623_v63, %v3627_v0 }
 0x1fd   :  { %v6583_v10 = vcombine.low %v3615_v3, %v3619_v5  ;;  %v3723_v58 = vld [vmem:[#allocation6 + $0x360] sm:$0xff] }
 0x1fe   :  { %3427 = vmatpush1.bf16.msra.mxu0 %v6557_v6  ;;  %v6584_v6 = vcombine.high %v3615_v3, %v3619_v5  ;;  %v3711_v28 = vld [vmem:[#allocation6 + $0x300] sm:$0xff] }
 0x1ff   :  { %3402 = vmatpush2.bf16.msra.mxu1 %v6493_v7  ;;  %3428 = vmatprep.subr.bf16.mxu0 %v6550_v8  ;;  %v3735_v7 = vld [vmem:[#allocation6 + $0x3c0] sm:$0xff] }
 0x200   :  { %3403 = vmatprep.subr.bf16.mxu1 %v6486_v23  ;;  %v3739_v8 = vld [vmem:[#allocation6 + $0x3e0] sm:$0xff]  ;;  %v7342_v23 = vld [vmem:[#allocation6 + $0x1c8] sm:$0xff] }
 0x201   :  { %v6704_v12 = vcombine.high %v3735_v7, %v3739_v8  ;;  %v6641_v13 = vcombine.low %v7342_v23, %v7344_v9  ;;  %v3715_v31 = vld [vmem:[#allocation6 + $0x320] sm:$0xff] }
 0x202   :  { %3429 = vmatpush1.bf16.msra.mxu0 %v6549_v14  ;;  %v3727_v14 = vld [vmem:[#allocation6 + $0x380] sm:$0xff] }
 0x203   :  { %3404 = vmatpush2.bf16.msra.mxu1 %v6485_v33  ;;  %3430 = vmatprep.subr.bf16.mxu0 %v6542_v15  ;;  %v3731_v33 = vld [vmem:[#allocation6 + $0x3a0] sm:$0xff]  ;;  %v6703_v15 = vcombine.low %v3735_v7, %v3739_v8 }
 0x204   :  { %3405 = vmatprep.subr.bf16.mxu1 %v6478_v18  ;;  %v6696_v18 = vcombine.high %v3727_v14, %v3731_v33  ;;  %v3703_v41 = vld [vmem:[#allocation6 + $0x2c0] sm:$0xff] }
 0x205   :  { %v3695_v45 = vld [vmem:[#allocation6 + $0x280] sm:$0xff] }
 0x206   :  { %3431 = vmatpush1.bf16.msra.mxu0 %v6541_v22  ;;  %v6695_v22 = vcombine.low %v3727_v14, %v3731_v33  ;;  %v3699_v46 = vld [vmem:[#allocation6 + $0x2a0] sm:$0xff] }
 0x207   :  { %3406 = vmatpush2.bf16.msra.mxu1 %v6477_v24  ;;  %3432 = vmatprep.subr.bf16.mxu0 %v6534_v25  ;;  %v3687_v49 = vld [vmem:[#allocation6 + $0x240] sm:$0xff] }
 0x208   :  { %3407 = vmatprep.subr.bf16.mxu1 %v6470_v26  ;;  %v6688_v26 = vcombine.high %v3719_v20, %v3723_v58  ;;  %v3691_v50 = vld [vmem:[#allocation6 + $0x260] sm:$0xff] }
 0x209   :  { %v3679_v29 = vld [vmem:[#allocation6 + $0x200] sm:$0xff] }
 0x20a   :  { %3433 = vmatpush1.bf16.msra.mxu0 %v6533_v34  ;;  %v3683_v53 = vld [vmem:[#allocation6 + $0x220] sm:$0xff] }
 0x20b   :  { %3408 = vmatpush2.bf16.msra.mxu1 %v6469_v37  ;;  %3434 = vmatprep.subr.bf16.mxu0 %v6526_v39  ;;  %v6687_v37 = vcombine.low %v3719_v20, %v3723_v58  ;;  %v3787_v3 = vld [vmem:[#allocation6 + $0x560] sm:$0xff] }
 0x20c   :  { %3409 = vmatprep.subr.bf16.mxu1 %v6462_v40  ;;  %v6680_v40 = vcombine.high %v3711_v28, %v3715_v31  ;;  %v3775_v8 = vld [vmem:[#allocation6 + $0x500] sm:$0xff] }
 0x20e   :  { %3435 = vmatpush1.bf16.msra.mxu0 %v6525_v42  ;;  %v3707_v42 = vld [vmem:[#allocation6 + $0x2e0] sm:$0xff] }
 0x20f   :  { %3410 = vmatpush2.bf16.msra.mxu1 %v6461_v16  ;;  %5151 = vmatprep.subr.bf16.mxu0 %v6640_v43  ;;  %v6679_v16 = vcombine.low %v3711_v28, %v3715_v31  ;;  %v6672_v43 = vcombine.high %v3703_v41, %v3707_v42  ;;  %v3463_v28 = vlaneseq  ;;  %v3751_v31 = vld [vmem:[#allocation6 + $0x440] sm:$0xff] }
 0x211   :  { %3453 = vmatmul.mubr.bf16.vlgmr.msra.gmra.mxu0 %v7277_v30  ;;  %v3635_v30 = vld [vmem:[#allocation6 + $0xa0] sm:$0xff] }
 0x212   :  { %3412 = vmatmul.mubr.bf16.vlgmr.msra.gmra.mxu1 %v7284_v36  ;;  %5152 = vmatpush1.bf16.msra.mxu0 %v6639_v47  ;;  %v6607_v36 = vcombine.low %v3639_v56, %v3643_v57  ;;  %v6600_v62 = vcombine.high %v3631_v61, %v3635_v30  ;;  %v6599_v1 = vcombine.low %v3631_v61, %v3635_v30  ;;  %v3799_v56 = vld [vmem:[#allocation6 + $0x5c0] sm:$0xff] }
 0x213   :  { %5153 = vmatprep.subr.bf16.mxu0 %v6632_v17  ;;  %v6671_v47 = vcombine.low %v3703_v41, %v3707_v42  ;;  %v6664_v17 = vcombine.high %v3695_v45, %v3699_v46  ;;  %v3803_v57 = vld [vmem:[#allocation6 + $0x5e0] sm:$0xff]  ;;  %v6642_v30 = vcombine.high %v7342_v23, %v7344_v9 }
 0x214   :  { %v6768_v61 = vcombine.high %v3799_v56, %v3803_v57 }
 0x216   :  { %5154 = vmatpush1.bf16.msra.mxu0 %v6631_v51  ;;  %v6663_v51 = vcombine.low %v3695_v45, %v3699_v46  ;;  %5192 = vmatprep.subr.bf16.mxu1 %v6768_v61  ;;  %v3867_v45 = vld [vmem:[#allocation6 + $0x7e0] sm:$0xff]  ;;  %v7365_v46 = vld [vmem:[#allocation4] sm:$0xff] }
 0x217   :  { %5155 = vmatprep.subr.bf16.mxu0 %v6624_v52  ;;  %v6656_v52 = vcombine.high %v3687_v49, %v3691_v50  ;;  %v3851_v61 = vld [vmem:[#allocation6 + $0x760] sm:$0xff] }
 0x21a   :  { %5156 = vmatpush1.bf16.msra.mxu0 %v6623_v54  ;;  %v6655_v54 = vcombine.low %v3687_v49, %v3691_v50 }
 0x21b   :  { %5157 = vmatprep.subr.bf16.mxu0 %v6616_v55  ;;  %v6648_v55 = vcombine.high %v3679_v29, %v3683_v53 }
 0x21e   :  { %5158 = vmatpush1.bf16.msra.mxu0 %v6615_v38  ;;  %v6647_v38 = vcombine.low %v3679_v29, %v3683_v53 }
 0x21f   :  { %5159 = vmatprep.subr.bf16.mxu0 %v6608_v27  ;;  %v6767_v27 = vcombine.low %v3799_v56, %v3803_v57 }
 0x221   :  { %5193 = vmatpush1.bf16.msra.mxu1 %v6767_v27  ;;  %v3847_v27 = vld [vmem:[#allocation6 + $0x740] sm:$0xff] }
 0x222   :  { %5160 = vmatpush1.bf16.msra.mxu0 %v6607_v36  ;;  %v3791_v36 = vld [vmem:[#allocation6 + $0x580] sm:$0xff] }
 0x223   :  { %5161 = vmatprep.subr.bf16.mxu0 %v6600_v62  ;;  %v3795_v62 = vld [vmem:[#allocation6 + $0x5a0] sm:$0xff] }
 0x224   :  { %v6759_v63 = vcombine.low %v3791_v36, %v3795_v62  ;;  %v6760_v0 = vcombine.high %v3791_v36, %v3795_v62  ;;  %v6816_v36 = vcombine.high %v3847_v27, %v3851_v61 }
 0x226   :  { %5162 = vmatpush1.bf16.msra.mxu0 %v6599_v1  ;;  %5194 = vmatprep.subr.bf16.mxu1 %v6760_v0 }
 0x227   :  { %5163 = vmatprep.subr.bf16.mxu0 %v6592_v2  ;;  %5195 = vmatpush1.bf16.msra.mxu1 %v6759_v63  ;;  %v3783_v2 = vld [vmem:[#allocation6 + $0x540] sm:$0xff] }
 0x228   :  { %v6752_v5 = vcombine.high %v3783_v2, %v3787_v3 }
 0x22a   :  { %5164 = vmatpush1.bf16.msra.mxu0 %v6591_v35  ;;  %5196 = vmatprep.subr.bf16.mxu1 %v6752_v5 }
 0x22b   :  { %5165 = vmatprep.subr.bf16.mxu0 %v6584_v6  ;;  %v6751_v6 = vcombine.low %v3783_v2, %v3787_v3  ;;  %v6815_v2 = vcombine.low %v3847_v27, %v3851_v61 }
 0x22d   :  { %5197 = vmatpush1.bf16.msra.mxu1 %v6751_v6 }
 0x22e   :  { %5166 = vmatpush1.bf16.msra.mxu0 %v6583_v10  ;;  %v3779_v10 = vld [vmem:[#allocation6 + $0x520] sm:$0xff] }
 0x22f   :  { %5167 = vmatprep.subr.bf16.mxu0 %v6704_v12  ;;  %v6744_v12 = vcombine.high %v3775_v8, %v3779_v10  ;;  %v6743_v33 = vcombine.low %v3775_v8, %v3779_v10 }
 0x231   :  { %v3167_v21 = vpop.f32.mrf.mxu0  ;;  %5198 = vmatprep.subr.bf16.mxu1 %v6744_v12 }
 0x232   :  { %v3208_v48 = vpop.f32.mrf.mxu1  ;;  %5168 = vmatpush2.bf16.msra.mxu0 %v6703_v15  ;;  %5199 = vmatpush1.bf16.msra.mxu1 %v6743_v33  ;;  %v3767_v15 = vld [vmem:[#allocation6 + $0x4c0] sm:$0xff] }
 0x233   :  { %v7348_v24 = vadd.f32 %v3208_v48, %v3167_v21  ;;  %v7350_v25 = vpop.f32.mrf.mxu0  ;;  %5169 = vmatprep.subr.bf16.mxu0 %v6696_v18  ;;  %v3771_v18 = vld [vmem:[#allocation6 + $0x4e0] sm:$0xff] }
 0x234   :  { %v7352_v59 = vpop.f32.mrf.mxu1  ;;  %v6736_v20 = vcombine.high %v3767_v15, %v3771_v18  ;;  %v6735_v58 = vcombine.low %v3767_v15, %v3771_v18  ;;  %v3759_v21 = vld [vmem:[#allocation6 + $0x480] sm:$0xff] }
 0x235   :  { %v3171_v32 = vpop.f32.mrf.mxu0  ;;  %v3763_v48 = vld [vmem:[#allocation6 + $0x4a0] sm:$0xff]  ;;  %v3211_v56 = vadd.f32 %v7352_v59, %v7350_v25 }
 0x236   :  { %v3212_v34 = vpop.f32.mrf.mxu1  ;;  %5170 = vmatpush2.bf16.msra.mxu0 %v6695_v22  ;;  %5200 = vmatprep.subr.bf16.mxu1 %v6736_v20  ;;  %v6728_v22 = vcombine.high %v3759_v21, %v3763_v48  ;;  %v3755_v32 = vld [vmem:[#allocation6 + $0x460] sm:$0xff] }
 0x237   :  { %v3172_v39 = vpop.f32.mrf.mxu0  ;;  %5171 = vmatprep.subr.bf16.mxu0 %v6688_v26  ;;  %5201 = vmatpush1.bf16.msra.mxu1 %v6735_v58  ;;  %v6727_v26 = vcombine.low %v3759_v21, %v3763_v48  ;;  %v6720_v34 = vcombine.high %v3751_v31, %v3755_v32  ;;  %v3843_v59 = vld [vmem:[#allocation6 + $0x720] sm:$0xff] }
 0x238   :  { %v3213_v44 = vpop.f32.mrf.mxu1  ;;  %5202 = vmatprep.subr.bf16.mxu1 %v6728_v22  ;;  %v7360_v39 = vshrl.u32 %v3463_v28, 7  ;;  %v3831_v33 = vld [vmem:[#allocation6 + $0x6c0] sm:$0xff] }
 0x239   :  { %v3747_v44 = vld [vmem:[#allocation6 + $0x420] sm:$0xff] }
 0x23a   :  { %5172 = vmatpush2.bf16.msra.mxu0 %v6687_v37  ;;  %v6719_v37 = vcombine.low %v3751_v31, %v3755_v32  ;;  %v3835_v15 = vld [vmem:[#allocation6 + $0x6e0] sm:$0xff] }
 0x23b   :  { %5173 = vmatprep.subr.bf16.mxu0 %v6680_v40  ;;  %5203 = vmatpush1.bf16.msra.mxu1 %v6727_v26  ;;  %v3743_v40 = vld [vmem:[#allocation6 + $0x400] sm:$0xff]  ;;  %v6800_v18 = vcombine.high %v3831_v33, %v3835_v15  ;;  %v6799_v58 = vcombine.low %v3831_v33, %v3835_v15 }
 0x23c   :  { %5204 = vmatprep.subr.bf16.mxu1 %v6720_v34  ;;  %v6712_v41 = vcombine.high %v3743_v40, %v3747_v44  ;;  %v6711_v42 = vcombine.low %v3743_v40, %v3747_v44  ;;  %v3823_v48 = vld [vmem:[#allocation6 + $0x680] sm:$0xff] }
 0x23d   :  { %v3827_v22 = vld [vmem:[#allocation6 + $0x6a0] sm:$0xff] }
 0x23e   :  { %5174 = vmatpush2.bf16.msra.mxu0 %v6679_v16  ;;  %v7363_v16 = vsub.s32 0, %v7360_v39  ;;  %v6792_v26 = vcombine.high %v3823_v48, %v3827_v22  ;;  %v6791_v28 = vcombine.low %v3823_v48, %v3827_v22  ;;  %v3815_v31 = vld [vmem:[#allocation6 + $0x640] sm:$0xff] }
 0x23f   :  { %5175 = vmatprep.subr.bf16.mxu0 %v6672_v43  ;;  %5205 = vmatpush1.bf16.msra.mxu1 %v6719_v37  ;;  %v3863_v43 = vld [vmem:[#allocation6 + $0x7c0] sm:$0xff] }
 0x240   :  { %5206 = vmatprep.subr.bf16.mxu1 %v6712_v41  ;;  %v6831_v49 = vcombine.low %v3863_v43, %v3867_v45  ;;  %v3466_v50 = vrot.slane %v7365_v46, %v7363_v16  ;;  %v3819_v32 = vld [vmem:[#allocation6 + $0x660] sm:$0xff] }
 0x241   :  { %v6784_v34 = vcombine.high %v3815_v31, %v3819_v32  ;;  %v6783_v37 = vcombine.low %v3815_v31, %v3819_v32  ;;  %v3807_v40 = vld [vmem:[#allocation6 + $0x600] sm:$0xff] }
 0x242   :  { %5176 = vmatpush2.bf16.msra.mxu0 %v6671_v47  ;;  %v6832_v47 = vcombine.high %v3863_v43, %v3867_v45  ;;  %v3811_v44 = vld [vmem:[#allocation6 + $0x620] sm:$0xff]  ;;  %v7386_v43 = vld [vmem:[#allocation6 + $0x5c8] sm:$0xff] }
 0x243   :  { %5177 = vmatprep.subr.bf16.mxu0 %v6664_v17  ;;  %5207 = vmatpush1.bf16.msra.mxu1 %v6711_v42  ;;  %v3469_v17 = vsub.s32 2, %v7360_v39  ;;  %v6775_v41 = vcombine.low %v3807_v40, %v3811_v44  ;;  %v6776_v42 = vcombine.high %v3807_v40, %v3811_v44  ;;  %v7388_v45 = vld [vmem:[#allocation6 + $0x5e8] sm:$0xff] }
 0x244   :  { %5208 = vmatprep.subr.bf16.mxu1 %v6832_v47  ;;  %v3648_v40 = vld [vmem:[#allocation6 + $0x108] sm:$0xff] }
 0x245   :  { %v3470_v53 = vrot.slane %v7365_v46, %v3469_v17  ;;  %v3652_v44 = vld [vmem:[#allocation6 + $0x128] sm:$0xff] }
 0x246   :  { %5178 = vmatpush2.bf16.msra.mxu0 %v6663_v51  ;;  %v3855_v51 = vld [vmem:[#allocation6 + $0x780] sm:$0xff] }
 0x247   :  { %5179 = vmatprep.subr.bf16.mxu0 %v6656_v52  ;;  %5209 = vmatpush2.bf16.msra.mxu1 %v6831_v49  ;;  %v3859_v52 = vld [vmem:[#allocation6 + $0x7a0] sm:$0xff]  ;;  %v3490_v0 = vrot.slane %v3470_v53, %v7363_v16  ;;  %v6770_v49 = vcombine.high %v7386_v43, %v7388_v45 }
 0x248   :  { %v6824_v29 = vcombine.high %v3855_v51, %v3859_v52 }
 0x24a   :  { %5180 = vmatpush2.bf16.msra.mxu0 %v6655_v54  ;;  %v6823_v54 = vcombine.low %v3855_v51, %v3859_v52  ;;  %5210 = vmatprep.subr.bf16.mxu1 %v6824_v29  ;;  %v6769_v51 = vcombine.low %v7386_v43, %v7388_v45  ;;  %v3705_v45 = vld [vmem:[#allocation6 + $0x2d0] sm:$0xff] }
 0x24b   :  { %5181 = vmatprep.subr.bf16.mxu0 %v6648_v55 }
 0x24c   :  { %5211 = vmatpush2.bf16.msra.mxu1 %v6823_v54 }
 0x24d   :  { %5212 = vmatprep.subr.bf16.mxu1 %v6816_v36  ;;  %v3573_v36 = vsub.s32 3, %v7360_v39 }
 0x24e   :  { %5182 = vmatpush2.bf16.msra.mxu0 %v6647_v38  ;;  %v3486_v38 = vrot.slane %v3466_v50, %v7363_v16 }
 0x24f   :  { %5233 = vmatprep.subr.bf16.mxu0 %v6642_v30 }
 0x250   :  { %5213 = vmatpush2.bf16.msra.mxu1 %v6815_v2 }
 0x252   :  { %v7356_v1 = vpop.f32.mrf.mxu1 }
 0x254   :  { %v7358_v35 = vpop.f32.mrf.mxu1 }
 0x256   :  { %v3294_v7 = vpop.f32.mrf.mxu1 }
 0x258   :  { %v3295_v14 = vpop.f32.mrf.mxu1 }
 0x271   :  { %v3249_v55 = vpop.f32.mrf.mxu0 }
 0x272   :  { %v3250_v57 = vadd.f32 %v3249_v55, %v7348_v24  ;;  %v3839_v24 = vld [vmem:[#allocation6 + $0x700] sm:$0xff] }
 0x273   :  { %v3251_v30 = vpop.f32.mrf.mxu0  ;;  %v6808_v7 = vcombine.high %v3839_v24, %v3843_v59 }
 0x274   :  { %v3291_v62 = vadd.f32 %v7356_v1, %v3250_v57  ;;  %v3252_v63 = vadd.f32 %v3251_v30, %v3211_v56  ;;  %v6807_v1 = vcombine.low %v3839_v24, %v3843_v59 }
 0x275   :  { %v3253_v3 = vpop.f32.mrf.mxu0  ;;  %5214 = vmatprep.subr.bf16.mxu1 %v6808_v7 }
 0x276   :  { %v7379_v5 = vadd.f32 %v3486_v38, %v3291_v62  ;;  %v3293_v25 = vadd.f32 %v7358_v35, %v3252_v63  ;;  %5215 = vmatpush2.bf16.msra.mxu1 %v6807_v1  ;;  %v7399_v38 = vsub.s32 1, %v7360_v39 }
 0x277   :  { %v3254_v6 = vpop.f32.mrf.mxu0  ;;  %5216 = vmatprep.subr.bf16.mxu1 %v6800_v18 }
 0x278   :  { %v3507_v8 = vand.u32 2147483647, %v7379_v5  ;;  %v7383_v10 = vadd.f32 %v3490_v0, %v3293_v25  ;;  %v3570_v2 = vrot.slane %v7365_v46, %v7399_v38  ;;  %v3503_v59 = vmax.f32 %v7379_v5, 0.0 }
 0x279   :  { %v3574_v6 = vrot.slane %v7365_v46, %v3573_v36 }
 0x27a   :  { %v3511_v12 = vsub.f32 0.0, %v3507_v8  ;;  %v3508_v14 = vand.u32 2147483647, %v7383_v10  ;;  %5217 = vmatpush2.bf16.msra.mxu1 %v6799_v58  ;;  %v3590_v33 = vrot.slane %v3570_v2, %v7399_v38  ;;  %v3620_v2 = vld [vmem:[#allocation6 + $0x28] sm:$0xff] }
 0x27b   :  { %5218 = vmatprep.subr.bf16.mxu1 %v6792_v26  ;;  %v3664_v26 = vld [vmem:[#allocation6 + $0x188] sm:$0xff] }
 0x27c   :  { %v3515_v20 = vmul.f32 1.442695, %v3511_v12  ;;  %v3512_v35 = vsub.f32 0.0, %v3508_v14  ;;  %v3504_v14 = vmax.f32 %v7383_v10, 0.0 }
 0x27e   :  { %7010 = vpow2.f32 %v3515_v20  ;;  %v3517_v21 = vmul.f32 1.442695, %v3512_v35  ;;  %5219 = vmatpush2.bf16.msra.mxu1 %v6791_v28  ;;  %v3594_v20 = vrot.slane %v3574_v6, %v7399_v38  ;;  %v3668_v28 = vld [vmem:[#allocation6 + $0x1a8] sm:$0xff] }
 0x27f   :  { %5220 = vmatprep.subr.bf16.mxu1 %v6784_v34  ;;  %v6634_v32 = vcombine.high %v3664_v26, %v3668_v28  ;;  %v3656_v34 = vld [vmem:[#allocation6 + $0x148] sm:$0xff] }
 0x280   :  { %7012 = vpow2.f32 %v3517_v21 }
 0x282   :  { %5221 = vmatpush2.bf16.msra.mxu1 %v6783_v37  ;;  %v3660_v37 = vld [vmem:[#allocation6 + $0x168] sm:$0xff] }
 0x283   :  { %5222 = vmatprep.subr.bf16.mxu1 %v6776_v42  ;;  %v6625_v42 = vcombine.low %v3656_v34, %v3660_v37 }
 0x286   :  { %5223 = vmatpush2.bf16.msra.mxu1 %v6775_v41 }
 0x287   :  { %5274 = vmatprep.subr.bf16.mxu1 %v6770_v49 }
 0x28b   :  { %v7011_v47 = vpop.eup %7010 }
 0x28c   :  { %v3523_v50 = vadd.f32 1.0, %v7011_v47  ;;  %v3526_v54 = vmul.f32 -0.5, %v7011_v47  ;;  %v3529_v30 = vand.u32 2147483647, %v7011_v47 }
 0x28d   :  { %v7013_v52 = vpop.eup %7012 }
 0x28e   :  { %7014 = vlog2.f32 %v3523_v50  ;;  %v3532_v29 = vadd.f32 1.0, %v7013_v52  ;;  %v3535_v56 = vmul.f32 -0.5, %v7013_v52  ;;  %v3527_v27 = vadd.f32 1.0, %v3526_v54  ;;  %v3640_v50 = vld [vmem:[#allocation6 + $0xc8] sm:$0xff] }
 0x28f   :  { %v3538_v0 = vand.u32 2147483647, %v7013_v52  ;;  %vm3530_vm0 = vcmp.lt.f32.partialorder %v3529_v30, 0.0004427343  ;;  %v6617_v54 = vcombine.low %v3648_v40, %v3652_v44  ;;  %v3628_v30 = vld [vmem:[#allocation6 + $0x68] sm:$0xff] }
 0x290   :  { %7016 = vlog2.f32 %v3532_v29  ;;  %v3536_v62 = vadd.f32 1.0, %v3535_v56  ;;  %v3528_v25 = vmul.f32 %v7011_v47, %v3527_v27  ;;  %v6618_v47 = vcombine.high %v3648_v40, %v3652_v44  ;;  %v3636_v56 = vld [vmem:[#allocation6 + $0xa8] sm:$0xff] }
 0x291   :  { %vm3539_vm1 = vcmp.lt.f32.partialorder %v3538_v0, 0.0004427343  ;;  %v3616_v0 = vld [vmem:[#allocation6 + $0x8] sm:$0xff] }
 0x292   :  { %v7394_v53 = vpop.f32.mrf.mxu1  ;;  %v3537_v1 = vmul.f32 %v7013_v52, %v3536_v62  ;;  %v3644_v52 = vld [vmem:[#allocation6 + $0xe8] sm:$0xff]  ;;  %v6585_v6 = vcombine.low %v3616_v0, %v3620_v2 }
 0x293   :  { %v6610_v23 = vcombine.high %v3640_v50, %v3644_v52 }
 0x294   :  { %v7396_v55 = vpop.f32.mrf.mxu1 }
 0x296   :  { %v3335_v57 = vpop.f32.mrf.mxu1 }
 0x297   :  { %v6609_v57 = vcombine.low %v3640_v50, %v3644_v52 }
 0x298   :  { %v3336_v61 = vpop.f32.mrf.mxu1 }
 0x299   :  { %v3624_v61 = vld [vmem:[#allocation6 + $0x48] sm:$0xff] }
 0x29b   :  { %v7015_v63 = vpop.eup %7014 }
 0x29c   :  { %v3525_v3 = vmul.f32 0.6931472, %v7015_v63  ;;  %v6594_v63 = vcombine.high %v3624_v61, %v3628_v30 }
 0x29d   :  { %v7017_v24 = vpop.eup %7016 }
 0x29e   :  { %v3531_v7 = vsel %vm3530_vm0, %v3528_v25, %v3525_v3  ;;  %v3534_v8 = vmul.f32 0.6931472, %v7017_v24  ;;  %v6593_v3 = vcombine.low %v3624_v61, %v3628_v30  ;;  %v6586_v25 = vcombine.high %v3616_v0, %v3620_v2  ;;  %v3736_v24 = vld [vmem:[#allocation6 + $0x3c8] sm:$0xff] }
 0x29f   :  { %v3559_v12 = vadd.f32 %v3531_v7, %v3503_v59  ;;  %v3740_v59 = vld [vmem:[#allocation6 + $0x3e8] sm:$0xff] }
 0x2a0   :  { %v3540_v15 = vsel %vm3539_vm1, %v3537_v1, %v3534_v8  ;;  %v6706_v7 = vcombine.high %v3736_v24, %v3740_v59  ;;  %v3728_v8 = vld [vmem:[#allocation6 + $0x388] sm:$0xff] }
 0x2a1   :  { %v3560_v18 = vadd.f32 %v3540_v15, %v3504_v14  ;;  %v3563_v5 = vmul.f32 %v3559_v12, %v7311_v4  ;;  %v6633_v4 = vcombine.low %v3664_v26, %v3668_v28  ;;  %v3732_v1 = vld [vmem:[#allocation6 + $0x3a8] sm:$0xff]  ;;  %v6705_v12 = vcombine.low %v3736_v24, %v3740_v59 }
 0x2a2   :  { %v6698_v14 = vcombine.high %v3728_v8, %v3732_v1  ;;  %v3720_v15 = vld [vmem:[#allocation6 + $0x348] sm:$0xff] }
 0x2a3   :  { %v3564_v35 = vmul.f32 %v3560_v18, %v7316_v11  ;;  %v3603_v58 = vadd.f32 %v3590_v33, %v3563_v5  ;;  %v6626_v11 = vcombine.high %v3656_v34, %v3660_v37  ;;  %v3473_v33 = vsub.s32 4, %v7360_v39  ;;  %v3724_v18 = vld [vmem:[#allocation6 + $0x368] sm:$0xff] }
 0x2a4   :  { %v3477_v5 = vsub.s32 6, %v7360_v39 }
 0x2a5   :  { %v3604_v21 = vadd.f32 %v3594_v20, %v3564_v35  ;;  %v3607_v48 = vmax.f32 %v3603_v58, 0.0  ;;  %v6697_v20 = vcombine.low %v3728_v8, %v3732_v1  ;;  %v6690_v35 = vcombine.high %v3720_v15, %v3724_v18  ;;  %v3680_v1 = vld [vmem:[#allocation6 + $0x208] sm:$0xff] }
 0x2a6   :  { %v3474_v58 = vrot.slane %v7365_v46, %v3473_v33  ;;  %v3478_v28 = vrot.slane %v7365_v46, %v3477_v5 }
 0x2a7   :  { %v3608_v22 = vmax.f32 %v3604_v21, 0.0  ;;  %v7415_v10 = vpack.c.bf16 %v3607_v48, %v3607_v48  ;;  %v3712_v21 = vld [vmem:[#allocation6 + $0x308] sm:$0xff] }
 0x2a8   :  { %v3716_v48 = vld [vmem:[#allocation6 + $0x328] sm:$0xff]  ;;  %v3494_v40 = vrot.slane %v3474_v58, %v7363_v16  ;;  %v3498_v52 = vrot.slane %v3478_v28, %v7363_v16  ;;  %v3657_v28 = vld [vmem:[#allocation6 + $0x150] sm:$0xff] }
 0x2a9   :  { %v7413_v31 = vpack.c.bf16 %v3608_v22, %v3608_v22  ;;  %v6682_v37 = vcombine.high %v3712_v21, %v3716_v48 }
 0x2ab   :  { %5183 = vmatprep.mubr.bf16.mxu0 %v7413_v31 }
 0x2ac   :  { %5184 = vmatmul.mubr.bf16.vlgmr.msra.gmra.mxu0 %v7415_v10 }
 0x2ad   :  { %5234 = vmatpush1.bf16.msra.mxu0 %v6641_v13  ;;  %5265 = vmatprep.mubr.bf16.mxu0 %v7413_v31  ;;  %v3632_v13 = vld [vmem:[#allocation6 + $0x88] sm:$0xff] }
 0x2ae   :  { %5235 = vmatprep.subr.bf16.mxu0 %v6634_v32  ;;  %v6602_v27 = vcombine.high %v3632_v13, %v3636_v56  ;;  %v6601_v62 = vcombine.low %v3632_v13, %v3636_v56  ;;  %v6689_v32 = vcombine.low %v3720_v15, %v3724_v18  ;;  %v3696_v56 = vld [vmem:[#allocation6 + $0x288] sm:$0xff]  ;;  %v3673_v18 = vld [vmem:[#allocation6 + $0x1d0] sm:$0xff] }
 0x2b1   :  { %5236 = vmatpush1.bf16.msra.mxu0 %v6633_v4  ;;  %v3372_v41 = vpop.f32.mrf.mxu0 }
 0x2b2   :  { %5237 = vmatprep.subr.bf16.mxu0 %v6626_v11  ;;  %v3373_v22 = vadd.f32 %v3372_v41, %v7394_v53 }
 0x2b3   :  { %v3374_v49 = vpop.f32.mrf.mxu0 }
 0x2b4   :  { %v3375_v4 = vadd.f32 %v3374_v49, %v7396_v55 }
 0x2b5   :  { %5238 = vmatpush1.bf16.msra.mxu0 %v6625_v42  ;;  %v3376_v29 = vpop.f32.mrf.mxu0  ;;  %v3704_v42 = vld [vmem:[#allocation6 + $0x2c8] sm:$0xff] }
 0x2b6   :  { %5239 = vmatprep.subr.bf16.mxu0 %v6618_v47  ;;  %v3708_v47 = vld [vmem:[#allocation6 + $0x2e8] sm:$0xff] }
 0x2b7   :  { %v3377_v9 = vpop.f32.mrf.mxu0 }
 0x2b8   :  { %v6674_v9 = vcombine.high %v3704_v42, %v3708_v47 }
 0x2b9   :  { %5240 = vmatpush1.bf16.msra.mxu0 %v6617_v54  ;;  %v6681_v54 = vcombine.low %v3712_v21, %v3716_v48  ;;  %v3665_v21 = vld [vmem:[#allocation6 + $0x190] sm:$0xff] }
 0x2ba   :  { %5241 = vmatprep.subr.bf16.mxu0 %v6610_v23  ;;  %v3669_v48 = vld [vmem:[#allocation6 + $0x1b0] sm:$0xff] }
 0x2bd   :  { %5242 = vmatpush1.bf16.msra.mxu0 %v6609_v57  ;;  %v3700_v57 = vld [vmem:[#allocation6 + $0x2a8] sm:$0xff] }
 0x2be   :  { %5243 = vmatprep.subr.bf16.mxu0 %v6602_v27 }
 0x2c1   :  { %5244 = vmatpush1.bf16.msra.mxu0 %v6601_v62  ;;  %v6673_v62 = vcombine.low %v3704_v42, %v3708_v47  ;;  %v3649_v42 = vld [vmem:[#allocation6 + $0x110] sm:$0xff] }
 0x2c2   :  { %5245 = vmatprep.subr.bf16.mxu0 %v6594_v63  ;;  %v6666_v63 = vcombine.high %v3696_v56, %v3700_v57  ;;  %v3653_v47 = vld [vmem:[#allocation6 + $0x130] sm:$0xff] }
 0x2c5   :  { %5246 = vmatpush1.bf16.msra.mxu0 %v6593_v3  ;;  %v3688_v3 = vld [vmem:[#allocation6 + $0x248] sm:$0xff] }
 0x2c6   :  { %5247 = vmatprep.subr.bf16.mxu0 %v6586_v25  ;;  %v3692_v25 = vld [vmem:[#allocation6 + $0x268] sm:$0xff] }
 0x2c9   :  { %5248 = vmatpush1.bf16.msra.mxu0 %v6585_v6  ;;  %v6665_v6 = vcombine.low %v3696_v56, %v3700_v57  ;;  %v3577_v56 = vsub.s32 5, %v7360_v39 }
 0x2ca   :  { %5249 = vmatprep.subr.bf16.mxu0 %v6706_v7  ;;  %v6658_v7 = vcombine.high %v3688_v3, %v3692_v25 }
 0x2cd   :  { %5250 = vmatpush2.bf16.msra.mxu0 %v6705_v12  ;;  %v3684_v12 = vld [vmem:[#allocation6 + $0x228] sm:$0xff] }
 0x2ce   :  { %5251 = vmatprep.subr.bf16.mxu0 %v6698_v14  ;;  %v6657_v14 = vcombine.low %v3688_v3, %v3692_v25  ;;  %v6650_v15 = vcombine.high %v3680_v1, %v3684_v12  ;;  %v3629_v3 = vld [vmem:[#allocation6 + $0x70] sm:$0xff] }
 0x2d1   :  { %5252 = vmatpush2.bf16.msra.mxu0 %v6697_v20  ;;  %v3454_v26 = vpop.f32.mrf.mxu0  ;;  %v3677_v20 = vld [vmem:[#allocation6 + $0x1f0] sm:$0xff] }
 0x2d2   :  { %v3413_v34 = vpop.f32.mrf.mxu1  ;;  %5253 = vmatprep.subr.bf16.mxu0 %v6690_v35  ;;  %v6649_v35 = vcombine.low %v3680_v1, %v3684_v12  ;;  %v6644_v58 = vcombine.high %v3673_v18, %v3677_v20 }
 0x2d3   :  { %v3414_v11 = vadd.f32 %v3413_v34, %v3373_v22  ;;  %v3456_v44 = vpop.f32.mrf.mxu0  ;;  %v6643_v22 = vcombine.low %v3673_v18, %v3677_v20 }
 0x2d4   :  { %v3415_v50 = vpop.f32.mrf.mxu1 }
 0x2d5   :  { %v3455_v53 = vadd.f32 %v3454_v26, %v3414_v11  ;;  %v3416_v41 = vadd.f32 %v3415_v50, %v3375_v4  ;;  %5254 = vmatpush2.bf16.msra.mxu0 %v6689_v32  ;;  %v3458_v29 = vpop.f32.mrf.mxu0  ;;  %v6636_v26 = vcombine.high %v3665_v21, %v3669_v48  ;;  %v3661_v32 = vld [vmem:[#allocation6 + $0x170] sm:$0xff]  ;;  %v6635_v4 = vcombine.low %v3665_v21, %v3669_v48 }
 0x2d6   :  { %v3417_v23 = vpop.f32.mrf.mxu1  ;;  %5255 = vmatprep.subr.bf16.mxu0 %v6682_v37  ;;  %v6627_v50 = vcombine.low %v3657_v28, %v3661_v32  ;;  %v3621_v21 = vld [vmem:[#allocation6 + $0x30] sm:$0xff] }
 0x2d7   :  { %v7435_v13 = vadd.f32 %v3494_v40, %v3455_v53  ;;  %v3457_v55 = vadd.f32 %v3456_v44, %v3416_v41  ;;  %v3459_v49 = vpop.f32.mrf.mxu0  ;;  %v6628_v40 = vcombine.high %v3657_v28, %v3661_v32  ;;  %v6620_v53 = vcombine.high %v3649_v42, %v3653_v47  ;;  %v3641_v41 = vld [vmem:[#allocation6 + $0xd0] sm:$0xff] }
 0x2d8   :  { %v3418_v27 = vpop.f32.mrf.mxu1  ;;  %v3637_v49 = vld [vmem:[#allocation6 + $0xb0] sm:$0xff] }
 0x2d9   :  { %v3509_v61 = vand.u32 2147483647, %v7435_v13  ;;  %v7438_v30 = vadd.f32 %v3498_v52, %v3457_v55  ;;  %5256 = vmatpush2.bf16.msra.mxu0 %v6681_v54  ;;  %v3645_v52 = vld [vmem:[#allocation6 + $0xf0] sm:$0xff]  ;;  %v6619_v54 = vcombine.low %v3649_v42, %v3653_v47  ;;  %v3505_v12 = vmax.f32 %v7435_v13, 0.0 }
 0x2da   :  { %5257 = vmatprep.subr.bf16.mxu0 %v6674_v9  ;;  %v6612_v23 = vcombine.high %v3641_v41, %v3645_v52  ;;  %v3633_v55 = vld [vmem:[#allocation6 + $0x90] sm:$0xff]  ;;  %v6611_v27 = vcombine.low %v3641_v41, %v3645_v52  ;;  %v3796_v52 = vld [vmem:[#allocation6 + $0x5a8] sm:$0xff] }
 0x2db   :  { %v3513_v0 = vsub.f32 0.0, %v3509_v61  ;;  %v3510_v2 = vand.u32 2147483647, %v7438_v30 }
 0x2dd   :  { %v3519_v24 = vmul.f32 1.442695, %v3513_v0  ;;  %v3514_v59 = vsub.f32 0.0, %v3510_v2  ;;  %5258 = vmatpush2.bf16.msra.mxu0 %v6673_v62  ;;  %v6604_v62 = vcombine.high %v3633_v55, %v3637_v49  ;;  %v3625_v2 = vld [vmem:[#allocation6 + $0x50] sm:$0xff] }
 0x2de   :  { %5259 = vmatprep.subr.bf16.mxu0 %v6666_v63  ;;  %v3581_v63 = vsub.s32 7, %v7360_v39  ;;  %v6595_v13 = vcombine.low %v3625_v2, %v3629_v3 }
 0x2df   :  { %7018 = vpow2.f32 %v3519_v24  ;;  %v3521_v8 = vmul.f32 1.442695, %v3514_v59  ;;  %v3578_v59 = vrot.slane %v7365_v46, %v3577_v56 }
 0x2e1   :  { %7020 = vpow2.f32 %v3521_v8  ;;  %5260 = vmatpush2.bf16.msra.mxu0 %v6665_v6  ;;  %v6603_v8 = vcombine.low %v3633_v55, %v3637_v49  ;;  %v3721_v49 = vld [vmem:[#allocation6 + $0x350] sm:$0xff] }
 0x2e2   :  { %5261 = vmatprep.subr.bf16.mxu0 %v6658_v7 }
 0x2e5   :  { %5262 = vmatpush2.bf16.msra.mxu0 %v6657_v14  ;;  %v6596_v14 = vcombine.high %v3625_v2, %v3629_v3 }
 0x2e6   :  { %5263 = vmatprep.subr.bf16.mxu0 %v6650_v15  ;;  %v3582_v15 = vrot.slane %v7365_v46, %v3581_v63 }
 0x2e8   :  { %v3602_v46 = vrot.slane %v3582_v15, %v7399_v38 }
 0x2e9   :  { %5264 = vmatpush2.bf16.msra.mxu0 %v6649_v35 }
 0x2ea   :  { %5315 = vmatprep.subr.bf16.mxu0 %v6644_v58  ;;  %v3617_v58 = vld [vmem:[#allocation6 + $0x10] sm:$0xff] }
 0x2ec   :  { %v7019_v34 = vpop.eup %7018  ;;  %5266 = vmatmul.mubr.bf16.vlgmr.msra.gmra.mxu0 %v7415_v10 }
 0x2ed   :  { %v3541_v37 = vadd.f32 1.0, %v7019_v34  ;;  %5316 = vmatpush1.bf16.msra.mxu0 %v6643_v22  ;;  %5347 = vmatprep.mubr.bf16.mxu0 %v7413_v31  ;;  %v3544_v29 = vmul.f32 -0.5, %v7019_v34  ;;  %v3547_v61 = vand.u32 2147483647, %v7019_v34  ;;  %v3506_v22 = vmax.f32 %v7438_v30, 0.0 }
 0x2ee   :  { %v7021_v11 = vpop.eup %7020  ;;  %5317 = vmatprep.subr.bf16.mxu0 %v6636_v26  ;;  %v3598_v26 = vrot.slane %v3578_v59, %v7399_v38  ;;  %v6587_v30 = vcombine.low %v3617_v58, %v3621_v21  ;;  %v3776_v59 = vld [vmem:[#allocation6 + $0x508] sm:$0xff] }
 0x2ef   :  { %7022 = vlog2.f32 %v3541_v37  ;;  %v3550_v44 = vadd.f32 1.0, %v7021_v11  ;;  %v3553_v9 = vmul.f32 -0.5, %v7021_v11  ;;  %v3545_v57 = vadd.f32 1.0, %v3544_v29  ;;  %v3733_v29 = vld [vmem:[#allocation6 + $0x3b0] sm:$0xff] }
 0x2f0   :  { %v3556_v24 = vand.u32 2147483647, %v7021_v11  ;;  %vm3548_vm2 = vcmp.lt.f32.partialorder %v3547_v61, 0.0004427343  ;;  %v6588_v37 = vcombine.high %v3617_v58, %v3621_v21  ;;  %v3788_v61 = vld [vmem:[#allocation6 + $0x568] sm:$0xff]  ;;  %v3697_v58 = vld [vmem:[#allocation6 + $0x290] sm:$0xff] }
 0x2f1   :  { %7024 = vlog2.f32 %v3550_v44  ;;  %5318 = vmatpush1.bf16.msra.mxu0 %v6635_v4  ;;  %v3554_v0 = vadd.f32 1.0, %v3553_v9  ;;  %v3546_v7 = vmul.f32 %v7019_v34, %v3545_v57  ;;  %v3737_v4 = vld [vmem:[#allocation6 + $0x3d0] sm:$0xff] }
 0x2f2   :  { %5319 = vmatprep.subr.bf16.mxu0 %v6628_v40  ;;  %vm3557_vm3 = vcmp.lt.f32.partialorder %v3556_v24, 0.0004427343  ;;  %v3725_v57 = vld [vmem:[#allocation6 + $0x370] sm:$0xff] }
 0x2f3   :  { %v3555_v35 = vmul.f32 %v7021_v11, %v3554_v0  ;;  %v3741_v11 = vld [vmem:[#allocation6 + $0x3f0] sm:$0xff]  ;;  %v6692_v2 = vcombine.high %v3721_v49, %v3725_v57 }
 0x2f4   :  { %v6708_v47 = vcombine.high %v3737_v4, %v3741_v11  ;;  %v3717_v24 = vld [vmem:[#allocation6 + $0x330] sm:$0xff] }
 0x2f5   :  { %5320 = vmatpush1.bf16.msra.mxu0 %v6627_v50  ;;  %v3701_v21 = vld [vmem:[#allocation6 + $0x2b0] sm:$0xff] }
 0x2f6   :  { %5321 = vmatprep.subr.bf16.mxu0 %v6620_v53  ;;  %v3792_v53 = vld [vmem:[#allocation6 + $0x588] sm:$0xff] }
 0x2f7   :  { %v6761_v0 = vcombine.low %v3792_v53, %v3796_v52 }
 0x2f9   :  { %5322 = vmatpush1.bf16.msra.mxu0 %v6619_v54  ;;  %v6707_v54 = vcombine.low %v3737_v4, %v3741_v11  ;;  %v3756_v4 = vld [vmem:[#allocation6 + $0x468] sm:$0xff]  ;;  %v6667_v11 = vcombine.low %v3697_v58, %v3701_v21 }
 0x2fa   :  { %5323 = vmatprep.subr.bf16.mxu0 %v6612_v23 }
 0x2fc   :  { %v7023_v25 = vpop.eup %7022 }
 0x2fd   :  { %v3543_v6 = vmul.f32 0.6931472, %v7023_v25  ;;  %5324 = vmatpush1.bf16.msra.mxu0 %v6611_v27  ;;  %v3784_v27 = vld [vmem:[#allocation6 + $0x548] sm:$0xff]  ;;  %v3713_v25 = vld [vmem:[#allocation6 + $0x310] sm:$0xff] }
 0x2fe   :  { %v7025_v1 = vpop.eup %7024  ;;  %5325 = vmatprep.subr.bf16.mxu0 %v6604_v62  ;;  %v6754_v3 = vcombine.high %v3784_v27, %v3788_v61  ;;  %v6683_v15 = vcombine.low %v3713_v25, %v3717_v24 }
 0x2ff   :  { %v3549_v18 = vsel %vm3548_vm2, %v3546_v7, %v3543_v6  ;;  %v3552_v20 = vmul.f32 0.6931472, %v7025_v1  ;;  %v3780_v6 = vld [vmem:[#allocation6 + $0x528] sm:$0xff]  ;;  %v6691_v7 = vcombine.low %v3721_v49, %v3725_v57  ;;  %v6684_v1 = vcombine.high %v3713_v25, %v3717_v24 }
 0x300   :  { %v3561_v48 = vadd.f32 %v3549_v18, %v3505_v12  ;;  %v6746_v43 = vcombine.high %v3776_v59, %v3780_v6  ;;  %v3768_v12 = vld [vmem:[#allocation6 + $0x4c8] sm:$0xff]  ;;  %v6745_v18 = vcombine.low %v3776_v59, %v3780_v6 }
 0x301   :  { %v3558_v28 = vsel %vm3557_vm3, %v3555_v35, %v3552_v20  ;;  %5326 = vmatpush1.bf16.msra.mxu0 %v6603_v8  ;;  %v6753_v8 = vcombine.low %v3784_v27, %v3788_v61  ;;  %v3868_v49 = vld [vmem:[#allocation6 + $0x7e8] sm:$0xff] }
 0x302   :  { %v3565_v32 = vmul.f32 %v3561_v48, %v7335_v19  ;;  %v3562_v34 = vadd.f32 %v3558_v28, %v3506_v22  ;;  %5327 = vmatprep.subr.bf16.mxu0 %v6596_v14  ;;  %v3729_v19 = vld [vmem:[#allocation6 + $0x390] sm:$0xff]  ;;  %v3772_v14 = vld [vmem:[#allocation6 + $0x4e8] sm:$0xff] }
 0x303   :  { %v6700_v55 = vcombine.high %v3729_v19, %v3733_v29  ;;  %v6699_v62 = vcombine.low %v3729_v19, %v3733_v29  ;;  %v6738_v35 = vcombine.high %v3768_v12, %v3772_v14  ;;  %v3760_v48 = vld [vmem:[#allocation6 + $0x488] sm:$0xff]  ;;  %v6737_v28 = vcombine.low %v3768_v12, %v3772_v14 }
 0x304   :  { %v3566_v40 = vmul.f32 %v3562_v34, %v7338_v60  ;;  %v3605_v44 = vadd.f32 %v3598_v26, %v3565_v32  ;;  %v6762_v60 = vcombine.high %v3792_v53, %v3796_v52  ;;  %v3764_v22 = vld [vmem:[#allocation6 + $0x4a8] sm:$0xff]  ;;  %v3689_v34 = vld [vmem:[#allocation6 + $0x250] sm:$0xff] }
 0x305   :  { %5328 = vmatpush1.bf16.msra.mxu0 %v6595_v13  ;;  %v6668_v13 = vcombine.high %v3697_v58, %v3701_v21  ;;  %v6730_v32 = vcombine.high %v3760_v48, %v3764_v22  ;;  %v3748_v53 = vld [vmem:[#allocation6 + $0x428] sm:$0xff] }
 0x306   :  { %5329 = vmatprep.subr.bf16.mxu0 %v6588_v37  ;;  %v3606_v42 = vadd.f32 %v3602_v46, %v3566_v40  ;;  %v3609_v50 = vmax.f32 %v3605_v44, 0.0  ;;  %v3693_v37 = vld [vmem:[#allocation6 + $0x270] sm:$0xff]  ;;  %v3752_v46 = vld [vmem:[#allocation6 + $0x448] sm:$0xff]  ;;  %v6729_v40 = vcombine.low %v3760_v48, %v3764_v22 }
 0x307   :  { %v6660_v44 = vcombine.high %v3689_v34, %v3693_v37  ;;  %v6721_v52 = vcombine.low %v3752_v46, %v3756_v4  ;;  %v3860_v25 = vld [vmem:[#allocation6 + $0x7a8] sm:$0xff] }
 0x308   :  { %v3610_v41 = vmax.f32 %v3606_v42, 0.0  ;;  %v7459_v9 = vpack.c.bf16 %v3609_v50, %v3609_v50  ;;  %v3681_v42 = vld [vmem:[#allocation6 + $0x210] sm:$0xff]  ;;  %v3744_v50 = vld [vmem:[#allocation6 + $0x408] sm:$0xff] }
 0x309   :  { %5330 = vmatpush1.bf16.msra.mxu0 %v6587_v30  ;;  %v6722_v30 = vcombine.high %v3752_v46, %v3756_v4  ;;  %v6714_v29 = vcombine.high %v3744_v50, %v3748_v53  ;;  %v6713_v27 = vcombine.low %v3744_v50, %v3748_v53  ;;  %v3844_v58 = vld [vmem:[#allocation6 + $0x728] sm:$0xff] }
 0x30a   :  { %v7457_v23 = vpack.c.bf16 %v3610_v41, %v3610_v41  ;;  %5331 = vmatprep.subr.bf16.mxu0 %v6708_v47  ;;  %v3685_v47 = vld [vmem:[#allocation6 + $0x230] sm:$0xff]  ;;  %v6659_v41 = vcombine.low %v3689_v34, %v3693_v37 }
 0x30b   :  { %v6652_v19 = vcombine.high %v3681_v42, %v3685_v47  ;;  %v6651_v57 = vcombine.low %v3681_v42, %v3685_v47 }
 0x30c   :  { %5224 = vmatprep.mubr.bf16.mxu1 %v7457_v23 }
 0x30d   :  { %5225 = vmatmul.mubr.bf16.vlgmr.msra.gmra.mxu1 %v7459_v9  ;;  %5332 = vmatpush2.bf16.msra.mxu0 %v6707_v54  ;;  %v3674_v54 = vld [vmem:[#allocation6 + $0x1d8] sm:$0xff] }
 0x30e   :  { %5275 = vmatpush1.bf16.msra.mxu1 %v6769_v51  ;;  %5306 = vmatprep.mubr.bf16.mxu1 %v7457_v23  ;;  %v3709_v51 = vld [vmem:[#allocation6 + $0x2f0] sm:$0xff] }
 0x30f   :  { %5276 = vmatprep.subr.bf16.mxu1 %v6762_v60  ;;  %5333 = vmatprep.subr.bf16.mxu0 %v6700_v55  ;;  %v6676_v20 = vcombine.high %v3705_v45, %v3709_v51  ;;  %v6675_v26 = vcombine.low %v3705_v45, %v3709_v51  ;;  %v3678_v60 = vld [vmem:[#allocation6 + $0x1f8] sm:$0xff]  ;;  %v3864_v55 = vld [vmem:[#allocation6 + $0x7c8] sm:$0xff] }
 0x310   :  { %v6646_v61 = vcombine.high %v3674_v54, %v3678_v60  ;;  %v6645_v24 = vcombine.low %v3674_v54, %v3678_v60  ;;  %v6833_v59 = vcombine.low %v3864_v55, %v3868_v49  ;;  %v3852_v45 = vld [vmem:[#allocation6 + $0x768] sm:$0xff] }
 0x311   :  { %5334 = vmatpush2.bf16.msra.mxu0 %v6699_v62  ;;  %v6834_v62 = vcombine.high %v3864_v55, %v3868_v49 }
 0x312   :  { %5277 = vmatpush1.bf16.msra.mxu1 %v6761_v0  ;;  %5335 = vmatprep.subr.bf16.mxu0 %v6692_v2  ;;  %v3666_v0 = vld [vmem:[#allocation6 + $0x198] sm:$0xff] }
 0x313   :  { %5278 = vmatprep.subr.bf16.mxu1 %v6754_v3  ;;  %v3670_v2 = vld [vmem:[#allocation6 + $0x1b8] sm:$0xff]  ;;  %v3856_v3 = vld [vmem:[#allocation6 + $0x788] sm:$0xff] }
 0x314   :  { %v6638_v6 = vcombine.high %v3666_v0, %v3670_v2  ;;  %v6637_v51 = vcombine.low %v3666_v0, %v3670_v2  ;;  %v6825_v12 = vcombine.low %v3856_v3, %v3860_v25 }
 0x315   :  { %5336 = vmatpush2.bf16.msra.mxu0 %v6691_v7  ;;  %v6826_v7 = vcombine.high %v3856_v3, %v3860_v25 }
 0x316   :  { %5279 = vmatpush1.bf16.msra.mxu1 %v6753_v8  ;;  %5337 = vmatprep.subr.bf16.mxu0 %v6684_v1  ;;  %v3658_v8 = vld [vmem:[#allocation6 + $0x158] sm:$0xff] }
 0x317   :  { %5280 = vmatprep.subr.bf16.mxu1 %v6746_v43  ;;  %v3662_v1 = vld [vmem:[#allocation6 + $0x178] sm:$0xff]  ;;  %v3848_v43 = vld [vmem:[#allocation6 + $0x748] sm:$0xff] }
 0x318   :  { %v6630_v14 = vcombine.high %v3658_v8, %v3662_v1  ;;  %v6629_v21 = vcombine.low %v3658_v8, %v3662_v1  ;;  %v6817_v48 = vcombine.low %v3848_v43, %v3852_v45 }
 0x319   :  { %5338 = vmatpush2.bf16.msra.mxu0 %v6683_v15  ;;  %v6818_v15 = vcombine.high %v3848_v43, %v3852_v45 }
 0x31a   :  { %5281 = vmatpush1.bf16.msra.mxu1 %v6745_v18  ;;  %5339 = vmatprep.subr.bf16.mxu0 %v6676_v20  ;;  %v3650_v18 = vld [vmem:[#allocation6 + $0x118] sm:$0xff] }
 0x31b   :  { %5282 = vmatprep.subr.bf16.mxu1 %v6738_v35  ;;  %v3654_v20 = vld [vmem:[#allocation6 + $0x138] sm:$0xff]  ;;  %v3840_v35 = vld [vmem:[#allocation6 + $0x708] sm:$0xff] }
 0x31c   :  { %v6622_v22 = vcombine.high %v3650_v18, %v3654_v20  ;;  %v6621_v34 = vcombine.low %v3650_v18, %v3654_v20  ;;  %v6809_v37 = vcombine.low %v3840_v35, %v3844_v58 }
 0x31d   :  { %5340 = vmatpush2.bf16.msra.mxu0 %v6675_v26  ;;  %v6810_v26 = vcombine.high %v3840_v35, %v3844_v58 }
 0x31e   :  { %5283 = vmatpush1.bf16.msra.mxu1 %v6737_v28  ;;  %5341 = vmatprep.subr.bf16.mxu0 %v6668_v13  ;;  %v3646_v28 = vld [vmem:[#allocation6 + $0xf8] sm:$0xff]  ;;  %v3832_v13 = vld [vmem:[#allocation6 + $0x6c8] sm:$0xff] }
 0x31f   :  { %5284 = vmatprep.subr.bf16.mxu1 %v6730_v32  ;;  %v3836_v32 = vld [vmem:[#allocation6 + $0x6e8] sm:$0xff] }
 0x320   :  { %v6802_v4 = vcombine.high %v3832_v13, %v3836_v32  ;;  %v6801_v47 = vcombine.low %v3832_v13, %v3836_v32 }
 0x321   :  { %5342 = vmatpush2.bf16.msra.mxu0 %v6667_v11  ;;  %v3634_v11 = vld [vmem:[#allocation6 + $0x98] sm:$0xff] }
 0x322   :  { %5285 = vmatpush1.bf16.msra.mxu1 %v6729_v40  ;;  %5343 = vmatprep.subr.bf16.mxu0 %v6660_v44  ;;  %v3638_v40 = vld [vmem:[#allocation6 + $0xb8] sm:$0xff]  ;;  %v3824_v44 = vld [vmem:[#allocation6 + $0x688] sm:$0xff] }
 0x323   :  { %5286 = vmatprep.subr.bf16.mxu1 %v6722_v30  ;;  %v3828_v30 = vld [vmem:[#allocation6 + $0x6a8] sm:$0xff]  ;;  %v6606_v50 = vcombine.high %v3634_v11, %v3638_v40  ;;  %v6605_v54 = vcombine.low %v3634_v11, %v3638_v40 }
 0x324   :  { %v6794_v53 = vcombine.high %v3824_v44, %v3828_v30  ;;  %v6793_v60 = vcombine.low %v3824_v44, %v3828_v30 }
 0x325   :  { %5344 = vmatpush2.bf16.msra.mxu0 %v6659_v41  ;;  %v3626_v41 = vld [vmem:[#allocation6 + $0x58] sm:$0xff] }
 0x326   :  { %5287 = vmatpush1.bf16.msra.mxu1 %v6721_v52  ;;  %5345 = vmatprep.subr.bf16.mxu0 %v6652_v19  ;;  %v3630_v52 = vld [vmem:[#allocation6 + $0x78] sm:$0xff]  ;;  %v3816_v19 = vld [vmem:[#allocation6 + $0x648] sm:$0xff] }
 0x327   :  { %5288 = vmatprep.subr.bf16.mxu1 %v6714_v29  ;;  %v3820_v29 = vld [vmem:[#allocation6 + $0x668] sm:$0xff]  ;;  %v6598_v55 = vcombine.high %v3626_v41, %v3630_v52  ;;  %v6597_v0 = vcombine.low %v3626_v41, %v3630_v52 }
 0x328   :  { %v6786_v49 = vcombine.high %v3816_v19, %v3820_v29  ;;  %v6785_v2 = vcombine.low %v3816_v19, %v3820_v29 }
 0x329   :  { %5346 = vmatpush2.bf16.msra.mxu0 %v6651_v57  ;;  %v3618_v57 = vld [vmem:[#allocation6 + $0x18] sm:$0xff] }
 0x32a   :  { %5289 = vmatpush1.bf16.msra.mxu1 %v6713_v27  ;;  %5397 = vmatprep.subr.bf16.mxu0 %v6646_v61  ;;  %v3622_v27 = vld [vmem:[#allocation6 + $0x38] sm:$0xff]  ;;  %v3808_v61 = vld [vmem:[#allocation6 + $0x608] sm:$0xff] }
 0x32b   :  { %5290 = vmatprep.subr.bf16.mxu1 %v6834_v62  ;;  %v3812_v62 = vld [vmem:[#allocation6 + $0x628] sm:$0xff]  ;;  %v6590_v3 = vcombine.high %v3618_v57, %v3622_v27  ;;  %v6589_v8 = vcombine.low %v3618_v57, %v3622_v27 }
 0x32c   :  { %5348 = vmatmul.mubr.bf16.vlgmr.msra.gmra.mxu0 %v7415_v10  ;;  %v6778_v25 = vcombine.high %v3808_v61, %v3812_v62  ;;  %v6777_v1 = vcombine.low %v3808_v61, %v3812_v62 }
 0x32d   :  { %5398 = vmatpush1.bf16.msra.mxu0 %v6645_v24  ;;  %5429 = vmatprep.mubr.bf16.mxu0 %v7413_v31  ;;  %v3642_v31 = vld [vmem:[#allocation6 + $0xd8] sm:$0xff] }
 0x32e   :  { %5291 = vmatpush2.bf16.msra.mxu1 %v6833_v59  ;;  %5399 = vmatprep.subr.bf16.mxu0 %v6638_v6  ;;  %v6614_v46 = vcombine.high %v3642_v31, %v3646_v28  ;;  %v6613_v42 = vcombine.low %v3642_v31, %v3646_v28  ;;  %v3738_v24 = vld [vmem:[#allocation6 + $0x3d8] sm:$0xff]  ;;  %v3801_v6 = vld [vmem:[#allocation6 + $0x5d0] sm:$0xff] }
 0x32f   :  { %5292 = vmatprep.subr.bf16.mxu1 %v6826_v7  ;;  %v3742_v59 = vld [vmem:[#allocation6 + $0x3f8] sm:$0xff]  ;;  %v3805_v7 = vld [vmem:[#allocation6 + $0x5f0] sm:$0xff] }
 0x330   :  { %v6710_v43 = vcombine.high %v3738_v24, %v3742_v59  ;;  %v6772_v45 = vcombine.high %v3801_v6, %v3805_v7  ;;  %v6709_v18 = vcombine.low %v3738_v24, %v3742_v59  ;;  %v6771_v20 = vcombine.low %v3801_v6, %v3805_v7 }
 0x331   :  { %5400 = vmatpush1.bf16.msra.mxu0 %v6637_v51  ;;  %v3793_v51 = vld [vmem:[#allocation6 + $0x590] sm:$0xff] }
 0x332   :  { %5293 = vmatpush2.bf16.msra.mxu1 %v6825_v12  ;;  %5401 = vmatprep.subr.bf16.mxu0 %v6630_v14  ;;  %v3797_v12 = vld [vmem:[#allocation6 + $0x5b0] sm:$0xff]  ;;  %v3730_v14 = vld [vmem:[#allocation6 + $0x398] sm:$0xff] }
 0x333   :  { %5294 = vmatprep.subr.bf16.mxu1 %v6818_v15  ;;  %v3734_v15 = vld [vmem:[#allocation6 + $0x3b8] sm:$0xff]  ;;  %v6764_v35 = vcombine.high %v3793_v51, %v3797_v12  ;;  %v6763_v28 = vcombine.low %v3793_v51, %v3797_v12 }
 0x334   :  { %v6702_v58 = vcombine.high %v3730_v14, %v3734_v15  ;;  %v6701_v31 = vcombine.low %v3730_v14, %v3734_v15 }
 0x335   :  { %5402 = vmatpush1.bf16.msra.mxu0 %v6629_v21  ;;  %v3722_v21 = vld [vmem:[#allocation6 + $0x358] sm:$0xff] }
 0x336   :  { %5295 = vmatpush2.bf16.msra.mxu1 %v6817_v48  ;;  %5403 = vmatprep.subr.bf16.mxu0 %v6622_v22  ;;  %v3726_v48 = vld [vmem:[#allocation6 + $0x378] sm:$0xff]  ;;  %v3785_v22 = vld [vmem:[#allocation6 + $0x550] sm:$0xff] }
 0x337   :  { %5296 = vmatprep.subr.bf16.mxu1 %v6810_v26  ;;  %v3789_v26 = vld [vmem:[#allocation6 + $0x570] sm:$0xff]  ;;  %v6694_v13 = vcombine.high %v3722_v21, %v3726_v48  ;;  %v6693_v11 = vcombine.low %v3722_v21, %v3726_v48 }
 0x338   :  { %v6756_v32 = vcombine.high %v3785_v22, %v3789_v26  ;;  %v6755_v40 = vcombine.low %v3785_v22, %v3789_v26  ;;  %v3857_v48 = vld [vmem:[#allocation6 + $0x790] sm:$0xff] }
 0x339   :  { %5404 = vmatpush1.bf16.msra.mxu0 %v6621_v34  ;;  %v3714_v34 = vld [vmem:[#allocation6 + $0x318] sm:$0xff]  ;;  %v3861_v22 = vld [vmem:[#allocation6 + $0x7b0] sm:$0xff] }
 0x33a   :  { %5297 = vmatpush2.bf16.msra.mxu1 %v6809_v37  ;;  %5405 = vmatprep.subr.bf16.mxu0 %v6614_v46  ;;  %v3718_v37 = vld [vmem:[#allocation6 + $0x338] sm:$0xff]  ;;  %v3777_v46 = vld [vmem:[#allocation6 + $0x510] sm:$0xff] }
 0x33b   :  { %5298 = vmatprep.subr.bf16.mxu1 %v6802_v4  ;;  %v3781_v4 = vld [vmem:[#allocation6 + $0x530] sm:$0xff]  ;;  %v6686_v44 = vcombine.high %v3714_v34, %v3718_v37  ;;  %v6685_v41 = vcombine.low %v3714_v34, %v3718_v37  ;;  %v6827_v37 = vcombine.low %v3857_v48, %v3861_v22 }
 0x33c   :  { %v6748_v30 = vcombine.high %v3777_v46, %v3781_v4  ;;  %v6747_v52 = vcombine.low %v3777_v46, %v3781_v4 }
 0x33d   :  { %5406 = vmatpush1.bf16.msra.mxu0 %v6613_v42  ;;  %v3706_v42 = vld [vmem:[#allocation6 + $0x2d8] sm:$0xff] }
 0x33e   :  { %5299 = vmatpush2.bf16.msra.mxu1 %v6801_v47  ;;  %5407 = vmatprep.subr.bf16.mxu0 %v6606_v50  ;;  %v3710_v47 = vld [vmem:[#allocation6 + $0x2f8] sm:$0xff]  ;;  %v3769_v50 = vld [vmem:[#allocation6 + $0x4d0] sm:$0xff] }
 0x33f   :  { %5300 = vmatprep.subr.bf16.mxu1 %v6794_v53  ;;  %v3773_v53 = vld [vmem:[#allocation6 + $0x4f0] sm:$0xff]  ;;  %v6678_v19 = vcombine.high %v3706_v42, %v3710_v47  ;;  %v6677_v57 = vcombine.low %v3706_v42, %v3710_v47 }
 0x340   :  { %v6740_v29 = vcombine.high %v3769_v50, %v3773_v53  ;;  %v6739_v27 = vcombine.low %v3769_v50, %v3773_v53  ;;  %v3833_v47 = vld [vmem:[#allocation6 + $0x6d0] sm:$0xff] }
 0x341   :  { %5408 = vmatpush1.bf16.msra.mxu0 %v6605_v54  ;;  %v3698_v54 = vld [vmem:[#allocation6 + $0x298] sm:$0xff] }
 0x342   :  { %5301 = vmatpush2.bf16.msra.mxu1 %v6793_v60  ;;  %5409 = vmatprep.subr.bf16.mxu0 %v6598_v55  ;;  %v3702_v60 = vld [vmem:[#allocation6 + $0x2b8] sm:$0xff]  ;;  %v3761_v55 = vld [vmem:[#allocation6 + $0x490] sm:$0xff] }
 0x343   :  { %5302 = vmatprep.subr.bf16.mxu1 %v6786_v49  ;;  %v3765_v49 = vld [vmem:[#allocation6 + $0x4b0] sm:$0xff]  ;;  %v6670_v61 = vcombine.high %v3698_v54, %v3702_v60  ;;  %v6669_v24 = vcombine.low %v3698_v54, %v3702_v60 }
 0x344   :  { %v6732_v62 = vcombine.high %v3761_v55, %v3765_v49  ;;  %v6731_v59 = vcombine.low %v3761_v55, %v3765_v49  ;;  %v3817_v54 = vld [vmem:[#allocation6 + $0x650] sm:$0xff] }
 0x345   :  { %5410 = vmatpush1.bf16.msra.mxu0 %v6597_v0  ;;  %v3690_v0 = vld [vmem:[#allocation6 + $0x258] sm:$0xff]  ;;  %v3821_v60 = vld [vmem:[#allocation6 + $0x670] sm:$0xff] }
 0x346   :  { %5303 = vmatpush2.bf16.msra.mxu1 %v6785_v2  ;;  %5411 = vmatprep.subr.bf16.mxu0 %v6590_v3  ;;  %v3694_v2 = vld [vmem:[#allocation6 + $0x278] sm:$0xff]  ;;  %v3753_v3 = vld [vmem:[#allocation6 + $0x450] sm:$0xff]  ;;  %v6788_v49 = vcombine.high %v3817_v54, %v3821_v60 }
 0x347   :  { %5304 = vmatprep.subr.bf16.mxu1 %v6778_v25  ;;  %v3757_v25 = vld [vmem:[#allocation6 + $0x470] sm:$0xff]  ;;  %v6662_v6 = vcombine.high %v3690_v0, %v3694_v2  ;;  %v6661_v51 = vcombine.low %v3690_v0, %v3694_v2  ;;  %v3802_v0 = vld [vmem:[#allocation6 + $0x5d8] sm:$0xff] }
 0x348   :  { %v6724_v7 = vcombine.high %v3753_v3, %v3757_v25  ;;  %v6723_v12 = vcombine.low %v3753_v3, %v3757_v25  ;;  %v3806_v2 = vld [vmem:[#allocation6 + $0x5f8] sm:$0xff] }
 0x349   :  { %5412 = vmatpush1.bf16.msra.mxu0 %v6589_v8  ;;  %v3682_v8 = vld [vmem:[#allocation6 + $0x218] sm:$0xff]  ;;  %v6774_v25 = vcombine.high %v3802_v0, %v3806_v2 }
 0x34a   :  { %5305 = vmatpush2.bf16.msra.mxu1 %v6777_v1  ;;  %5413 = vmatprep.subr.bf16.mxu0 %v6710_v43  ;;  %v3686_v1 = vld [vmem:[#allocation6 + $0x238] sm:$0xff]  ;;  %v3745_v43 = vld [vmem:[#allocation6 + $0x410] sm:$0xff] }
 0x34b   :  { %5356 = vmatprep.subr.bf16.mxu1 %v6772_v45  ;;  %v3749_v45 = vld [vmem:[#allocation6 + $0x430] sm:$0xff]  ;;  %v6654_v14 = vcombine.high %v3682_v8, %v3686_v1 }
 0x34c   :  { %v6716_v15 = vcombine.high %v3745_v43, %v3749_v45 }
 0x34d   :  { %5307 = vmatmul.mubr.bf16.vlgmr.msra.gmra.mxu1 %v7459_v9  ;;  %5414 = vmatpush2.bf16.msra.mxu0 %v6709_v18  ;;  %v3865_v18 = vld [vmem:[#allocation6 + $0x7d0] sm:$0xff] }
 0x34e   :  { %5357 = vmatpush1.bf16.msra.mxu1 %v6771_v20  ;;  %5388 = vmatprep.mubr.bf16.mxu1 %v7457_v23  ;;  %v3869_v20 = vld [vmem:[#allocation6 + $0x7f0] sm:$0xff] }
 0x34f   :  { %5358 = vmatprep.subr.bf16.mxu1 %v6764_v35  ;;  %5415 = vmatprep.subr.bf16.mxu0 %v6702_v58  ;;  %v6653_v35 = vcombine.low %v3682_v8, %v3686_v1  ;;  %v6715_v58 = vcombine.low %v3745_v43, %v3749_v45  ;;  %v6836_v21 = vcombine.high %v3865_v18, %v3869_v20  ;;  %v3786_v8 = vld [vmem:[#allocation6 + $0x558] sm:$0xff] }
 0x350   :  { %v6835_v26 = vcombine.low %v3865_v18, %v3869_v20  ;;  %v3790_v1 = vld [vmem:[#allocation6 + $0x578] sm:$0xff] }
 0x351   :  { %5416 = vmatpush2.bf16.msra.mxu0 %v6701_v31  ;;  %v6828_v31 = vcombine.high %v3857_v48, %v3861_v22  ;;  %v6758_v45 = vcombine.high %v3786_v8, %v3790_v1  ;;  %v3770_v18 = vld [vmem:[#allocation6 + $0x4d8] sm:$0xff] }
 0x352   :  { %5359 = vmatpush1.bf16.msra.mxu1 %v6763_v28  ;;  %5417 = vmatprep.subr.bf16.mxu0 %v6694_v13  ;;  %v3849_v13 = vld [vmem:[#allocation6 + $0x750] sm:$0xff]  ;;  %v3774_v20 = vld [vmem:[#allocation6 + $0x4f8] sm:$0xff] }
 0x353   :  { %5360 = vmatprep.subr.bf16.mxu1 %v6756_v32  ;;  %v3853_v32 = vld [vmem:[#allocation6 + $0x770] sm:$0xff]  ;;  %v3766_v48 = vld [vmem:[#allocation6 + $0x4b8] sm:$0xff]  ;;  %v6741_v22 = vcombine.low %v3770_v18, %v3774_v20 }
 0x354   :  { %v6820_v46 = vcombine.high %v3849_v13, %v3853_v32 }
 0x355   :  { %5418 = vmatpush2.bf16.msra.mxu0 %v6693_v11  ;;  %v3841_v11 = vld [vmem:[#allocation6 + $0x710] sm:$0xff] }
 0x356   :  { %5361 = vmatpush1.bf16.msra.mxu1 %v6755_v40  ;;  %5419 = vmatprep.subr.bf16.mxu0 %v6686_v44  ;;  %v3845_v40 = vld [vmem:[#allocation6 + $0x730] sm:$0xff] }
 0x357   :  { %5362 = vmatprep.subr.bf16.mxu1 %v6748_v30  ;;  %v6819_v30 = vcombine.low %v3849_v13, %v3853_v32  ;;  %v6812_v42 = vcombine.high %v3841_v11, %v3845_v40  ;;  %v6811_v50 = vcombine.low %v3841_v11, %v3845_v40  ;;  %v3866_v40 = vld [vmem:[#allocation6 + $0x7d8] sm:$0xff] }
 0x359   :  { %5420 = vmatpush2.bf16.msra.mxu0 %v6685_v41  ;;  %v3825_v41 = vld [vmem:[#allocation6 + $0x690] sm:$0xff] }
 0x35a   :  { %5363 = vmatpush1.bf16.msra.mxu1 %v6747_v52  ;;  %5421 = vmatprep.subr.bf16.mxu0 %v6678_v19  ;;  %v3829_v52 = vld [vmem:[#allocation6 + $0x6b0] sm:$0xff] }
 0x35b   :  { %5364 = vmatprep.subr.bf16.mxu1 %v6740_v29  ;;  %v6796_v29 = vcombine.high %v3825_v41, %v3829_v52  ;;  %v6795_v55 = vcombine.low %v3825_v41, %v3829_v52  ;;  %v3850_v52 = vld [vmem:[#allocation6 + $0x758] sm:$0xff] }
 0x35d   :  { %5422 = vmatpush2.bf16.msra.mxu0 %v6677_v57  ;;  %v3809_v57 = vld [vmem:[#allocation6 + $0x610] sm:$0xff] }
 0x35e   :  { %5365 = vmatpush1.bf16.msra.mxu1 %v6739_v27  ;;  %5423 = vmatprep.subr.bf16.mxu0 %v6670_v61  ;;  %v3813_v27 = vld [vmem:[#allocation6 + $0x630] sm:$0xff]  ;;  %v6787_v61 = vcombine.low %v3817_v54, %v3821_v60 }
 0x35f   :  { %5366 = vmatprep.subr.bf16.mxu1 %v6732_v62  ;;  %v6780_v62 = vcombine.high %v3809_v57, %v3813_v27  ;;  %v6779_v3 = vcombine.low %v3809_v57, %v3813_v27  ;;  %v3846_v57 = vld [vmem:[#allocation6 + $0x738] sm:$0xff] }
 0x361   :  { %5424 = vmatpush2.bf16.msra.mxu0 %v6669_v24  ;;  %v3794_v24 = vld [vmem:[#allocation6 + $0x598] sm:$0xff] }
 0x362   :  { %5367 = vmatpush1.bf16.msra.mxu1 %v6731_v59  ;;  %5425 = vmatprep.subr.bf16.mxu0 %v6662_v6  ;;  %v3798_v59 = vld [vmem:[#allocation6 + $0x5b8] sm:$0xff]  ;;  %v6773_v6 = vcombine.low %v3802_v0, %v3806_v2 }
 0x363   :  { %5368 = vmatprep.subr.bf16.mxu1 %v6724_v7  ;;  %v6766_v7 = vcombine.high %v3794_v24, %v3798_v59  ;;  %v6765_v43 = vcombine.low %v3794_v24, %v3798_v59  ;;  %v6916_v0 = vld [vmem:[#allocation9 + $0x74] ss:$8 sps:$4 sm:$0xff]   ;;  %v6917_v59 = vld [vmem:[#allocation9 + $0x60] ss:$8 sps:$4 sm:$0xff]  }
 0x364   :  { %v3838_v24 = vld [vmem:[#allocation6 + $0x6f8] sm:$0xff] }
 0x365   :  { %5426 = vmatpush2.bf16.msra.mxu0 %v6661_v51  ;;  %v3778_v51 = vld [vmem:[#allocation6 + $0x518] sm:$0xff] }
 0x366   :  { %5369 = vmatpush1.bf16.msra.mxu1 %v6723_v12  ;;  %5427 = vmatprep.subr.bf16.mxu0 %v6654_v14  ;;  %v3782_v12 = vld [vmem:[#allocation6 + $0x538] sm:$0xff]  ;;  %v6757_v14 = vcombine.low %v3786_v8, %v3790_v1 }
 0x367   :  { %5370 = vmatprep.subr.bf16.mxu1 %v6716_v15  ;;  %v6750_v15 = vcombine.high %v3778_v51, %v3782_v12  ;;  %v3826_v8 = vld [vmem:[#allocation6 + $0x698] sm:$0xff] }
 0x368   :  { %v3830_v1 = vld [vmem:[#allocation6 + $0x6b8] sm:$0xff] }
 0x369   :  { %5428 = vmatpush2.bf16.msra.mxu0 %v6653_v35  ;;  %v6749_v35 = vcombine.low %v3778_v51, %v3782_v12  ;;  %v3818_v51 = vld [vmem:[#allocation6 + $0x658] sm:$0xff] }
 0x36a   :  { %5371 = vmatpush1.bf16.msra.mxu1 %v6715_v58  ;;  %v6742_v58 = vcombine.high %v3770_v18, %v3774_v20  ;;  %6017 = vmatprep.subr.bf16.mxu0 %v6916_v0  ;;  %v3822_v12 = vld [vmem:[#allocation6 + $0x678] sm:$0xff]  ;;  %v6955_v0 = vld [vmem:[#allocation9 + $0xa4] ss:$8 sps:$4 sm:$0xff]  }
 0x36b   :  { %5372 = vmatprep.subr.bf16.mxu1 %v6836_v21  ;;  %v3762_v21 = vld [vmem:[#allocation6 + $0x498] sm:$0xff] }
 0x36c   :  { %5430 = vmatmul.mubr.bf16.vlgmr.msra.gmra.mxu0 %v7415_v10  ;;  %v7472_v28 = vpop.f32.mrf.mxu0  ;;  %v3837_v10 = vld [vmem:[#allocation6 + $0x6f0] sm:$0xff]  ;;  %v6733_v13 = vcombine.low %v3762_v21, %v3766_v48  ;;  %v3810_v18 = vld [vmem:[#allocation6 + $0x618] sm:$0xff] }
 0x36d   :  { %v6804_v53 = vcombine.high %v3833_v47, %v3837_v10  ;;  %v6803_v19 = vcombine.low %v3833_v47, %v3837_v10  ;;  %v3858_v47 = vld [vmem:[#allocation6 + $0x798] sm:$0xff] }
 0x36e   :  { %5373 = vmatpush2.bf16.msra.mxu1 %v6835_v26  ;;  %v7474_v34 = vpop.f32.mrf.mxu0  ;;  %v3754_v26 = vld [vmem:[#allocation6 + $0x458] sm:$0xff] }
 0x36f   :  { %5374 = vmatprep.subr.bf16.mxu1 %v6828_v31  ;;  %v3758_v31 = vld [vmem:[#allocation6 + $0x478] sm:$0xff] }
 0x370   :  { %v5189_v4 = vpop.f32.mrf.mxu0  ;;  %v6726_v32 = vcombine.high %v3754_v26, %v3758_v31  ;;  %v3862_v10 = vld [vmem:[#allocation6 + $0x7b8] sm:$0xff] }
 0x371   :  { %v6725_v4 = vcombine.low %v3754_v26, %v3758_v31  ;;  %v6829_v54 = vcombine.low %v3858_v47, %v3862_v10  ;;  %v3814_v20 = vld [vmem:[#allocation6 + $0x638] sm:$0xff] }
 0x372   :  { %5375 = vmatpush2.bf16.msra.mxu1 %v6827_v37  ;;  %v5190_v44 = vpop.f32.mrf.mxu0  ;;  %v3746_v37 = vld [vmem:[#allocation6 + $0x418] sm:$0xff] }
 0x373   :  { %5376 = vmatprep.subr.bf16.mxu1 %v6820_v46  ;;  %v3750_v46 = vld [vmem:[#allocation6 + $0x438] sm:$0xff] }
 0x374   :  { %v6718_v11 = vcombine.high %v3746_v37, %v3750_v46  ;;  %v3870_v44 = vld [vmem:[#allocation6 + $0x7f8] sm:$0xff] }
 0x376   :  { %5377 = vmatpush2.bf16.msra.mxu1 %v6819_v30  ;;  %v6717_v30 = vcombine.low %v3746_v37, %v3750_v46  ;;  %v6928_v46 = vld [vmem:[#allocation9 + $0x34] ss:$8 sps:$4 sm:$0xff]  }
 0x377   :  { %5378 = vmatprep.subr.bf16.mxu1 %v6812_v42  ;;  %v6838_v42 = vcombine.high %v3866_v40, %v3870_v44 }
 0x37a   :  { %5379 = vmatpush2.bf16.msra.mxu1 %v6811_v50  ;;  %v6837_v50 = vcombine.low %v3866_v40, %v3870_v44  ;;  %v6929_v40 = vld [vmem:[#allocation9 + $0x20] ss:$8 sps:$4 sm:$0xff]   ;;  %v6932_v44 = vld [vmem:[#allocation9 + $0x10] ss:$8 sps:$4 sm:$0xff]  }
 0x37b   :  { %5380 = vmatprep.subr.bf16.mxu1 %v6804_v53  ;;  %v6830_v53 = vcombine.high %v3858_v47, %v3862_v10  ;;  %v6940_v47 = vld [vmem:[#allocation9 + $0xf4] ss:$8 sps:$4 sm:$0xff]   ;;  %v6938_v10 = vld [vmem:[#allocation9 + $0xf0] ss:$8 sps:$4 sm:$0xff]  }
 0x37e   :  { %5381 = vmatpush2.bf16.msra.mxu1 %v6803_v19  ;;  %v3854_v19 = vld [vmem:[#allocation6 + $0x778] sm:$0xff] }
 0x37f   :  { %5382 = vmatprep.subr.bf16.mxu1 %v6796_v29  ;;  %v6822_v60 = vcombine.high %v3850_v52, %v3854_v19 }
 0x382   :  { %5383 = vmatpush2.bf16.msra.mxu1 %v6795_v55 }
 0x383   :  { %5384 = vmatprep.subr.bf16.mxu1 %v6788_v49  ;;  %v3842_v49 = vld [vmem:[#allocation6 + $0x718] sm:$0xff] }
 0x384   :  { %v6814_v2 = vcombine.high %v3842_v49, %v3846_v57 }
 0x386   :  { %5385 = vmatpush2.bf16.msra.mxu1 %v6787_v61  ;;  %v6821_v61 = vcombine.low %v3850_v52, %v3854_v19  ;;  %v6946_v19 = vld [vmem:[#allocation9 + $0xd4] ss:$8 sps:$4 sm:$0xff]  }
 0x387   :  { %5386 = vmatprep.subr.bf16.mxu1 %v6780_v62  ;;  %v6914_v62 = vld [vmem:[#allocation9 + $0x70] ss:$8 sps:$4 sm:$0xff]  }
 0x388   :  { %6018 = vmatpush1.bf16.msra.mxu0 %v6914_v62  ;;  %v6950_v62 = vld [vmem:[#allocation9 + $0xb0] ss:$8 sps:$4 sm:$0xff]  }
 0x38a   :  { %5387 = vmatpush2.bf16.msra.mxu1 %v6779_v3  ;;  %v6919_v3 = vld [vmem:[#allocation9 + $0x64] ss:$8 sps:$4 sm:$0xff]  }
 0x38b   :  { %5438 = vmatprep.subr.bf16.mxu1 %v6774_v25  ;;  %v3834_v25 = vld [vmem:[#allocation6 + $0x6d8] sm:$0xff]  ;;  %6019 = vmatprep.subr.bf16.mxu0 %v6919_v3 }
 0x38c   :  { %6020 = vmatpush1.bf16.msra.mxu0 %v6917_v59  ;;  %v6958_v3 = vld [vmem:[#allocation9 + $0x94] ss:$8 sps:$4 sm:$0xff]   ;;  %v6959_v59 = vld [vmem:[#allocation9 + $0x80] ss:$8 sps:$4 sm:$0xff]  }
 0x38d   :  { %5389 = vmatmul.mubr.bf16.vlgmr.msra.gmra.mxu1 %v7459_v9 }
 0x38e   :  { %5439 = vmatpush1.bf16.msra.mxu1 %v6773_v6  ;;  %5470 = vmatprep.mubr.bf16.mxu1 %v7457_v23  ;;  %v6734_v23 = vcombine.high %v3762_v21, %v3766_v48  ;;  %v6813_v6 = vcombine.low %v3842_v49, %v3846_v57  ;;  %v6781_v21 = vcombine.low %v3810_v18, %v3814_v20  ;;  %v6922_v48 = vld [vmem:[#allocation9 + $0x54] ss:$8 sps:$4 sm:$0xff]   ;;  %v6949_v49 = vld [vmem:[#allocation9 + $0xc4] ss:$8 sps:$4 sm:$0xff]  }
 0x38f   :  { %5440 = vmatprep.subr.bf16.mxu1 %v6766_v7  ;;  %v6806_v7 = vcombine.high %v3834_v25, %v3838_v24  ;;  %6021 = vmatprep.subr.bf16.mxu0 %v6922_v48  ;;  %v6977_v48 = vld [vmem:[#allocation9 + $0x120] ss:$8 sps:$4 sm:$0xff]  }
 0x392   :  { %5441 = vmatpush1.bf16.msra.mxu1 %v6765_v43  ;;  %v6805_v43 = vcombine.low %v3834_v25, %v3838_v24  ;;  %v6956_v25 = vld [vmem:[#allocation9 + $0x90] ss:$8 sps:$4 sm:$0xff]   ;;  %v6961_v24 = vld [vmem:[#allocation9 + $0x84] ss:$8 sps:$4 sm:$0xff]  }
 0x393   :  { %5442 = vmatprep.subr.bf16.mxu1 %v6758_v45  ;;  %v6798_v45 = vcombine.high %v3826_v8, %v3830_v1 }
 0x396   :  { %5443 = vmatpush1.bf16.msra.mxu1 %v6757_v14  ;;  %v6797_v14 = vcombine.low %v3826_v8, %v3830_v1  ;;  %v6967_v8 = vld [vmem:[#allocation9 + $0x164] ss:$8 sps:$4 sm:$0xff]   ;;  %v6965_v1 = vld [vmem:[#allocation9 + $0x160] ss:$8 sps:$4 sm:$0xff]  }
 0x397   :  { %5444 = vmatprep.subr.bf16.mxu1 %v6750_v15  ;;  %v6790_v15 = vcombine.high %v3818_v51, %v3822_v12 }
 0x39a   :  { %5445 = vmatpush1.bf16.msra.mxu1 %v6749_v35  ;;  %v6789_v35 = vcombine.low %v3818_v51, %v3822_v12  ;;  %v6968_v51 = vld [vmem:[#allocation9 + $0x150] ss:$8 sps:$4 sm:$0xff]  }
 0x39b   :  { %5446 = vmatprep.subr.bf16.mxu1 %v6742_v58  ;;  %v6782_v58 = vcombine.high %v3810_v18, %v3814_v20  ;;  %v6971_v18 = vld [vmem:[#allocation9 + $0x140] ss:$8 sps:$4 sm:$0xff]  }
 0x39e   :  { %5447 = vmatpush1.bf16.msra.mxu1 %v6741_v22 }
 0x39f   :  { %5448 = vmatprep.subr.bf16.mxu1 %v6734_v23  ;;  %v6920_v23 = vld [vmem:[#allocation9 + $0x50] ss:$8 sps:$4 sm:$0xff]  }
 0x3a0   :  { %6022 = vmatpush1.bf16.msra.mxu0 %v6920_v23  ;;  %v6982_v23 = vld [vmem:[#allocation9 + $0x114] ss:$8 sps:$4 sm:$0xff]  }
 0x3a2   :  { %5449 = vmatpush1.bf16.msra.mxu1 %v6733_v13  ;;  %v6925_v13 = vld [vmem:[#allocation9 + $0x44] ss:$8 sps:$4 sm:$0xff]  }
 0x3a3   :  { %5450 = vmatprep.subr.bf16.mxu1 %v6726_v32  ;;  %v6923_v32 = vld [vmem:[#allocation9 + $0x40] ss:$8 sps:$4 sm:$0xff]   ;;  %6023 = vmatprep.subr.bf16.mxu0 %v6925_v13  ;;  %v6985_v13 = vld [vmem:[#allocation9 + $0x104] ss:$8 sps:$4 sm:$0xff]  }
 0x3a4   :  { %6024 = vmatpush1.bf16.msra.mxu0 %v6923_v32  ;;  %v6983_v32 = vld [vmem:[#allocation9 + $0x100] ss:$8 sps:$4 sm:$0xff]  }
 0x3a5   :  { %6025 = vmatprep.subr.bf16.mxu0 %v6928_v46  ;;  %v6986_v46 = vld [vmem:[#allocation9 + $0x1f0] ss:$8 sps:$4 sm:$0xff]  }
 0x3a6   :  { %5451 = vmatpush1.bf16.msra.mxu1 %v6725_v4  ;;  %v6926_v4 = vld [vmem:[#allocation9 + $0x30] ss:$8 sps:$4 sm:$0xff]  }
 0x3a7   :  { %5452 = vmatprep.subr.bf16.mxu1 %v6718_v11  ;;  %v6931_v11 = vld [vmem:[#allocation9 + $0x24] ss:$8 sps:$4 sm:$0xff]  }
 0x3a8   :  { %6026 = vmatpush1.bf16.msra.mxu0 %v6926_v4  ;;  %v6991_v4 = vld [vmem:[#allocation9 + $0x1e4] ss:$8 sps:$4 sm:$0xff]  }
 0x3a9   :  { %6027 = vmatprep.subr.bf16.mxu0 %v6931_v11  ;;  %v6989_v11 = vld [vmem:[#allocation9 + $0x1e0] ss:$8 sps:$4 sm:$0xff]  }
 0x3aa   :  { %5453 = vmatpush1.bf16.msra.mxu1 %v6717_v30  ;;  %v6937_v30 = vld [vmem:[#allocation9 + $0x4] ss:$8 sps:$4 sm:$0xff]  }
 0x3ab   :  { %5454 = vmatprep.subr.bf16.mxu1 %v6838_v42  ;;  %v6935_v42 = vld [vmem:[#allocation9] ss:$8 sps:$4 sm:$0xff]  }
 0x3ac   :  { %v7478_v41 = vpop.f32.mrf.mxu0  ;;  %6028 = vmatpush1.bf16.msra.mxu0 %v6929_v40 }
 0x3ae   :  { %5455 = vmatpush2.bf16.msra.mxu1 %v6837_v50  ;;  %v7480_v29 = vpop.f32.mrf.mxu0  ;;  %v6943_v50 = vld [vmem:[#allocation9 + $0xe4] ss:$8 sps:$4 sm:$0xff]  }
 0x3af   :  { %5456 = vmatprep.subr.bf16.mxu1 %v6830_v53  ;;  %v6941_v53 = vld [vmem:[#allocation9 + $0xe0] ss:$8 sps:$4 sm:$0xff]  }
 0x3b0   :  { %v5271_v55 = vpop.f32.mrf.mxu0 }
 0x3b2   :  { %5457 = vmatpush2.bf16.msra.mxu1 %v6829_v54  ;;  %v5272_v27 = vpop.f32.mrf.mxu0 }
 0x3b3   :  { %5458 = vmatprep.subr.bf16.mxu1 %v6822_v60  ;;  %v6944_v60 = vld [vmem:[#allocation9 + $0xd0] ss:$8 sps:$4 sm:$0xff]   ;;  %v6947_v27 = vld [vmem:[#allocation9 + $0xc0] ss:$8 sps:$4 sm:$0xff]  }
 0x3b6   :  { %5459 = vmatpush2.bf16.msra.mxu1 %v6821_v61  ;;  %v6952_v61 = vld [vmem:[#allocation9 + $0xb4] ss:$8 sps:$4 sm:$0xff]  }
 0x3b7   :  { %5460 = vmatprep.subr.bf16.mxu1 %v6814_v2  ;;  %v6953_v2 = vld [vmem:[#allocation9 + $0xa0] ss:$8 sps:$4 sm:$0xff]  }
 0x3ba   :  { %5461 = vmatpush2.bf16.msra.mxu1 %v6813_v6  ;;  %v6964_v6 = vld [vmem:[#allocation9 + $0x174] ss:$8 sps:$4 sm:$0xff]  }
 0x3bb   :  { %5462 = vmatprep.subr.bf16.mxu1 %v6806_v7  ;;  %v6962_v7 = vld [vmem:[#allocation9 + $0x170] ss:$8 sps:$4 sm:$0xff]  }
 0x3be   :  { %5463 = vmatpush2.bf16.msra.mxu1 %v6805_v43 }
 0x3bf   :  { %5464 = vmatprep.subr.bf16.mxu1 %v6798_v45  ;;  %v6970_v45 = vld [vmem:[#allocation9 + $0x154] ss:$8 sps:$4 sm:$0xff]  }
 0x3c2   :  { %5465 = vmatpush2.bf16.msra.mxu1 %v6797_v14 }
 0x3c3   :  { %5466 = vmatprep.subr.bf16.mxu1 %v6790_v15  ;;  %v6973_v15 = vld [vmem:[#allocation9 + $0x144] ss:$8 sps:$4 sm:$0xff]  }
 0x3c6   :  { %5467 = vmatpush2.bf16.msra.mxu1 %v6789_v35  ;;  %v6976_v35 = vld [vmem:[#allocation9 + $0x134] ss:$8 sps:$4 sm:$0xff]  }
 0x3c7   :  { %5468 = vmatprep.subr.bf16.mxu1 %v6782_v58  ;;  %v6974_v58 = vld [vmem:[#allocation9 + $0x130] ss:$8 sps:$4 sm:$0xff]  }
 0x3ca   :  { %5469 = vmatpush2.bf16.msra.mxu1 %v6781_v21  ;;  %v6979_v21 = vld [vmem:[#allocation9 + $0x124] ss:$8 sps:$4 sm:$0xff]  }
 0x3cb   :  { %6058 = vmatprep.subr.bf16.mxu1 %v6964_v6 }
 0x3cd   :  { %5471 = vmatmul.mubr.bf16.vlgmr.msra.gmra.mxu1 %v7459_v9  ;;  %v7483_v22 = vpop.f32.mrf.mxu1  ;;  %v6934_v9 = vld [vmem:[#allocation9 + $0x14] ss:$8 sps:$4 sm:$0xff]  }
 0x3ce   :  { %6029 = vmatprep.subr.bf16.mxu0 %v6934_v9  ;;  %6059 = vmatpush1.bf16.msra.mxu1 %v6962_v7  ;;  %v6994_v9 = vld [vmem:[#allocation9 + $0x1d4] ss:$8 sps:$4 sm:$0xff]  }
 0x3cf   :  { %v7485_v26 = vpop.f32.mrf.mxu1  ;;  %6030 = vmatpush1.bf16.msra.mxu0 %v6932_v44  ;;  %6060 = vmatprep.subr.bf16.mxu1 %v6967_v8 }
 0x3d0   :  { %6031 = vmatprep.subr.bf16.mxu0 %v6937_v30  ;;  %v6992_v30 = vld [vmem:[#allocation9 + $0x1d0] ss:$8 sps:$4 sm:$0xff]  }
 0x3d1   :  { %v5230_v31 = vpop.f32.mrf.mxu1 }
 0x3d2   :  { %6061 = vmatpush1.bf16.msra.mxu1 %v6965_v1  ;;  %v6980_v31 = vld [vmem:[#allocation9 + $0x110] ss:$8 sps:$4 sm:$0xff]  }
 0x3d3   :  { %v5231_v37 = vpop.f32.mrf.mxu1  ;;  %6032 = vmatpush1.bf16.msra.mxu0 %v6935_v42  ;;  %6062 = vmatprep.subr.bf16.mxu1 %v6970_v45 }
 0x3d4   :  { %6033 = vmatprep.subr.bf16.mxu0 %v6940_v47  ;;  %v6988_v37 = vld [vmem:[#allocation9 + $0x1f4] ss:$8 sps:$4 sm:$0xff]   ;;  %v6997_v47 = vld [vmem:[#allocation9 + $0x1c4] ss:$8 sps:$4 sm:$0xff]  }
 0x3d6   :  { %6063 = vmatpush1.bf16.msra.mxu1 %v6968_v51 }
 0x3d7   :  { %6034 = vmatpush2.bf16.msra.mxu0 %v6938_v10  ;;  %6064 = vmatprep.subr.bf16.mxu1 %v6973_v15 }
 0x3d8   :  { %6035 = vmatprep.subr.bf16.mxu0 %v6943_v50  ;;  %v6995_v50 = vld [vmem:[#allocation9 + $0x1c0] ss:$8 sps:$4 sm:$0xff]  }
 0x3da   :  { %6065 = vmatpush1.bf16.msra.mxu1 %v6971_v18 }
 0x3db   :  { %6036 = vmatpush2.bf16.msra.mxu0 %v6941_v53  ;;  %6066 = vmatprep.subr.bf16.mxu1 %v6976_v35  ;;  %v7000_v53 = vld [vmem:[#allocation9 + $0x1b4] ss:$8 sps:$4 sm:$0xff]  }
 0x3dc   :  { %6037 = vmatprep.subr.bf16.mxu0 %v6946_v19  ;;  %v6998_v19 = vld [vmem:[#allocation9 + $0x1b0] ss:$8 sps:$4 sm:$0xff]  }
 0x3de   :  { %6067 = vmatpush1.bf16.msra.mxu1 %v6974_v58 }
 0x3df   :  { %6038 = vmatpush2.bf16.msra.mxu0 %v6944_v60  ;;  %6068 = vmatprep.subr.bf16.mxu1 %v6979_v21  ;;  %v7003_v60 = vld [vmem:[#allocation9 + $0x1a4] ss:$8 sps:$4 sm:$0xff]  }
 0x3e0   :  { %6039 = vmatprep.subr.bf16.mxu0 %v6949_v49  ;;  %v7006_v49 = vld [vmem:[#allocation9 + $0x194] ss:$8 sps:$4 sm:$0xff]  }
 0x3e2   :  { %6069 = vmatpush1.bf16.msra.mxu1 %v6977_v48 }
 0x3e3   :  { %6040 = vmatpush2.bf16.msra.mxu0 %v6947_v27  ;;  %6070 = vmatprep.subr.bf16.mxu1 %v6982_v23  ;;  %v7009_v27 = vld [vmem:[#allocation9 + $0x184] ss:$8 sps:$4 sm:$0xff]  }
 0x3e4   :  { %6041 = vmatprep.subr.bf16.mxu0 %v6952_v61  ;;  %v7007_v61 = vld [vmem:[#allocation9 + $0x180] ss:$8 sps:$4 sm:$0xff]  }
 0x3e6   :  { %6071 = vmatpush1.bf16.msra.mxu1 %v6980_v31 }
 0x3e7   :  { %6042 = vmatpush2.bf16.msra.mxu0 %v6950_v62  ;;  %6072 = vmatprep.subr.bf16.mxu1 %v6985_v13  ;;  %v7499_v62 = vld [vmem:[#allocation7] sm:$0xff] }
 0x3e8   :  { %6043 = vmatprep.subr.bf16.mxu0 %v6955_v0  ;;  %v5484_v0 = vrot.slane %v7499_v62, %v7363_v16 }
 0x3ea   :  { %6073 = vmatpush1.bf16.msra.mxu1 %v6983_v32 }
 0x3eb   :  { %6044 = vmatpush2.bf16.msra.mxu0 %v6953_v2  ;;  %6074 = vmatprep.subr.bf16.mxu1 %v6988_v37  ;;  %v5488_v2 = vrot.slane %v7499_v62, %v3469_v17 }
 0x3ec   :  { %v7487_v52 = vpop.f32.mrf.mxu0  ;;  %6045 = vmatprep.subr.bf16.mxu0 %v6958_v3  ;;  %v5504_v3 = vrot.slane %v5484_v0, %v7363_v16 }
 0x3ee   :  { %v7489_v54 = vpop.f32.mrf.mxu0  ;;  %6075 = vmatpush2.bf16.msra.mxu1 %v6986_v46 }
 0x3ef   :  { %6046 = vmatpush2.bf16.msra.mxu0 %v6956_v25  ;;  %6076 = vmatprep.subr.bf16.mxu1 %v6991_v4  ;;  %v5588_v4 = vrot.slane %v7499_v62, %v7399_v38 }
 0x3f0   :  { %v5353_v55 = vpop.f32.mrf.mxu0  ;;  %6047 = vmatprep.subr.bf16.mxu0 %v6961_v24 }
 0x3f1   :  { %v7001_v55 = vld [vmem:[#allocation9 + $0x1a0] ss:$8 sps:$4 sm:$0xff]  }
 0x3f2   :  { %v5354_v57 = vpop.f32.mrf.mxu0  ;;  %6077 = vmatpush2.bf16.msra.mxu1 %v6989_v11 }
 0x3f3   :  { %6048 = vmatpush2.bf16.msra.mxu0 %v6959_v59  ;;  %6078 = vmatprep.subr.bf16.mxu1 %v6994_v9  ;;  %v7004_v57 = vld [vmem:[#allocation9 + $0x190] ss:$8 sps:$4 sm:$0xff]   ;;  %v5508_v59 = vrot.slane %v5488_v2, %v7363_v16 }
 0x3f6   :  { %6079 = vmatpush2.bf16.msra.mxu1 %v6992_v30 }
 0x3f7   :  { %6080 = vmatprep.subr.bf16.mxu1 %v6997_v47  ;;  %v5592_v47 = vrot.slane %v7499_v62, %v3573_v36 }
 0x3f9   :  { %v5612_v2 = vrot.slane %v5592_v47, %v7399_v38  ;;  %v5600_v47 = vrot.slane %v7499_v62, %v3581_v63 }
 0x3fa   :  { %6081 = vmatpush2.bf16.msra.mxu1 %v6995_v50 }
 0x3fb   :  { %6082 = vmatprep.subr.bf16.mxu1 %v7000_v53  ;;  %v5620_v39 = vrot.slane %v5600_v47, %v7399_v38 }
 0x3fe   :  { %6083 = vmatpush2.bf16.msra.mxu1 %v6998_v19 }
 0x3ff   :  { %6084 = vmatprep.subr.bf16.mxu1 %v7003_v60 }
 0x402   :  { %6085 = vmatpush2.bf16.msra.mxu1 %v7001_v55 }
 0x403   :  { %6086 = vmatprep.subr.bf16.mxu1 %v7006_v49  ;;  %v5608_v49 = vrot.slane %v5588_v4, %v7399_v38  ;;  %v5596_v4 = vrot.slane %v7499_v62, %v3577_v56 }
 0x405   :  { %v5616_v56 = vrot.slane %v5596_v4, %v7399_v38 }
 0x406   :  { %6087 = vmatpush2.bf16.msra.mxu1 %v7004_v57 }
 0x407   :  { %6088 = vmatprep.subr.bf16.mxu1 %v7009_v27  ;;  %v5229_v27 = vadd.f32 %v7485_v26, %v7474_v34  ;;  %v5496_v34 = vrot.slane %v7499_v62, %v3477_v5 }
 0x40a   :  { %6089 = vmatpush2.bf16.msra.mxu1 %v7007_v61 }
 0x40d   :  { %v7491_v43 = vpop.f32.mrf.mxu1 }
 0x40f   :  { %v7493_v12 = vpop.f32.mrf.mxu1 }
 0x411   :  { %v5312_v14 = vpop.f32.mrf.mxu1 }
 0x413   :  { %v5313_v20 = vpop.f32.mrf.mxu1 }
 0x42c   :  { %v7495_v40 = vpop.f32.mrf.mxu0 }
 0x42e   :  { %v7497_v44 = vpop.f32.mrf.mxu0 }
 0x430   :  { %v5435_v42 = vpop.f32.mrf.mxu0 }
 0x432   :  { %v5436_v10 = vpop.f32.mrf.mxu0 }
 0x433   :  { %v5227_v10 = vadd.f32 %v7483_v22, %v7472_v28 }
 0x44d   :  { %v5390_v25 = vpop.f32.mrf.mxu1 }
 0x44e   :  { %v5391_v24 = vadd.f32 %v5390_v25, %v7487_v52 }
 0x44f   :  { %v5392_v6 = vpop.f32.mrf.mxu1 }
 0x450   :  { %v5517_v7 = vadd.f32 %v5504_v3, %v5391_v24  ;;  %v5393_v8 = vadd.f32 %v5392_v6, %v7489_v54  ;;  %v5492_v6 = vrot.slane %v7499_v62, %v3473_v33 }
 0x451   :  { %v5394_v1 = vpop.f32.mrf.mxu1 }
 0x452   :  { %v5525_v45 = vand.u32 2147483647, %v5517_v7  ;;  %v5518_v51 = vadd.f32 %v5508_v59, %v5393_v8  ;;  %v5521_v42 = vmax.f32 %v5517_v7, 0.0  ;;  %v5512_v26 = vrot.slane %v5492_v6, %v7363_v16 }
 0x453   :  { %v5395_v14 = vpop.f32.mrf.mxu1  ;;  %v5516_v1 = vrot.slane %v5496_v34, %v7363_v16 }
 0x454   :  { %v5529_v15 = vsub.f32 0.0, %v5525_v45  ;;  %v5526_v18 = vand.u32 2147483647, %v5518_v51  ;;  %v5522_v55 = vmax.f32 %v5518_v51, 0.0 }
 0x456   :  { %v5533_v20 = vmul.f32 1.442695, %v5529_v15  ;;  %v5530_v35 = vsub.f32 0.0, %v5526_v18 }
 0x458   :  { %7026 = vpow2.f32 %v5533_v20  ;;  %v5535_v17 = vmul.f32 1.442695, %v5530_v35 }
 0x45a   :  { %7028 = vpow2.f32 %v5535_v17 }
 0x465   :  { %v7027_v58 = vpop.eup %7026 }
 0x466   :  { %v5541_v21 = vadd.f32 1.0, %v7027_v58  ;;  %v5544_v23 = vmul.f32 -0.5, %v7027_v58  ;;  %v5547_v13 = vand.u32 2147483647, %v7027_v58 }
 0x467   :  { %v7029_v52 = vpop.eup %7028 }
 0x468   :  { %7030 = vlog2.f32 %v5541_v21  ;;  %v5550_v48 = vadd.f32 1.0, %v7029_v52  ;;  %v5553_v31 = vmul.f32 -0.5, %v7029_v52  ;;  %v5545_v54 = vadd.f32 1.0, %v5544_v23 }
 0x469   :  { %v5556_v46 = vand.u32 2147483647, %v7029_v52  ;;  %vm5548_vm4 = vcmp.lt.f32.partialorder %v5547_v13, 0.0004427343 }
 0x46a   :  { %7032 = vlog2.f32 %v5550_v48  ;;  %v5554_v32 = vadd.f32 1.0, %v5553_v31  ;;  %v5546_v9 = vmul.f32 %v7027_v58, %v5545_v54 }
 0x46b   :  { %vm5557_vm5 = vcmp.lt.f32.partialorder %v5556_v46, 0.0004427343 }
 0x46c   :  { %v5555_v19 = vmul.f32 %v7029_v52, %v5554_v32 }
 0x475   :  { %v7031_v37 = vpop.eup %7030 }
 0x476   :  { %v5543_v11 = vmul.f32 0.6931472, %v7031_v37 }
 0x477   :  { %v7033_v30 = vpop.eup %7032 }
 0x478   :  { %v5549_v50 = vsel %vm5548_vm4, %v5546_v9, %v5543_v11  ;;  %v5552_v53 = vmul.f32 0.6931472, %v7033_v30 }
 0x479   :  { %v5577_v60 = vadd.f32 %v5549_v50, %v5521_v42 }
 0x47a   :  { %v5558_v57 = vsel %vm5557_vm5, %v5555_v19, %v5552_v53 }
 0x47b   :  { %v5581_v61 = vmul.f32 %v5577_v60, %v5227_v10  ;;  %v5578_v0 = vadd.f32 %v5558_v57, %v5522_v55  ;;  %v5309_v10 = vadd.f32 %v7491_v43, %v7478_v41  ;;  %v5311_v57 = vadd.f32 %v7493_v12, %v7480_v29 }
 0x47d   :  { %v5582_v36 = vmul.f32 %v5578_v0, %v5229_v27  ;;  %v5621_v3 = vadd.f32 %v5608_v49, %v5581_v61 }
 0x47f   :  { %v5622_v25 = vadd.f32 %v5612_v2, %v5582_v36  ;;  %v5625_v28 = vmax.f32 %v5621_v3, 0.0 }
 0x481   :  { %v5626_v22 = vmax.f32 %v5622_v25, 0.0  ;;  %v5629_v59 = vpack.c.bf16 %v5625_v28, %v5625_v28 }
 0x483   :  { %v5630_v24 = vpack.c.bf16 %v5626_v22, %v5626_v22 }
 0x485   :  { %6049 = vmatprep.mubr.bf16.mxu0 %v5630_v24  ;;  %v6099_v24 = vld [vmem:[#allocation10] sm:$0x3] }
 0x486   :  { %6050 = vmatmul.mubr.bf16.vlgmr.msra.gmra.mxu0 %v5629_v59  ;;  %v6103_v29 = vrot.slane %v6099_v24, %v7363_v16 }
 0x48d   :  { %v5472_v7 = vpop.f32.mrf.mxu1 }
 0x48e   :  { %v5473_v8 = vadd.f32 %v5472_v7, %v7495_v40 }
 0x48f   :  { %v5474_v45 = vpop.f32.mrf.mxu1 }
 0x490   :  { %v5519_v51 = vadd.f32 %v5512_v26, %v5473_v8  ;;  %v5475_v14 = vadd.f32 %v5474_v45, %v7497_v44 }
 0x491   :  { %v5476_v15 = vpop.f32.mrf.mxu1 }
 0x492   :  { %v5527_v18 = vand.u32 2147483647, %v5519_v51  ;;  %v5520_v20 = vadd.f32 %v5516_v1, %v5475_v14  ;;  %v5523_v42 = vmax.f32 %v5519_v51, 0.0 }
 0x493   :  { %v5477_v35 = vpop.f32.mrf.mxu1 }
 0x494   :  { %v5531_v33 = vsub.f32 0.0, %v5527_v18  ;;  %v5528_v17 = vand.u32 2147483647, %v5520_v20  ;;  %v5524_v55 = vmax.f32 %v5520_v20, 0.0 }
 0x496   :  { %v5537_v58 = vmul.f32 1.442695, %v5531_v33  ;;  %v5532_v21 = vsub.f32 0.0, %v5528_v17 }
 0x498   :  { %7034 = vpow2.f32 %v5537_v58  ;;  %v5539_v5 = vmul.f32 1.442695, %v5532_v21 }
 0x49a   :  { %7036 = vpow2.f32 %v5539_v5 }
 0x4a5   :  { %v7035_v52 = vpop.eup %7034 }
 0x4a6   :  { %v5559_v48 = vadd.f32 1.0, %v7035_v52  ;;  %v5562_v31 = vmul.f32 -0.5, %v7035_v52  ;;  %v5565_v13 = vand.u32 2147483647, %v7035_v52 }
 0x4a7   :  { %v7037_v40 = vpop.eup %7036 }
 0x4a8   :  { %7038 = vlog2.f32 %v5559_v48  ;;  %v5568_v23 = vadd.f32 1.0, %v7037_v40  ;;  %v5571_v54 = vmul.f32 -0.5, %v7037_v40  ;;  %v5563_v44 = vadd.f32 1.0, %v5562_v31 }
 0x4a9   :  { %v5574_v46 = vand.u32 2147483647, %v7037_v40  ;;  %vm5566_vm6 = vcmp.lt.f32.partialorder %v5565_v13, 0.0004427343 }
 0x4aa   :  { %7040 = vlog2.f32 %v5568_v23  ;;  %v5572_v32 = vadd.f32 1.0, %v5571_v54  ;;  %v5564_v9 = vmul.f32 %v7035_v52, %v5563_v44  ;;  %v6124_v52 = vrot.slane %v6099_v24, %v7399_v38 }
 0x4ab   :  { %vm5575_vm7 = vcmp.lt.f32.partialorder %v5574_v46, 0.0004427343 }
 0x4ac   :  { %v5573_v19 = vmul.f32 %v7037_v40, %v5572_v32 }
 0x4b5   :  { %v7039_v37 = vpop.eup %7038 }
 0x4b6   :  { %v5561_v11 = vmul.f32 0.6931472, %v7039_v37 }
 0x4b7   :  { %v7041_v30 = vpop.eup %7040 }
 0x4b8   :  { %v5567_v50 = vsel %vm5566_vm6, %v5564_v9, %v5561_v11  ;;  %v5570_v53 = vmul.f32 0.6931472, %v7041_v30 }
 0x4b9   :  { %v5579_v60 = vadd.f32 %v5567_v50, %v5523_v42 }
 0x4ba   :  { %v5576_v49 = vsel %vm5575_vm7, %v5573_v19, %v5570_v53 }
 0x4bb   :  { %v5583_v27 = vmul.f32 %v5579_v60, %v5309_v10  ;;  %v5580_v61 = vadd.f32 %v5576_v49, %v5524_v55 }
 0x4bd   :  { %v5584_v63 = vmul.f32 %v5580_v61, %v5311_v57  ;;  %v5623_v62 = vadd.f32 %v5616_v56, %v5583_v27 }
 0x4bf   :  { %v5624_v0 = vadd.f32 %v5620_v39, %v5584_v63  ;;  %v5627_v41 = vmax.f32 %v5623_v62, 0.0 }
 0x4c1   :  { %v5628_v43 = vmax.f32 %v5624_v0, 0.0  ;;  %v5631_v36 = vpack.c.bf16 %v5627_v41, %v5627_v41 }
 0x4c3   :  { %v5632_v2 = vpack.c.bf16 %v5628_v43, %v5628_v43 }
 0x4c5   :  { %6090 = vmatprep.mubr.bf16.mxu1 %v5632_v2 }
 0x4c6   :  { %6091 = vmatmul.mubr.bf16.vlgmr.msra.gmra.mxu1 %v5631_v36 }
 0x546   :  { %v6051_v3 = vpop.f32.mrf.mxu0 }
 0x548   :  { %v6053_v25 = vpop.f32.mrf.mxu0 }
 0x54a   :  { %v6055_v28 = vpop.f32.mrf.mxu0 }
 0x54c   :  { %v6056_v22 = vpop.f32.mrf.mxu0 }
 0x586   :  { %v6092_v59 = vpop.f32.mrf.mxu1 }
 0x587   :  { %v6093_v21 = vadd.f32 %v6092_v59, %v6051_v3 }
 0x588   :  { %v6094_v12 = vpop.f32.mrf.mxu1 }
 0x589   :  { %v6095_v6 = vadd.f32 %v6094_v12, %v6053_v25 }
 0x58a   :  { %v6096_v34 = vpop.f32.mrf.mxu1 }
 0x58b   :  { %v6104_v26 = vadd.f32 %v6103_v29, %v6095_v6 }
 0x58c   :  { %v6097_v7 = vpop.f32.mrf.mxu1 }
 0x58d   :  { %v6106_v8 = vand.u32 2147483647, %v6104_v26  ;;  %v6105_v58 = vmax.f32 %v6104_v26, 0.0 }
 0x58f   :  { %v6107_v1 = vsub.f32 0.0, %v6106_v8 }
 0x591   :  { %v6108_v45 = vmul.f32 1.442695, %v6107_v1 }
 0x593   :  { %7042 = vpow2.f32 %v6108_v45 }
 0x5a0   :  { %v7043_v51 = vpop.eup %7042 }
 0x5a1   :  { %v6110_v14 = vadd.f32 1.0, %v7043_v51  ;;  %v6113_v15 = vmul.f32 -0.5, %v7043_v51  ;;  %v6116_v20 = vand.u32 2147483647, %v7043_v51 }
 0x5a3   :  { %7044 = vlog2.f32 %v6110_v14  ;;  %v6114_v18 = vadd.f32 1.0, %v6113_v15  ;;  %vm6117_vm8 = vcmp.lt.f32.partialorder %v6116_v20, 0.0004427343 }
 0x5a5   :  { %v6115_v17 = vmul.f32 %v7043_v51, %v6114_v18 }
 0x5b0   :  { %v7045_v35 = vpop.eup %7044 }
 0x5b1   :  { %v6112_v33 = vmul.f32 0.6931472, %v7045_v35 }
 0x5b3   :  { %v6118_v16 = vsel %vm6117_vm8, %v6115_v17, %v6112_v33 }
 0x5b4   :  { %v6119_v5 = vadd.f32 %v6118_v16, %v6105_v58 }
 0x5b6   :  { %v6120_v48 = vmul.f32 %v6119_v5, %v6093_v21 }
 0x5b8   :  { %v6125_v40 = vadd.f32 %v6124_v52, %v6120_v48 }
 0x5ba   :  { %6126 = vst [vmem:[%s7555_s7] sm:$0xff] %v6125_v40 }
 0x5bb   :  { %6131 = vsyncpa [#allocation3], 1 }
 0x5bc   :  { %6132 = vsyncpa [#allocation5], 1 }
 0x5bd   :  { %6133 = vsyncpa [#allocation8], 1 }
 0x5be   :  { %6134 = vsyncpa [#allocation11], 1 }

</bundles_post_ra>
